<compile_context>
chip_gen: v6e
topology: v6e:2x2x1
jax: 0.10.0
libtpu: 0.0.40
codegen_flags: <defaults>
</compile_context>

<pallas_src>
import functools
import math

import jax
import jax.numpy as jnp
import numpy as np
from jax.experimental import pallas as pl
from jax.experimental.pallas import tpu as pltpu

LANE = 128


def _round_up(x, m):
    return ((x + m - 1) // m) * m


def _pad_axis(a, axis, target):
    """Zero-pad `a` along `axis` up to size `target` (no-op if already there)."""
    pad = target - a.shape[axis]
    if pad <= 0:
        return a
    widths = [(0, 0)] * a.ndim
    widths[axis] = (0, pad)
    return jnp.pad(a, widths)


@functools.lru_cache(maxsize=None)
def _vmem_limit():
    """Per-generation scoped-VMEM limit: ~85% of physical (≈108 MiB on
    v5e/v6e, ≈54 MiB on v7x); conservative fallback if the query fails."""
    try:
        cap = getattr(pltpu.get_tpu_info(), "vmem_capacity_bytes", None)
        if cap:
            return int(cap * 0.85)
    except Exception:
        pass
    return 48 * 1024 * 1024


def _choose_tile_h(H, W, tile_h):
    """Largest divisor of H <= tile_h with TH*W a sublane multiple."""
    for mult in (16, 8):
        for th in range(min(tile_h, H), 0, -1):
            if H % th == 0 and (th * W) % mult == 0:
                return th
    return H


def _choose_tile_hw(HW, cap):
    """Largest divisor of HW <= cap that is a sublane multiple."""
    for mult in (16, 8):
        for t in range(min(cap, HW), 0, -1):
            if HW % t == 0 and t % mult == 0:
                return t
    return HW


def _make_halos(x, TH):
    """Per-row-tile halo rows.  x: (B, H, W, C) -> top/bot: (B, nT, W, C),
    where top[b, r] is row r*TH-1 (zeros for r==0) and bot[b, r] is row
    r*TH+TH (zeros for the last tile).  Cost: 2*(nT-1) rows, not a full pass."""
    B, H, W, C = x.shape
    nT = H // TH
    zero = jnp.zeros((B, 1, W, C), x.dtype)
    if nT == 1:
        return zero, zero
    top = jnp.concatenate([zero, x[:, TH - 1:H - 1:TH]], axis=1)
    bot = jnp.concatenate([x[:, TH:H:TH], zero], axis=1)
    return top, bot


# ---------------------------------------------------------------------------
# 3x3 convolution (padding=1, stride=1) + optional ReLU, row-tiled, im2col
# ---------------------------------------------------------------------------
def _conv3x3_kernel(x_ref, top_ref, bot_ref, w_ref, b_ref, o_ref,
                    slab_ref, col_ref, *, TH, W, relu, compute_dtype):
    """x_ref: (1, TH, W, Cin) row tile, top/bot_ref: (1, 1, W, Cin) halo rows,
    w_ref: (9*Cin, Cout) im2col weights, b_ref: (1, Cout),
    o_ref: (1, TH*W, Cout), slab_ref: VMEM (TH+2, W+2, Cin),
    col_ref: VMEM (TH*W, 9*Cin)."""
    cin = x_ref.shape[-1]

    # Assemble the zero-padded slab in VMEM (the halo rows for boundary tiles
    # already arrive as zeros from the wrapper; pad columns are zeroed here).
    zcol = jnp.zeros((TH + 2, 1, cin), compute_dtype)
    slab_ref[:, 0:1, :] = zcol
    slab_ref[:, W + 1:W + 2, :] = zcol
    slab_ref[0:1, 1:W + 1, :] = top_ref[0].astype(compute_dtype)
    slab_ref[TH + 1:TH + 2, 1:W + 1, :] = bot_ref[0].astype(compute_dtype)
    slab_ref[1:TH + 1, 1:W + 1, :] = x_ref[0].astype(compute_dtype)

    # im2col: 9 shifted taps side by side, then ONE (TH*W, 9*Cin)x(9*Cin, Cout)
    # MXU matmul (no per-tap accumulator read-modify-write).
    for dy in range(3):
        for dx in range(3):
            t = dy * 3 + dx
            col_ref[:, t * cin:(t + 1) * cin] = (
                slab_ref[dy:dy + TH, dx:dx + W, :].reshape(TH * W, cin))

    out = jnp.dot(col_ref[...], w_ref[...].astype(compute_dtype),
                  preferred_element_type=jnp.float32)
    out = out + b_ref[0].astype(jnp.float32)
    if relu:
        out = jnp.maximum(out, 0.0)
    o_ref[0] = out.astype(o_ref.dtype)


def conv3x3(x_nhwc, w2d, bias, *, relu, tile_h=16,
            compute_dtype=jnp.bfloat16, storage_dtype=jnp.bfloat16):
    """x_nhwc: (B, H, W, Cin) -> (B, H, W, Cout).  w2d: (9*Cin, Cout) (Cout
    should be lane-padded).  Output stored in storage_dtype (bf16 halves the
    inter-layer HBM traffic; the conv stack is HBM-bandwidth bound)."""
    B, H, W, Cin = x_nhwc.shape
    KC, Cout = w2d.shape
    assert KC == 9 * Cin, (KC, Cin)
    TH = _choose_tile_h(H, W, tile_h)
    nT = H // TH

    top, bot = _make_halos(x_nhwc, TH)
    kern = functools.partial(_conv3x3_kernel, TH=TH, W=W, relu=relu,
                             compute_dtype=compute_dtype)
    out = pl.pallas_call(
        kern,
        out_shape=jax.ShapeDtypeStruct((B, H * W, Cout), storage_dtype),
        grid_spec=pltpu.PrefetchScalarGridSpec(
            num_scalar_prefetch=0,
            grid=(B, nT),
            in_specs=[
                pl.BlockSpec((1, TH, W, Cin), lambda bi, r: (bi, r, 0, 0)),
                pl.BlockSpec((1, 1, W, Cin), lambda bi, r: (bi, r, 0, 0)),
                pl.BlockSpec((1, 1, W, Cin), lambda bi, r: (bi, r, 0, 0)),
                pl.BlockSpec((9 * Cin, Cout), lambda bi, r: (0, 0)),
                pl.BlockSpec((1, Cout), lambda bi, r: (0, 0)),
            ],
            out_specs=pl.BlockSpec((1, TH * W, Cout), lambda bi, r: (bi, r, 0)),
            scratch_shapes=[pltpu.VMEM((TH + 2, W + 2, Cin), compute_dtype),
                            pltpu.VMEM((TH * W, 9 * Cin), compute_dtype)],
        ),
        compiler_params=pltpu.CompilerParams(
            dimension_semantics=("parallel", "parallel"),
            vmem_limit_bytes=_vmem_limit()),
    )(x_nhwc, top, bot, w2d, bias)
    return out.reshape(B, H, W, Cout)


# ---------------------------------------------------------------------------
# Fused instance head: sigmoid -> prob^T @ feat (HW-tiled) -> normalize ->
# single fused (cls | mask_kernel | objectness) matmul
# ---------------------------------------------------------------------------
def _inst_head_kernel(iam_ref, feat_ref, w_ref, b_ref, out_ref,
                      inst_acc, norm_acc, *, compute_dtype, norm_col):
    """Grid = (B, HW // T).
    iam_ref:  (1, T, N_pad)  pre-sigmoid IAM logits (HW-major, no transpose)
    feat_ref: (1, T, C_pad)  features
    w_ref:    (C_pad, OUT_pad) fused [cls | mask_kernel | objectness | pad]
    b_ref:    (1, OUT_pad)
    out_ref:  (1, N_pad, OUT_pad)
    inst_acc: VMEM (N_pad, C_pad) f32 accumulator.
    norm_acc: VMEM (N_pad, 8) f32 (only used when norm_col is None)."""
    hw_i = pl.program_id(1)

    @pl.when(hw_i == 0)
    def _init():
        inst_acc[...] = jnp.zeros_like(inst_acc)
        norm_acc[...] = jnp.zeros_like(norm_acc)

    # sigmoid in f32 (EUP); MXU operands may be bf16 (compute_dtype).
    prob = 1.0 / (1.0 + jnp.exp(-iam_ref[0].astype(jnp.float32)))    # (T, N_pad)
    probc = prob.astype(compute_dtype)
    featc = feat_ref[0].astype(compute_dtype)

    if norm_col is not None:
        # Spare zero-padded feature channel carries a constant 1.0, so the
        # per-instance normalizer sum(prob) lands in inst_acc[:, norm_col]
        # for free (the corresponding fused-weight row is zero).
        lane = jax.lax.broadcasted_iota(jnp.int32, featc.shape, 1)
        featc = jnp.where(lane == norm_col, jnp.ones_like(featc), featc)

    # inst += prob^T @ feat : contract the HW tile directly (dim 0 of both),
    # so no (N, HW) transpose is ever materialized.
    inst_acc[...] += jax.lax.dot_general(
        probc, featc,
        dimension_numbers=(((0,), (0,)), ((), ())),
        preferred_element_type=jnp.float32)

    if norm_col is None:
        # Fallback normalizer (tiny MXU dot) when DIM is already 128-aligned.
        ones = jnp.ones((probc.shape[0], 8), compute_dtype)
        norm_acc[...] += jax.lax.dot_general(
            probc, ones,
            dimension_numbers=(((0,), (0,)), ((), ())),
            preferred_element_type=jnp.float32)

    @pl.when(hw_i == pl.num_programs(1) - 1)
    def _finalize():
        # (inst / norm) @ W + b  ==  (inst @ W) * (1 / norm) + b  (row scalar).
        raw = jnp.dot(inst_acc[...].astype(compute_dtype),
                      w_ref[...].astype(compute_dtype),
                      preferred_element_type=jnp.float32)            # (N_pad, OUT_pad)
        if norm_col is not None:
            norm = inst_acc[:, norm_col:norm_col + 1]
        else:
            norm = norm_acc[:, 0:1]
        recip = pl.reciprocal(jnp.maximum(norm, 1e-6), approx=True)
        out_ref[0] = (raw * recip + b_ref[0]).astype(out_ref.dtype)


def inst_head(iam_flat, feat_flat, w_fused, b_fused, *, tile_hw=4096,
              compute_dtype=jnp.bfloat16, norm_col=None):
    B, HW, N_pad = iam_flat.shape
    C_pad = feat_flat.shape[-1]
    OUT_pad = w_fused.shape[-1]
    T = _choose_tile_hw(HW, tile_hw)

    kern = functools.partial(_inst_head_kernel, compute_dtype=compute_dtype,
                             norm_col=norm_col)
    return pl.pallas_call(
        kern,
        out_shape=jax.ShapeDtypeStruct((B, N_pad, OUT_pad), jnp.float32),
        grid_spec=pltpu.PrefetchScalarGridSpec(
            num_scalar_prefetch=0,
            grid=(B, HW // T),
            in_specs=[
                pl.BlockSpec((1, T, N_pad), lambda b, h: (b, h, 0)),
                pl.BlockSpec((1, T, C_pad), lambda b, h: (b, h, 0)),
                pl.BlockSpec((C_pad, OUT_pad), lambda b, h: (0, 0)),
                pl.BlockSpec((1, OUT_pad), lambda b, h: (0, 0)),
            ],
            out_specs=pl.BlockSpec((1, N_pad, OUT_pad), lambda b, h: (b, 0, 0)),
            scratch_shapes=[pltpu.VMEM((N_pad, C_pad), jnp.float32),
                            pltpu.VMEM((N_pad, 8), jnp.float32)],
        ),
        compiler_params=pltpu.CompilerParams(
            dimension_semantics=("parallel", "arbitrary"),
            vmem_limit_bytes=_vmem_limit()),
    )(iam_flat, feat_flat, w_fused, b_fused)


# ---------------------------------------------------------------------------
# One-time parameter preparation (outside the jitted forward)
# ---------------------------------------------------------------------------
def prepare_params(params, in_channels):
    """Pads channels to lane multiples, reshapes conv weights to (9*Cin, Cout)
    and fuses the head weights.  Returns (arrays, meta)."""
    arrays = {}
    convs = []
    cin = in_channels
    for (w, b) in params["inst_convs"]:
        cout = _round_up(w.shape[-1], LANE)
        wp = _pad_axis(_pad_axis(w, 2, cin), 3, cout)
        convs.append((jnp.asarray(wp.reshape(9 * cin, cout), jnp.float32),
                      jnp.asarray(_pad_axis(b, 1, cout), jnp.float32)))
        cin = cout
    arrays["conv_w"] = convs
    c_pad = cin

    n_masks = params["iam_w"].shape[-1]
    n_pad = _round_up(n_masks, LANE)
    wi = _pad_axis(_pad_axis(params["iam_w"], 2, c_pad), 3, n_pad)
    arrays["iam_w"] = jnp.asarray(wi.reshape(9 * c_pad, n_pad), jnp.float32)
    arrays["iam_b"] = jnp.asarray(_pad_axis(params["iam_b"], 1, n_pad), jnp.float32)

    dim = params["cls_w"].shape[0]
    num_classes = params["cls_w"].shape[1]
    kernel_dim = params["kern_w"].shape[1]
    w_fused = jnp.concatenate([params["cls_w"], params["kern_w"],
                               params["obj_w"]], axis=1)
    b_fused = jnp.concatenate([params["cls_b"], params["kern_b"],
                               params["obj_b"]], axis=1)
    out_pad = _round_up(w_fused.shape[1], LANE)
    arrays["head_w"] = jnp.asarray(
        _pad_axis(_pad_axis(w_fused, 0, c_pad), 1, out_pad), jnp.float32)
    arrays["head_b"] = jnp.asarray(_pad_axis(b_fused, 1, out_pad), jnp.float32)

    meta = dict(num_masks=n_masks, num_classes=num_classes,
                kernel_dim=kernel_dim, dim=dim, c_pad=c_pad, n_pad=n_pad,
                out_pad=out_pad,
                norm_col=(dim if dim < c_pad else None))
    return arrays, meta


# ---------------------------------------------------------------------------
# InstanceBranch forward
# ---------------------------------------------------------------------------
def instance_branch_forward(x_nchw, arrays, *, meta,
                            compute_dtype=jnp.bfloat16,
                            storage_dtype=jnp.bfloat16,
                            tile_h=16, tile_hw=4096):
    """Returns (pred_logits (B,N,num_classes), pred_kernel (B,N,kernel_dim),
    pred_scores (B,N,1), iam (B,N,H,W)) — identical semantics to the PyTorch
    module.  bf16 compute/storage is recommended on all of v5e/v6e/v7x (f32
    accumulation is kept inside the kernels)."""
    B, _, H, W = x_nchw.shape
    x = jnp.transpose(x_nchw, (0, 2, 3, 1)).astype(storage_dtype)    # NHWC

    for (w2d, bias) in arrays["conv_w"]:
        x = conv3x3(x, w2d, bias, relu=True, tile_h=tile_h,
                    compute_dtype=compute_dtype, storage_dtype=storage_dtype)

    iam = conv3x3(x, arrays["iam_w"], arrays["iam_b"], relu=False,
                  tile_h=tile_h, compute_dtype=compute_dtype,
                  storage_dtype=storage_dtype)                       # (B,H,W,n_pad)

    HW = H * W
    feat_flat = x.reshape(B, HW, meta["c_pad"])
    iam_flat = iam.reshape(B, HW, meta["n_pad"])

    fused = inst_head(iam_flat, feat_flat, arrays["head_w"], arrays["head_b"],
                      tile_hw=tile_hw, compute_dtype=compute_dtype,
                      norm_col=meta["norm_col"])                     # (B,N_pad,OUT_pad)

    N = meta["num_masks"]
    NC = meta["num_classes"]
    KD = meta["kernel_dim"]
    logits = fused[:, :N, :NC]
    kernels = fused[:, :N, NC:NC + KD]
    scores = fused[:, :N, NC + KD:NC + KD + 1]

    # The only transpose left: the returned iam itself (PyTorch NCHW layout).
    iam_out = jnp.transpose(iam_flat[..., :N], (0, 2, 1)).reshape(B, N, H, W)
    return logits, kernels, scores, iam_out.astype(jnp.float32)


# ---------------------------------------------------------------------------
# Pure-JAX reference (for correctness check)
# ---------------------------------------------------------------------------
def reference_forward(x_nchw, params):
    def conv(x, w, b):
        y = jax.lax.conv_general_dilated(
            x, w, window_strides=(1, 1), padding="SAME",
            dimension_numbers=("NCHW", "HWIO", "NCHW"))
        return y + b.reshape(1, -1, 1, 1)

    x = x_nchw.astype(jnp.float32)
    for (w, b) in params["inst_convs"]:
        x = jnp.maximum(conv(x, w, b), 0.0)
    iam = conv(x, params["iam_w"], params["iam_b"])
    B, C, H, W = x.shape
    N = iam.shape[1]
    prob = jax.nn.sigmoid(iam).reshape(B, N, -1)
    inst = jnp.einsum("bnp,bcp->bnc", prob, x.reshape(B, C, -1))
    norm = jnp.clip(prob.sum(-1), 1e-6, None)
    inst = inst / norm[:, :, None]
    logits = inst @ params["cls_w"] + params["cls_b"][0]
    kernels = inst @ params["kern_w"] + params["kern_b"][0]
    scores = inst @ params["obj_w"] + params["obj_b"][0]
    return logits, kernels, scores, iam


if __name__ == "__main__":
    # Small config consistent with the module.
    B, IN_CH, H, W = 2, 4, 16, 16
    DIM, NUM_CONVS = 32, 2
    NUM_MASKS, KERNEL_DIM, NUM_CLASSES = 8, 16, 8

    key = jax.random.PRNGKey(0)
    ks = jax.random.split(key, 12)

    prior_prob = 0.01
    bias_value = -math.log((1 - prior_prob) / prior_prob)

    # inst_convs: c2_msra_fill ~ kaiming normal (fan_out, relu), zero bias.
    convs = []
    cin = IN_CH
    for i in range(NUM_CONVS):
        std = math.sqrt(2.0 / (DIM * 9))
        w = jax.random.normal(ks[i], (3, 3, cin, DIM), jnp.float32) * std
        b = jnp.zeros((1, DIM), jnp.float32)
        convs.append((w, b))
        cin = DIM

    params = {
        "inst_convs": convs,
        "iam_w": jax.random.normal(ks[4], (3, 3, DIM, NUM_MASKS),
                                   jnp.float32) * 0.01,
        "iam_b": jnp.full((1, NUM_MASKS), bias_value, jnp.float32),
        "cls_w": jax.random.normal(ks[5], (DIM, NUM_CLASSES),
                                   jnp.float32) * 0.01,
        "cls_b": jnp.full((1, NUM_CLASSES), bias_value, jnp.float32),
        "kern_w": jax.random.normal(ks[6], (DIM, KERNEL_DIM),
                                    jnp.float32) * 0.01,
        "kern_b": jnp.zeros((1, KERNEL_DIM), jnp.float32),
        # objectness: deterministic stand-in for PyTorch default Linear init
        "obj_w": jax.random.normal(ks[7], (DIM, 1),
                                   jnp.float32) * (1.0 / math.sqrt(DIM)),
        "obj_b": jax.random.normal(ks[8], (1, 1),
                                   jnp.float32) * (1.0 / math.sqrt(DIM)),
    }

    arrays, meta = prepare_params(params, IN_CH)
    x = jax.random.normal(ks[9], (B, IN_CH, H, W), jnp.float32)

    refs = jax.block_until_ready(reference_forward(x, params))

    # tile_h=8 -> 2 row tiles per image (halo path); tile_hw=64 -> 4 HW
    # reduction steps, exercising the accumulation path at this small shape.

    # 1) f32 compute + f32 storage: tight numerical check (only the approx EUP
    #    reciprocal in the normalizer differs from the reference).
    fwd32 = jax.jit(functools.partial(
        instance_branch_forward, meta=meta,
        compute_dtype=jnp.float32, storage_dtype=jnp.float32,
        tile_h=8, tile_hw=64))
    outs32 = jax.block_until_ready(fwd32(x, arrays))
    for o, r in zip(outs32, refs):
        np.testing.assert_allclose(np.asarray(o, dtype=np.float32),
                                   np.asarray(r), rtol=5e-3, atol=5e-3)

    # 2) Production path: bf16 MXU operands + bf16 inter-kernel activations
    #    (f32 accumulation); loose sanity check.
    fwd16 = jax.jit(functools.partial(
        instance_branch_forward, meta=meta, tile_h=8, tile_hw=64))
    outs16 = jax.block_until_ready(fwd16(x, arrays))
    for o, r in zip(outs16, refs):
        np.testing.assert_allclose(np.asarray(o, dtype=np.float32),
                                   np.asarray(r), rtol=1e-1, atol=1e-1)

    print("KERNEL_OK")
</pallas_src>

<mosaic_0001>
module attributes {stable_mosaic.version = 11 : i64} {
  func.func @_inst_head_kernel(%arg0: i32, %arg1: i32, %arg2: memref<1x64x128xf32, #tpu.memory_space<vmem>>, %arg3: memref<1x64x128xf32, #tpu.memory_space<vmem>>, %arg4: memref<128x128xf32, #tpu.memory_space<vmem>>, %arg5: memref<1x128xf32, #tpu.memory_space<vmem>>, %arg6: memref<1x128x128xf32, #tpu.memory_space<vmem>>, %arg7: memref<128x128xf32, #tpu.memory_space<vmem>>, %arg8: memref<128x8xf32, #tpu.memory_space<vmem>>) attributes {dimension_semantics = [#tpu.dimension_semantics<parallel>, #tpu.dimension_semantics<arbitrary>], iteration_bounds = array<i64: 2, 4>, scalar_prefetch = 0 : i64, scratch_operands = 2 : i64, tpu.core_type = #tpu.core_type<tc>, window_params = [{transform_indices = @transform_0, window_bounds = array<i64: 1, 64, 128>}, {transform_indices = @transform_1, window_bounds = array<i64: 1, 64, 128>}, {pipeline_mode = #tpu.pipeline_mode<synchronous>, transform_indices = @transform_2, window_bounds = array<i64: 128, 128>}, {pipeline_mode = #tpu.pipeline_mode<synchronous>, transform_indices = @transform_3, window_bounds = array<i64: 1, 128>}, {transform_indices = @transform_4, window_bounds = array<i64: 1, 128, 128>}]} {
    %c0_i32 = arith.constant 0 : i32
    %0 = arith.cmpi eq, %arg1, %c0_i32 : i32
    %1 = arith.extui %0 : i1 to i32
    %c0_i32_0 = arith.constant 0 : i32
    %2 = arith.cmpi ne, %1, %c0_i32_0 : i32
    scf.if %2 {
      %cst_15 = arith.constant 0.000000e+00 : f32
      %26 = vector.broadcast %cst_15 : f32 to vector<128x128xf32>
      %c0_16 = arith.constant 0 : index
      %c0_17 = arith.constant 0 : index
      %27 = vector.load %arg7[%c0_16, %c0_17] : memref<128x128xf32, #tpu.memory_space<vmem>>, vector<128x128xf32>
      tpu.vector_store %arg7[%c0_16, %c0_17], %26 {strides = array<i32>} : memref<128x128xf32, #tpu.memory_space<vmem>>, vector<128x128xf32>,
      %cst_18 = arith.constant 0.000000e+00 : f32
      %28 = vector.broadcast %cst_18 : f32 to vector<128x8xf32>
      %c0_19 = arith.constant 0 : index
      %c0_20 = arith.constant 0 : index
      %29 = vector.load %arg8[%c0_19, %c0_20] : memref<128x8xf32, #tpu.memory_space<vmem>>, vector<128x8xf32>
      tpu.vector_store %arg8[%c0_19, %c0_20], %28 {strides = array<i32>} : memref<128x8xf32, #tpu.memory_space<vmem>>, vector<128x8xf32>,
    } else {
    }
    %c0 = arith.constant 0 : index
    %c0_1 = arith.constant 0 : index
    %c0_2 = arith.constant 0 : index
    %3 = vector.load %arg2[%c0, %c0_1, %c0_2] : memref<1x64x128xf32, #tpu.memory_space<vmem>>, vector<1x64x128xf32>
    %4 = vector.shape_cast %3 : vector<1x64x128xf32> to vector<64x128xf32>
    %cst = arith.constant 0.000000e+00 : f32
    %5 = vector.broadcast %cst : f32 to vector<64x128xf32>
    %6 = arith.subf %5, %4 : vector<64x128xf32>
    %7 = math.exp %6 : vector<64x128xf32>
    %cst_3 = arith.constant 1.000000e+00 : f32
    %8 = vector.broadcast %cst_3 : f32 to vector<64x128xf32>
    %9 = arith.addf %8, %7 : vector<64x128xf32>
    %cst_4 = arith.constant 1.000000e+00 : f32
    %10 = vector.broadcast %cst_4 : f32 to vector<64x128xf32>
    %11 = arith.divf %10, %9 : vector<64x128xf32>
    %c0_5 = arith.constant 0 : index
    %c0_6 = arith.constant 0 : index
    %c0_7 = arith.constant 0 : index
    %12 = vector.load %arg3[%c0_5, %c0_6, %c0_7] : memref<1x64x128xf32, #tpu.memory_space<vmem>>, vector<1x64x128xf32>
    %13 = vector.shape_cast %12 : vector<1x64x128xf32> to vector<64x128xf32>
    %14 = tpu.iota {dimensions = array<i32: 1>} : vector<64x128xi32>
    %c32_i32 = arith.constant 32 : i32
    %15 = vector.broadcast %c32_i32 : i32 to vector<64x128xi32>
    %16 = arith.cmpi eq, %14, %15 : vector<64x128xi32>
    %cst_8 = arith.constant 1.000000e+00 : f32
    %17 = vector.broadcast %cst_8 : f32 to vector<64x128xf32>
    %18 = arith.select %16, %17, %13 : vector<64x128xi1>, vector<64x128xf32>
    %c0_9 = arith.constant 0 : index
    %c0_10 = arith.constant 0 : index
    %19 = vector.load %arg7[%c0_9, %c0_10] : memref<128x128xf32, #tpu.memory_space<vmem>>, vector<128x128xf32>
    %cst_11 = arith.constant dense<0.000000e+00> : vector<128x128xf32>
    %20 = tpu.matmul %11, %18, %cst_11 {dimension_numbers = #tpu.dot_dimension_numbers<[0], [0], [1], [1], [0, 1, 1, 1], [], []>} : vector<64x128xf32>, vector<64x128xf32>, vector<128x128xf32> -> vector<128x128xf32>
    %21 = arith.addf %19, %20 : vector<128x128xf32>
    %c0_12 = arith.constant 0 : index
    %c0_13 = arith.constant 0 : index
    %22 = vector.load %arg7[%c0_12, %c0_13] : memref<128x128xf32, #tpu.memory_space<vmem>>, vector<128x128xf32>
    tpu.vector_store %arg7[%c0_12, %c0_13], %21 {strides = array<i32>} : memref<128x128xf32, #tpu.memory_space<vmem>>, vector<128x128xf32>,
    %c3_i32 = arith.constant 3 : i32
    %23 = arith.cmpi eq, %arg1, %c3_i32 : i32
    %24 = arith.extui %23 : i1 to i32
    %c0_i32_14 = arith.constant 0 : i32
    %25 = arith.cmpi ne, %24, %c0_i32_14 : i32
    scf.if %25 {
      %c0_15 = arith.constant 0 : index
      %c0_16 = arith.constant 0 : index
      %26 = vector.load %arg7[%c0_15, %c0_16] : memref<128x128xf32, #tpu.memory_space<vmem>>, vector<128x128xf32>
      %c0_17 = arith.constant 0 : index
      %c0_18 = arith.constant 0 : index
      %27 = vector.load %arg4[%c0_17, %c0_18] : memref<128x128xf32, #tpu.memory_space<vmem>>, vector<128x128xf32>
      %cst_19 = arith.constant dense<0.000000e+00> : vector<128x128xf32>
      %28 = tpu.matmul %26, %27, %cst_19 {dimension_numbers = #tpu.dot_dimension_numbers<[1], [0], [0], [1], [0, 0, 1, 1], [], []>} : vector<128x128xf32>, vector<128x128xf32>, vector<128x128xf32> -> vector<128x128xf32>
      %c0_20 = arith.constant 0 : index
      %c32 = arith.constant 32 : index
      %29 = vector.load %arg7[%c0_20, %c32] : memref<128x128xf32, #tpu.memory_space<vmem>>, vector<128x1xf32>
      %cst_21 = arith.constant 9.99999997E-7 : f32
      %30 = vector.broadcast %cst_21 : f32 to vector<128x1xf32>
      %31 = arith.maximumf %29, %30 : vector<128x1xf32>
      %32 = tpu.reciprocal %31 {approx = true} : vector<128x1xf32> -> vector<128x1xf32>
      %33 = vector.broadcast %32 : vector<128x1xf32> to vector<128x128xf32>
      %34 = arith.mulf %28, %33 : vector<128x128xf32>
      %c0_22 = arith.constant 0 : index
      %c0_23 = arith.constant 0 : index
      %35 = vector.load %arg5[%c0_22, %c0_23] : memref<1x128xf32, #tpu.memory_space<vmem>>, vector<1x128xf32>
      %36 = vector.shape_cast %35 : vector<1x128xf32> to vector<128xf32>
      %37 = vector.shape_cast %36 : vector<128xf32> to vector<1x128xf32>
      %38 = vector.broadcast %37 : vector<1x128xf32> to vector<128x128xf32>
      %39 = arith.addf %34, %38 : vector<128x128xf32>
      %c0_24 = arith.constant 0 : index
      %c0_25 = arith.constant 0 : index
      %c0_26 = arith.constant 0 : index
      %40 = vector.load %arg6[%c0_24, %c0_25, %c0_26] : memref<1x128x128xf32, #tpu.memory_space<vmem>>, vector<1x128x128xf32>
      %41 = vector.shape_cast %40 : vector<1x128x128xf32> to vector<128x128xf32>
      %42 = vector.shape_cast %39 : vector<128x128xf32> to vector<1x128x128xf32>
      tpu.vector_store %arg6[%c0_24, %c0_25, %c0_26], %42 {strides = array<i32>} : memref<1x128x128xf32, #tpu.memory_space<vmem>>, vector<1x128x128xf32>,
    } else {
    }
    return
  }
  func.func @transform_0(%arg0: i32, %arg1: i32) -> (i32, i32, i32) {
    %c0_i32 = arith.constant 0 : i32
    %c0_i32_0 = arith.constant 0 : i32
    return %arg0, %arg1, %c0_i32 : i32, i32, i32
  }
  func.func @transform_1(%arg0: i32, %arg1: i32) -> (i32, i32, i32) {
    %c0_i32 = arith.constant 0 : i32
    %c0_i32_0 = arith.constant 0 : i32
    return %arg0, %arg1, %c0_i32 : i32, i32, i32
  }
  func.func @transform_2(%arg0: i32, %arg1: i32) -> (i32, i32) {
    %c0_i32 = arith.constant 0 : i32
    %c0_i32_0 = arith.constant 0 : i32
    %c0_i32_1 = arith.constant 0 : i32
    return %c0_i32, %c0_i32_0 : i32, i32
  }
  func.func @transform_3(%arg0: i32, %arg1: i32) -> (i32, i32) {
    %c0_i32 = arith.constant 0 : i32
    %c0_i32_0 = arith.constant 0 : i32
    %c0_i32_1 = arith.constant 0 : i32
    return %c0_i32, %c0_i32_0 : i32, i32
  }
  func.func @transform_4(%arg0: i32, %arg1: i32) -> (i32, i32, i32) {
    %c0_i32 = arith.constant 0 : i32
    %c0_i32_0 = arith.constant 0 : i32
    %c0_i32_1 = arith.constant 0 : i32
    return %arg0, %c0_i32, %c0_i32_0 : i32, i32, i32
  }
}

module attributes {stable_mosaic.version = 11 : i64} {
  func.func @_conv3x3_kernel(%arg0: i32, %arg1: i32, %arg2: memref<1x8x16x4xf32, #tpu.memory_space<vmem>>, %arg3: memref<1x1x16x4xf32, #tpu.memory_space<vmem>>, %arg4: memref<1x1x16x4xf32, #tpu.memory_space<vmem>>, %arg5: memref<36x128xf32, #tpu.memory_space<vmem>>, %arg6: memref<1x128xf32, #tpu.memory_space<vmem>>, %arg7: memref<1x128x128xf32, #tpu.memory_space<vmem>>, %arg8: memref<10x18x4xf32, #tpu.memory_space<vmem>>, %arg9: memref<128x36xf32, #tpu.memory_space<vmem>>) attributes {dimension_semantics = [#tpu.dimension_semantics<parallel>, #tpu.dimension_semantics<parallel>], iteration_bounds = array<i64: 2, 2>, scalar_prefetch = 0 : i64, scratch_operands = 2 : i64, tpu.core_type = #tpu.core_type<tc>, window_params = [{transform_indices = @transform_0, window_bounds = array<i64: 1, 8, 16, 4>}, {transform_indices = @transform_1, window_bounds = array<i64: 1, 1, 16, 4>}, {transform_indices = @transform_2, window_bounds = array<i64: 1, 1, 16, 4>}, {pipeline_mode = #tpu.pipeline_mode<synchronous>, transform_indices = @transform_3, window_bounds = array<i64: 36, 128>}, {pipeline_mode = #tpu.pipeline_mode<synchronous>, transform_indices = @transform_4, window_bounds = array<i64: 1, 128>}, {transform_indices = @transform_5, window_bounds = array<i64: 1, 128, 128>}]} {
    %cst = arith.constant 0.000000e+00 : f32
    %0 = vector.broadcast %cst : f32 to vector<10x1x4xf32>
    %c0 = arith.constant 0 : index
    %c0_0 = arith.constant 0 : index
    %c0_1 = arith.constant 0 : index
    %1 = vector.load %arg8[%c0, %c0_0, %c0_1] : memref<10x18x4xf32, #tpu.memory_space<vmem>>, vector<10x1x4xf32>
    tpu.vector_store %arg8[%c0, %c0_0, %c0_1], %0 {strides = array<i32>} : memref<10x18x4xf32, #tpu.memory_space<vmem>>, vector<10x1x4xf32>,
    %c0_2 = arith.constant 0 : index
    %c17 = arith.constant 17 : index
    %c0_3 = arith.constant 0 : index
    %2 = vector.load %arg8[%c0_2, %c17, %c0_3] : memref<10x18x4xf32, #tpu.memory_space<vmem>>, vector<10x1x4xf32>
    tpu.vector_store %arg8[%c0_2, %c17, %c0_3], %0 {strides = array<i32>} : memref<10x18x4xf32, #tpu.memory_space<vmem>>, vector<10x1x4xf32>,
    %c0_4 = arith.constant 0 : index
    %c0_5 = arith.constant 0 : index
    %c0_6 = arith.constant 0 : index
    %c0_7 = arith.constant 0 : index
    %3 = vector.load %arg3[%c0_4, %c0_5, %c0_6, %c0_7] : memref<1x1x16x4xf32, #tpu.memory_space<vmem>>, vector<1x1x16x4xf32>
    %4 = vector.shape_cast %3 : vector<1x1x16x4xf32> to vector<1x16x4xf32>
    %c0_8 = arith.constant 0 : index
    %c1 = arith.constant 1 : index
    %c0_9 = arith.constant 0 : index
    %5 = vector.load %arg8[%c0_8, %c1, %c0_9] : memref<10x18x4xf32, #tpu.memory_space<vmem>>, vector<1x16x4xf32>
    tpu.vector_store %arg8[%c0_8, %c1, %c0_9], %4 {strides = array<i32>} : memref<10x18x4xf32, #tpu.memory_space<vmem>>, vector<1x16x4xf32>,
    %c0_10 = arith.constant 0 : index
    %c0_11 = arith.constant 0 : index
    %c0_12 = arith.constant 0 : index
    %c0_13 = arith.constant 0 : index
    %6 = vector.load %arg4[%c0_10, %c0_11, %c0_12, %c0_13] : memref<1x1x16x4xf32, #tpu.memory_space<vmem>>, vector<1x1x16x4xf32>
    %7 = vector.shape_cast %6 : vector<1x1x16x4xf32> to vector<1x16x4xf32>
    %c9 = arith.constant 9 : index
    %c1_14 = arith.constant 1 : index
    %c0_15 = arith.constant 0 : index
    %8 = vector.load %arg8[%c9, %c1_14, %c0_15] : memref<10x18x4xf32, #tpu.memory_space<vmem>>, vector<1x16x4xf32>
    tpu.vector_store %arg8[%c9, %c1_14, %c0_15], %7 {strides = array<i32>} : memref<10x18x4xf32, #tpu.memory_space<vmem>>, vector<1x16x4xf32>,
    %c0_16 = arith.constant 0 : index
    %c0_17 = arith.constant 0 : index
    %c0_18 = arith.constant 0 : index
    %c0_19 = arith.constant 0 : index
    %9 = vector.load %arg2[%c0_16, %c0_17, %c0_18, %c0_19] : memref<1x8x16x4xf32, #tpu.memory_space<vmem>>, vector<1x8x16x4xf32>
    %10 = vector.shape_cast %9 : vector<1x8x16x4xf32> to vector<8x16x4xf32>
    %c1_20 = arith.constant 1 : index
    %c1_21 = arith.constant 1 : index
    %c0_22 = arith.constant 0 : index
    %11 = vector.load %arg8[%c1_20, %c1_21, %c0_22] : memref<10x18x4xf32, #tpu.memory_space<vmem>>, vector<8x16x4xf32>
    tpu.vector_store %arg8[%c1_20, %c1_21, %c0_22], %10 {strides = array<i32>} : memref<10x18x4xf32, #tpu.memory_space<vmem>>, vector<8x16x4xf32>,
    %c0_23 = arith.constant 0 : index
    %c0_24 = arith.constant 0 : index
    %c0_25 = arith.constant 0 : index
    %12 = vector.load %arg8[%c0_23, %c0_24, %c0_25] : memref<10x18x4xf32, #tpu.memory_space<vmem>>, vector<8x16x4xf32>
    %13 = vector.shape_cast %12 : vector<8x16x4xf32> to vector<128x4xf32>
    %c0_26 = arith.constant 0 : index
    %c0_27 = arith.constant 0 : index
    %14 = vector.load %arg9[%c0_26, %c0_27] : memref<128x36xf32, #tpu.memory_space<vmem>>, vector<128x4xf32>
    tpu.vector_store %arg9[%c0_26, %c0_27], %13 {strides = array<i32>} : memref<128x36xf32, #tpu.memory_space<vmem>>, vector<128x4xf32>,
    %c0_28 = arith.constant 0 : index
    %c1_29 = arith.constant 1 : index
    %c0_30 = arith.constant 0 : index
    %15 = vector.load %arg8[%c0_28, %c1_29, %c0_30] : memref<10x18x4xf32, #tpu.memory_space<vmem>>, vector<8x16x4xf32>
    %16 = vector.shape_cast %15 : vector<8x16x4xf32> to vector<128x4xf32>
    %c0_31 = arith.constant 0 : index
    %c4 = arith.constant 4 : index
    %17 = vector.load %arg9[%c0_31, %c4] : memref<128x36xf32, #tpu.memory_space<vmem>>, vector<128x4xf32>
    tpu.vector_store %arg9[%c0_31, %c4], %16 {strides = array<i32>} : memref<128x36xf32, #tpu.memory_space<vmem>>, vector<128x4xf32>,
    %c0_32 = arith.constant 0 : index
    %c2 = arith.constant 2 : index
    %c0_33 = arith.constant 0 : index
    %18 = vector.load %arg8[%c0_32, %c2, %c0_33] : memref<10x18x4xf32, #tpu.memory_space<vmem>>, vector<8x16x4xf32>
    %19 = vector.shape_cast %18 : vector<8x16x4xf32> to vector<128x4xf32>
    %c0_34 = arith.constant 0 : index
    %c8 = arith.constant 8 : index
    %20 = vector.load %arg9[%c0_34, %c8] : memref<128x36xf32, #tpu.memory_space<vmem>>, vector<128x4xf32>
    tpu.vector_store %arg9[%c0_34, %c8], %19 {strides = array<i32>} : memref<128x36xf32, #tpu.memory_space<vmem>>, vector<128x4xf32>,
    %c1_35 = arith.constant 1 : index
    %c0_36 = arith.constant 0 : index
    %c0_37 = arith.constant 0 : index
    %21 = vector.load %arg8[%c1_35, %c0_36, %c0_37] : memref<10x18x4xf32, #tpu.memory_space<vmem>>, vector<8x16x4xf32>
    %22 = vector.shape_cast %21 : vector<8x16x4xf32> to vector<128x4xf32>
    %c0_38 = arith.constant 0 : index
    %c12 = arith.constant 12 : index
    %23 = vector.load %arg9[%c0_38, %c12] : memref<128x36xf32, #tpu.memory_space<vmem>>, vector<128x4xf32>
    tpu.vector_store %arg9[%c0_38, %c12], %22 {strides = array<i32>} : memref<128x36xf32, #tpu.memory_space<vmem>>, vector<128x4xf32>,
    %c1_39 = arith.constant 1 : index
    %c1_40 = arith.constant 1 : index
    %c0_41 = arith.constant 0 : index
    %24 = vector.load %arg8[%c1_39, %c1_40, %c0_41] : memref<10x18x4xf32, #tpu.memory_space<vmem>>, vector<8x16x4xf32>
    %25 = vector.shape_cast %24 : vector<8x16x4xf32> to vector<128x4xf32>
    %c0_42 = arith.constant 0 : index
    %c16 = arith.constant 16 : index
    %26 = vector.load %arg9[%c0_42, %c16] : memref<128x36xf32, #tpu.memory_space<vmem>>, vector<128x4xf32>
    tpu.vector_store %arg9[%c0_42, %c16], %25 {strides = array<i32>} : memref<128x36xf32, #tpu.memory_space<vmem>>, vector<128x4xf32>,
    %c1_43 = arith.constant 1 : index
    %c2_44 = arith.constant 2 : index
    %c0_45 = arith.constant 0 : index
    %27 = vector.load %arg8[%c1_43, %c2_44, %c0_45] : memref<10x18x4xf32, #tpu.memory_space<vmem>>, vector<8x16x4xf32>
    %28 = vector.shape_cast %27 : vector<8x16x4xf32> to vector<128x4xf32>
    %c0_46 = arith.constant 0 : index
    %c20 = arith.constant 20 : index
    %29 = vector.load %arg9[%c0_46, %c20] : memref<128x36xf32, #tpu.memory_space<vmem>>, vector<128x4xf32>
    tpu.vector_store %arg9[%c0_46, %c20], %28 {strides = array<i32>} : memref<128x36xf32, #tpu.memory_space<vmem>>, vector<128x4xf32>,
    %c2_47 = arith.constant 2 : index
    %c0_48 = arith.constant 0 : index
    %c0_49 = arith.constant 0 : index
    %30 = vector.load %arg8[%c2_47, %c0_48, %c0_49] : memref<10x18x4xf32, #tpu.memory_space<vmem>>, vector<8x16x4xf32>
    %31 = vector.shape_cast %30 : vector<8x16x4xf32> to vector<128x4xf32>
    %c0_50 = arith.constant 0 : index
    %c24 = arith.constant 24 : index
    %32 = vector.load %arg9[%c0_50, %c24] : memref<128x36xf32, #tpu.memory_space<vmem>>, vector<128x4xf32>
    tpu.vector_store %arg9[%c0_50, %c24], %31 {strides = array<i32>} : memref<128x36xf32, #tpu.memory_space<vmem>>, vector<128x4xf32>,
    %c2_51 = arith.constant 2 : index
    %c1_52 = arith.constant 1 : index
    %c0_53 = arith.constant 0 : index
    %33 = vector.load %arg8[%c2_51, %c1_52, %c0_53] : memref<10x18x4xf32, #tpu.memory_space<vmem>>, vector<8x16x4xf32>
    %34 = vector.shape_cast %33 : vector<8x16x4xf32> to vector<128x4xf32>
    %c0_54 = arith.constant 0 : index
    %c28 = arith.constant 28 : index
    %35 = vector.load %arg9[%c0_54, %c28] : memref<128x36xf32, #tpu.memory_space<vmem>>, vector<128x4xf32>
    tpu.vector_store %arg9[%c0_54, %c28], %34 {strides = array<i32>} : memref<128x36xf32, #tpu.memory_space<vmem>>, vector<128x4xf32>,
    %c2_55 = arith.constant 2 : index
    %c2_56 = arith.constant 2 : index
    %c0_57 = arith.constant 0 : index
    %36 = vector.load %arg8[%c2_55, %c2_56, %c0_57] : memref<10x18x4xf32, #tpu.memory_space<vmem>>, vector<8x16x4xf32>
    %37 = vector.shape_cast %36 : vector<8x16x4xf32> to vector<128x4xf32>
    %c0_58 = arith.constant 0 : index
    %c32 = arith.constant 32 : index
    %38 = vector.load %arg9[%c0_58, %c32] : memref<128x36xf32, #tpu.memory_space<vmem>>, vector<128x4xf32>
    tpu.vector_store %arg9[%c0_58, %c32], %37 {strides = array<i32>} : memref<128x36xf32, #tpu.memory_space<vmem>>, vector<128x4xf32>,
    %c0_59 = arith.constant 0 : index
    %c0_60 = arith.constant 0 : index
    %39 = vector.load %arg9[%c0_59, %c0_60] : memref<128x36xf32, #tpu.memory_space<vmem>>, vector<128x36xf32>
    %c0_61 = arith.constant 0 : index
    %c0_62 = arith.constant 0 : index
    %40 = vector.load %arg5[%c0_61, %c0_62] : memref<36x128xf32, #tpu.memory_space<vmem>>, vector<36x128xf32>
    %cst_63 = arith.constant dense<0.000000e+00> : vector<128x128xf32>
    %41 = tpu.matmul %39, %40, %cst_63 {dimension_numbers = #tpu.dot_dimension_numbers<[1], [0], [0], [1], [0, 0, 1, 1], [], []>} : vector<128x36xf32>, vector<36x128xf32>, vector<128x128xf32> -> vector<128x128xf32>
    %c0_64 = arith.constant 0 : index
    %c0_65 = arith.constant 0 : index
    %42 = vector.load %arg6[%c0_64, %c0_65] : memref<1x128xf32, #tpu.memory_space<vmem>>, vector<1x128xf32>
    %43 = vector.shape_cast %42 : vector<1x128xf32> to vector<128xf32>
    %44 = vector.shape_cast %43 : vector<128xf32> to vector<1x128xf32>
    %45 = vector.broadcast %44 : vector<1x128xf32> to vector<128x128xf32>
    %46 = arith.addf %41, %45 : vector<128x128xf32>
    %cst_66 = arith.constant 0.000000e+00 : f32
    %47 = vector.broadcast %cst_66 : f32 to vector<128x128xf32>
    %48 = arith.maximumf %46, %47 : vector<128x128xf32>
    %c0_67 = arith.constant 0 : index
    %c0_68 = arith.constant 0 : index
    %c0_69 = arith.constant 0 : index
    %49 = vector.load %arg7[%c0_67, %c0_68, %c0_69] : memref<1x128x128xf32, #tpu.memory_space<vmem>>, vector<1x128x128xf32>
    %50 = vector.shape_cast %49 : vector<1x128x128xf32> to vector<128x128xf32>
    %51 = vector.shape_cast %48 : vector<128x128xf32> to vector<1x128x128xf32>
    tpu.vector_store %arg7[%c0_67, %c0_68, %c0_69], %51 {strides = array<i32>} : memref<1x128x128xf32, #tpu.memory_space<vmem>>, vector<1x128x128xf32>,
    return
  }
  func.func @transform_0(%arg0: i32, %arg1: i32) -> (i32, i32, i32, i32) {
    %c0_i32 = arith.constant 0 : i32
    %c0_i32_0 = arith.constant 0 : i32
    %c0_i32_1 = arith.constant 0 : i32
    return %arg0, %arg1, %c0_i32, %c0_i32_0 : i32, i32, i32, i32
  }
  func.func @transform_1(%arg0: i32, %arg1: i32) -> (i32, i32, i32, i32) {
    %c0_i32 = arith.constant 0 : i32
    %c0_i32_0 = arith.constant 0 : i32
    %c0_i32_1 = arith.constant 0 : i32
    return %arg0, %arg1, %c0_i32, %c0_i32_0 : i32, i32, i32, i32
  }
  func.func @transform_2(%arg0: i32, %arg1: i32) -> (i32, i32, i32, i32) {
    %c0_i32 = arith.constant 0 : i32
    %c0_i32_0 = arith.constant 0 : i32
    %c0_i32_1 = arith.constant 0 : i32
    return %arg0, %arg1, %c0_i32, %c0_i32_0 : i32, i32, i32, i32
  }
  func.func @transform_3(%arg0: i32, %arg1: i32) -> (i32, i32) {
    %c0_i32 = arith.constant 0 : i32
    %c0_i32_0 = arith.constant 0 : i32
    %c0_i32_1 = arith.constant 0 : i32
    return %c0_i32, %c0_i32_0 : i32, i32
  }
  func.func @transform_4(%arg0: i32, %arg1: i32) -> (i32, i32) {
    %c0_i32 = arith.constant 0 : i32
    %c0_i32_0 = arith.constant 0 : i32
    %c0_i32_1 = arith.constant 0 : i32
    return %c0_i32, %c0_i32_0 : i32, i32
  }
  func.func @transform_5(%arg0: i32, %arg1: i32) -> (i32, i32, i32) {
    %c0_i32 = arith.constant 0 : i32
    %c0_i32_0 = arith.constant 0 : i32
    return %arg0, %arg1, %c0_i32 : i32, i32, i32
  }
}

module attributes {stable_mosaic.version = 11 : i64} {
  func.func @_conv3x3_kernel(%arg0: i32, %arg1: i32, %arg2: memref<1x8x16x128xf32, #tpu.memory_space<vmem>>, %arg3: memref<1x1x16x128xf32, #tpu.memory_space<vmem>>, %arg4: memref<1x1x16x128xf32, #tpu.memory_space<vmem>>, %arg5: memref<1152x128xf32, #tpu.memory_space<vmem>>, %arg6: memref<1x128xf32, #tpu.memory_space<vmem>>, %arg7: memref<1x128x128xf32, #tpu.memory_space<vmem>>, %arg8: memref<10x18x128xf32, #tpu.memory_space<vmem>>, %arg9: memref<128x1152xf32, #tpu.memory_space<vmem>>) attributes {dimension_semantics = [#tpu.dimension_semantics<parallel>, #tpu.dimension_semantics<parallel>], iteration_bounds = array<i64: 2, 2>, scalar_prefetch = 0 : i64, scratch_operands = 2 : i64, tpu.core_type = #tpu.core_type<tc>, window_params = [{transform_indices = @transform_0, window_bounds = array<i64: 1, 8, 16, 128>}, {transform_indices = @transform_1, window_bounds = array<i64: 1, 1, 16, 128>}, {transform_indices = @transform_2, window_bounds = array<i64: 1, 1, 16, 128>}, {pipeline_mode = #tpu.pipeline_mode<synchronous>, transform_indices = @transform_3, window_bounds = array<i64: 1152, 128>}, {pipeline_mode = #tpu.pipeline_mode<synchronous>, transform_indices = @transform_4, window_bounds = array<i64: 1, 128>}, {transform_indices = @transform_5, window_bounds = array<i64: 1, 128, 128>}]} {
    %cst = arith.constant 0.000000e+00 : f32
    %0 = vector.broadcast %cst : f32 to vector<10x1x128xf32>
    %c0 = arith.constant 0 : index
    %c0_0 = arith.constant 0 : index
    %c0_1 = arith.constant 0 : index
    %1 = vector.load %arg8[%c0, %c0_0, %c0_1] : memref<10x18x128xf32, #tpu.memory_space<vmem>>, vector<10x1x128xf32>
    tpu.vector_store %arg8[%c0, %c0_0, %c0_1], %0 {strides = array<i32>} : memref<10x18x128xf32, #tpu.memory_space<vmem>>, vector<10x1x128xf32>,
    %c0_2 = arith.constant 0 : index
    %c17 = arith.constant 17 : index
    %c0_3 = arith.constant 0 : index
    %2 = vector.load %arg8[%c0_2, %c17, %c0_3] : memref<10x18x128xf32, #tpu.memory_space<vmem>>, vector<10x1x128xf32>
    tpu.vector_store %arg8[%c0_2, %c17, %c0_3], %0 {strides = array<i32>} : memref<10x18x128xf32, #tpu.memory_space<vmem>>, vector<10x1x128xf32>,
    %c0_4 = arith.constant 0 : index
    %c0_5 = arith.constant 0 : index
    %c0_6 = arith.constant 0 : index
    %c0_7 = arith.constant 0 : index
    %3 = vector.load %arg3[%c0_4, %c0_5, %c0_6, %c0_7] : memref<1x1x16x128xf32, #tpu.memory_space<vmem>>, vector<1x1x16x128xf32>
    %4 = vector.shape_cast %3 : vector<1x1x16x128xf32> to vector<1x16x128xf32>
    %c0_8 = arith.constant 0 : index
    %c1 = arith.constant 1 : index
    %c0_9 = arith.constant 0 : index
    %5 = vector.load %arg8[%c0_8, %c1, %c0_9] : memref<10x18x128xf32, #tpu.memory_space<vmem>>, vector<1x16x128xf32>
    tpu.vector_store %arg8[%c0_8, %c1, %c0_9], %4 {strides = array<i32>} : memref<10x18x128xf32, #tpu.memory_space<vmem>>, vector<1x16x128xf32>,
    %c0_10 = arith.constant 0 : index
    %c0_11 = arith.constant 0 : index
    %c0_12 = arith.constant 0 : index
    %c0_13 = arith.constant 0 : index
    %6 = vector.load %arg4[%c0_10, %c0_11, %c0_12, %c0_13] : memref<1x1x16x128xf32, #tpu.memory_space<vmem>>, vector<1x1x16x128xf32>
    %7 = vector.shape_cast %6 : vector<1x1x16x128xf32> to vector<1x16x128xf32>
    %c9 = arith.constant 9 : index
    %c1_14 = arith.constant 1 : index
    %c0_15 = arith.constant 0 : index
    %8 = vector.load %arg8[%c9, %c1_14, %c0_15] : memref<10x18x128xf32, #tpu.memory_space<vmem>>, vector<1x16x128xf32>
    tpu.vector_store %arg8[%c9, %c1_14, %c0_15], %7 {strides = array<i32>} : memref<10x18x128xf32, #tpu.memory_space<vmem>>, vector<1x16x128xf32>,
    %c0_16 = arith.constant 0 : index
    %c0_17 = arith.constant 0 : index
    %c0_18 = arith.constant 0 : index
    %c0_19 = arith.constant 0 : index
    %9 = vector.load %arg2[%c0_16, %c0_17, %c0_18, %c0_19] : memref<1x8x16x128xf32, #tpu.memory_space<vmem>>, vector<1x8x16x128xf32>
    %10 = vector.shape_cast %9 : vector<1x8x16x128xf32> to vector<8x16x128xf32>
    %c1_20 = arith.constant 1 : index
    %c1_21 = arith.constant 1 : index
    %c0_22 = arith.constant 0 : index
    %11 = vector.load %arg8[%c1_20, %c1_21, %c0_22] : memref<10x18x128xf32, #tpu.memory_space<vmem>>, vector<8x16x128xf32>
    tpu.vector_store %arg8[%c1_20, %c1_21, %c0_22], %10 {strides = array<i32>} : memref<10x18x128xf32, #tpu.memory_space<vmem>>, vector<8x16x128xf32>,
    %c0_23 = arith.constant 0 : index
    %c0_24 = arith.constant 0 : index
    %c0_25 = arith.constant 0 : index
    %12 = vector.load %arg8[%c0_23, %c0_24, %c0_25] : memref<10x18x128xf32, #tpu.memory_space<vmem>>, vector<8x16x128xf32>
    %13 = vector.shape_cast %12 : vector<8x16x128xf32> to vector<128x128xf32>
    %c0_26 = arith.constant 0 : index
    %c0_27 = arith.constant 0 : index
    %14 = vector.load %arg9[%c0_26, %c0_27] : memref<128x1152xf32, #tpu.memory_space<vmem>>, vector<128x128xf32>
    tpu.vector_store %arg9[%c0_26, %c0_27], %13 {strides = array<i32>} : memref<128x1152xf32, #tpu.memory_space<vmem>>, vector<128x128xf32>,
    %c0_28 = arith.constant 0 : index
    %c1_29 = arith.constant 1 : index
    %c0_30 = arith.constant 0 : index
    %15 = vector.load %arg8[%c0_28, %c1_29, %c0_30] : memref<10x18x128xf32, #tpu.memory_space<vmem>>, vector<8x16x128xf32>
    %16 = vector.shape_cast %15 : vector<8x16x128xf32> to vector<128x128xf32>
    %c0_31 = arith.constant 0 : index
    %c128 = arith.constant 128 : index
    %17 = vector.load %arg9[%c0_31, %c128] : memref<128x1152xf32, #tpu.memory_space<vmem>>, vector<128x128xf32>
    tpu.vector_store %arg9[%c0_31, %c128], %16 {strides = array<i32>} : memref<128x1152xf32, #tpu.memory_space<vmem>>, vector<128x128xf32>,
    %c0_32 = arith.constant 0 : index
    %c2 = arith.constant 2 : index
    %c0_33 = arith.constant 0 : index
    %18 = vector.load %arg8[%c0_32, %c2, %c0_33] : memref<10x18x128xf32, #tpu.memory_space<vmem>>, vector<8x16x128xf32>
    %19 = vector.shape_cast %18 : vector<8x16x128xf32> to vector<128x128xf32>
    %c0_34 = arith.constant 0 : index
    %c256 = arith.constant 256 : index
    %20 = vector.load %arg9[%c0_34, %c256] : memref<128x1152xf32, #tpu.memory_space<vmem>>, vector<128x128xf32>
    tpu.vector_store %arg9[%c0_34, %c256], %19 {strides = array<i32>} : memref<128x1152xf32, #tpu.memory_space<vmem>>, vector<128x128xf32>,
    %c1_35 = arith.constant 1 : index
    %c0_36 = arith.constant 0 : index
    %c0_37 = arith.constant 0 : index
    %21 = vector.load %arg8[%c1_35, %c0_36, %c0_37] : memref<10x18x128xf32, #tpu.memory_space<vmem>>, vector<8x16x128xf32>
    %22 = vector.shape_cast %21 : vector<8x16x128xf32> to vector<128x128xf32>
    %c0_38 = arith.constant 0 : index
    %c384 = arith.constant 384 : index
    %23 = vector.load %arg9[%c0_38, %c384] : memref<128x1152xf32, #tpu.memory_space<vmem>>, vector<128x128xf32>
    tpu.vector_store %arg9[%c0_38, %c384], %22 {strides = array<i32>} : memref<128x1152xf32, #tpu.memory_space<vmem>>, vector<128x128xf32>,
    %c1_39 = arith.constant 1 : index
    %c1_40 = arith.constant 1 : index
    %c0_41 = arith.constant 0 : index
    %24 = vector.load %arg8[%c1_39, %c1_40, %c0_41] : memref<10x18x128xf32, #tpu.memory_space<vmem>>, vector<8x16x128xf32>
    %25 = vector.shape_cast %24 : vector<8x16x128xf32> to vector<128x128xf32>
    %c0_42 = arith.constant 0 : index
    %c512 = arith.constant 512 : index
    %26 = vector.load %arg9[%c0_42, %c512] : memref<128x1152xf32, #tpu.memory_space<vmem>>, vector<128x128xf32>
    tpu.vector_store %arg9[%c0_42, %c512], %25 {strides = array<i32>} : memref<128x1152xf32, #tpu.memory_space<vmem>>, vector<128x128xf32>,
    %c1_43 = arith.constant 1 : index
    %c2_44 = arith.constant 2 : index
    %c0_45 = arith.constant 0 : index
    %27 = vector.load %arg8[%c1_43, %c2_44, %c0_45] : memref<10x18x128xf32, #tpu.memory_space<vmem>>, vector<8x16x128xf32>
    %28 = vector.shape_cast %27 : vector<8x16x128xf32> to vector<128x128xf32>
    %c0_46 = arith.constant 0 : index
    %c640 = arith.constant 640 : index
    %29 = vector.load %arg9[%c0_46, %c640] : memref<128x1152xf32, #tpu.memory_space<vmem>>, vector<128x128xf32>
    tpu.vector_store %arg9[%c0_46, %c640], %28 {strides = array<i32>} : memref<128x1152xf32, #tpu.memory_space<vmem>>, vector<128x128xf32>,
    %c2_47 = arith.constant 2 : index
    %c0_48 = arith.constant 0 : index
    %c0_49 = arith.constant 0 : index
    %30 = vector.load %arg8[%c2_47, %c0_48, %c0_49] : memref<10x18x128xf32, #tpu.memory_space<vmem>>, vector<8x16x128xf32>
    %31 = vector.shape_cast %30 : vector<8x16x128xf32> to vector<128x128xf32>
    %c0_50 = arith.constant 0 : index
    %c768 = arith.constant 768 : index
    %32 = vector.load %arg9[%c0_50, %c768] : memref<128x1152xf32, #tpu.memory_space<vmem>>, vector<128x128xf32>
    tpu.vector_store %arg9[%c0_50, %c768], %31 {strides = array<i32>} : memref<128x1152xf32, #tpu.memory_space<vmem>>, vector<128x128xf32>,
    %c2_51 = arith.constant 2 : index
    %c1_52 = arith.constant 1 : index
    %c0_53 = arith.constant 0 : index
    %33 = vector.load %arg8[%c2_51, %c1_52, %c0_53] : memref<10x18x128xf32, #tpu.memory_space<vmem>>, vector<8x16x128xf32>
    %34 = vector.shape_cast %33 : vector<8x16x128xf32> to vector<128x128xf32>
    %c0_54 = arith.constant 0 : index
    %c896 = arith.constant 896 : index
    %35 = vector.load %arg9[%c0_54, %c896] : memref<128x1152xf32, #tpu.memory_space<vmem>>, vector<128x128xf32>
    tpu.vector_store %arg9[%c0_54, %c896], %34 {strides = array<i32>} : memref<128x1152xf32, #tpu.memory_space<vmem>>, vector<128x128xf32>,
    %c2_55 = arith.constant 2 : index
    %c2_56 = arith.constant 2 : index
    %c0_57 = arith.constant 0 : index
    %36 = vector.load %arg8[%c2_55, %c2_56, %c0_57] : memref<10x18x128xf32, #tpu.memory_space<vmem>>, vector<8x16x128xf32>
    %37 = vector.shape_cast %36 : vector<8x16x128xf32> to vector<128x128xf32>
    %c0_58 = arith.constant 0 : index
    %c1024 = arith.constant 1024 : index
    %38 = vector.load %arg9[%c0_58, %c1024] : memref<128x1152xf32, #tpu.memory_space<vmem>>, vector<128x128xf32>
    tpu.vector_store %arg9[%c0_58, %c1024], %37 {strides = array<i32>} : memref<128x1152xf32, #tpu.memory_space<vmem>>, vector<128x128xf32>,
    %c0_59 = arith.constant 0 : index
    %c0_60 = arith.constant 0 : index
    %39 = vector.load %arg9[%c0_59, %c0_60] : memref<128x1152xf32, #tpu.memory_space<vmem>>, vector<128x1152xf32>
    %c0_61 = arith.constant 0 : index
    %c0_62 = arith.constant 0 : index
    %40 = vector.load %arg5[%c0_61, %c0_62] : memref<1152x128xf32, #tpu.memory_space<vmem>>, vector<1152x128xf32>
    %cst_63 = arith.constant dense<0.000000e+00> : vector<128x128xf32>
    %41 = tpu.matmul %39, %40, %cst_63 {dimension_numbers = #tpu.dot_dimension_numbers<[1], [0], [0], [1], [0, 0, 1, 1], [], []>} : vector<128x1152xf32>, vector<1152x128xf32>, vector<128x128xf32> -> vector<128x128xf32>
    %c0_64 = arith.constant 0 : index
    %c0_65 = arith.constant 0 : index
    %42 = vector.load %arg6[%c0_64, %c0_65] : memref<1x128xf32, #tpu.memory_space<vmem>>, vector<1x128xf32>
    %43 = vector.shape_cast %42 : vector<1x128xf32> to vector<128xf32>
    %44 = vector.shape_cast %43 : vector<128xf32> to vector<1x128xf32>
    %45 = vector.broadcast %44 : vector<1x128xf32> to vector<128x128xf32>
    %46 = arith.addf %41, %45 : vector<128x128xf32>
    %cst_66 = arith.constant 0.000000e+00 : f32
    %47 = vector.broadcast %cst_66 : f32 to vector<128x128xf32>
    %48 = arith.maximumf %46, %47 : vector<128x128xf32>
    %c0_67 = arith.constant 0 : index
    %c0_68 = arith.constant 0 : index
    %c0_69 = arith.constant 0 : index
    %49 = vector.load %arg7[%c0_67, %c0_68, %c0_69] : memref<1x128x128xf32, #tpu.memory_space<vmem>>, vector<1x128x128xf32>
    %50 = vector.shape_cast %49 : vector<1x128x128xf32> to vector<128x128xf32>
    %51 = vector.shape_cast %48 : vector<128x128xf32> to vector<1x128x128xf32>
    tpu.vector_store %arg7[%c0_67, %c0_68, %c0_69], %51 {strides = array<i32>} : memref<1x128x128xf32, #tpu.memory_space<vmem>>, vector<1x128x128xf32>,
    return
  }
  func.func @transform_0(%arg0: i32, %arg1: i32) -> (i32, i32, i32, i32) {
    %c0_i32 = arith.constant 0 : i32
    %c0_i32_0 = arith.constant 0 : i32
    %c0_i32_1 = arith.constant 0 : i32
    return %arg0, %arg1, %c0_i32, %c0_i32_0 : i32, i32, i32, i32
  }
  func.func @transform_1(%arg0: i32, %arg1: i32) -> (i32, i32, i32, i32) {
    %c0_i32 = arith.constant 0 : i32
    %c0_i32_0 = arith.constant 0 : i32
    %c0_i32_1 = arith.constant 0 : i32
    return %arg0, %arg1, %c0_i32, %c0_i32_0 : i32, i32, i32, i32
  }
  func.func @transform_2(%arg0: i32, %arg1: i32) -> (i32, i32, i32, i32) {
    %c0_i32 = arith.constant 0 : i32
    %c0_i32_0 = arith.constant 0 : i32
    %c0_i32_1 = arith.constant 0 : i32
    return %arg0, %arg1, %c0_i32, %c0_i32_0 : i32, i32, i32, i32
  }
  func.func @transform_3(%arg0: i32, %arg1: i32) -> (i32, i32) {
    %c0_i32 = arith.constant 0 : i32
    %c0_i32_0 = arith.constant 0 : i32
    %c0_i32_1 = arith.constant 0 : i32
    return %c0_i32, %c0_i32_0 : i32, i32
  }
  func.func @transform_4(%arg0: i32, %arg1: i32) -> (i32, i32) {
    %c0_i32 = arith.constant 0 : i32
    %c0_i32_0 = arith.constant 0 : i32
    %c0_i32_1 = arith.constant 0 : i32
    return %c0_i32, %c0_i32_0 : i32, i32
  }
  func.func @transform_5(%arg0: i32, %arg1: i32) -> (i32, i32, i32) {
    %c0_i32 = arith.constant 0 : i32
    %c0_i32_0 = arith.constant 0 : i32
    return %arg0, %arg1, %c0_i32 : i32, i32, i32
  }
}

module attributes {stable_mosaic.version = 11 : i64} {
  func.func @_conv3x3_kernel(%arg0: i32, %arg1: i32, %arg2: memref<1x8x16x128xf32, #tpu.memory_space<vmem>>, %arg3: memref<1x1x16x128xf32, #tpu.memory_space<vmem>>, %arg4: memref<1x1x16x128xf32, #tpu.memory_space<vmem>>, %arg5: memref<1152x128xf32, #tpu.memory_space<vmem>>, %arg6: memref<1x128xf32, #tpu.memory_space<vmem>>, %arg7: memref<1x128x128xf32, #tpu.memory_space<vmem>>, %arg8: memref<10x18x128xf32, #tpu.memory_space<vmem>>, %arg9: memref<128x1152xf32, #tpu.memory_space<vmem>>) attributes {dimension_semantics = [#tpu.dimension_semantics<parallel>, #tpu.dimension_semantics<parallel>], iteration_bounds = array<i64: 2, 2>, scalar_prefetch = 0 : i64, scratch_operands = 2 : i64, tpu.core_type = #tpu.core_type<tc>, window_params = [{transform_indices = @transform_0, window_bounds = array<i64: 1, 8, 16, 128>}, {transform_indices = @transform_1, window_bounds = array<i64: 1, 1, 16, 128>}, {transform_indices = @transform_2, window_bounds = array<i64: 1, 1, 16, 128>}, {pipeline_mode = #tpu.pipeline_mode<synchronous>, transform_indices = @transform_3, window_bounds = array<i64: 1152, 128>}, {pipeline_mode = #tpu.pipeline_mode<synchronous>, transform_indices = @transform_4, window_bounds = array<i64: 1, 128>}, {transform_indices = @transform_5, window_bounds = array<i64: 1, 128, 128>}]} {
    %cst = arith.constant 0.000000e+00 : f32
    %0 = vector.broadcast %cst : f32 to vector<10x1x128xf32>
    %c0 = arith.constant 0 : index
    %c0_0 = arith.constant 0 : index
    %c0_1 = arith.constant 0 : index
    %1 = vector.load %arg8[%c0, %c0_0, %c0_1] : memref<10x18x128xf32, #tpu.memory_space<vmem>>, vector<10x1x128xf32>
    tpu.vector_store %arg8[%c0, %c0_0, %c0_1], %0 {strides = array<i32>} : memref<10x18x128xf32, #tpu.memory_space<vmem>>, vector<10x1x128xf32>,
    %c0_2 = arith.constant 0 : index
    %c17 = arith.constant 17 : index
    %c0_3 = arith.constant 0 : index
    %2 = vector.load %arg8[%c0_2, %c17, %c0_3] : memref<10x18x128xf32, #tpu.memory_space<vmem>>, vector<10x1x128xf32>
    tpu.vector_store %arg8[%c0_2, %c17, %c0_3], %0 {strides = array<i32>} : memref<10x18x128xf32, #tpu.memory_space<vmem>>, vector<10x1x128xf32>,
    %c0_4 = arith.constant 0 : index
    %c0_5 = arith.constant 0 : index
    %c0_6 = arith.constant 0 : index
    %c0_7 = arith.constant 0 : index
    %3 = vector.load %arg3[%c0_4, %c0_5, %c0_6, %c0_7] : memref<1x1x16x128xf32, #tpu.memory_space<vmem>>, vector<1x1x16x128xf32>
    %4 = vector.shape_cast %3 : vector<1x1x16x128xf32> to vector<1x16x128xf32>
    %c0_8 = arith.constant 0 : index
    %c1 = arith.constant 1 : index
    %c0_9 = arith.constant 0 : index
    %5 = vector.load %arg8[%c0_8, %c1, %c0_9] : memref<10x18x128xf32, #tpu.memory_space<vmem>>, vector<1x16x128xf32>
    tpu.vector_store %arg8[%c0_8, %c1, %c0_9], %4 {strides = array<i32>} : memref<10x18x128xf32, #tpu.memory_space<vmem>>, vector<1x16x128xf32>,
    %c0_10 = arith.constant 0 : index
    %c0_11 = arith.constant 0 : index
    %c0_12 = arith.constant 0 : index
    %c0_13 = arith.constant 0 : index
    %6 = vector.load %arg4[%c0_10, %c0_11, %c0_12, %c0_13] : memref<1x1x16x128xf32, #tpu.memory_space<vmem>>, vector<1x1x16x128xf32>
    %7 = vector.shape_cast %6 : vector<1x1x16x128xf32> to vector<1x16x128xf32>
    %c9 = arith.constant 9 : index
    %c1_14 = arith.constant 1 : index
    %c0_15 = arith.constant 0 : index
    %8 = vector.load %arg8[%c9, %c1_14, %c0_15] : memref<10x18x128xf32, #tpu.memory_space<vmem>>, vector<1x16x128xf32>
    tpu.vector_store %arg8[%c9, %c1_14, %c0_15], %7 {strides = array<i32>} : memref<10x18x128xf32, #tpu.memory_space<vmem>>, vector<1x16x128xf32>,
    %c0_16 = arith.constant 0 : index
    %c0_17 = arith.constant 0 : index
    %c0_18 = arith.constant 0 : index
    %c0_19 = arith.constant 0 : index
    %9 = vector.load %arg2[%c0_16, %c0_17, %c0_18, %c0_19] : memref<1x8x16x128xf32, #tpu.memory_space<vmem>>, vector<1x8x16x128xf32>
    %10 = vector.shape_cast %9 : vector<1x8x16x128xf32> to vector<8x16x128xf32>
    %c1_20 = arith.constant 1 : index
    %c1_21 = arith.constant 1 : index
    %c0_22 = arith.constant 0 : index
    %11 = vector.load %arg8[%c1_20, %c1_21, %c0_22] : memref<10x18x128xf32, #tpu.memory_space<vmem>>, vector<8x16x128xf32>
    tpu.vector_store %arg8[%c1_20, %c1_21, %c0_22], %10 {strides = array<i32>} : memref<10x18x128xf32, #tpu.memory_space<vmem>>, vector<8x16x128xf32>,
    %c0_23 = arith.constant 0 : index
    %c0_24 = arith.constant 0 : index
    %c0_25 = arith.constant 0 : index
    %12 = vector.load %arg8[%c0_23, %c0_24, %c0_25] : memref<10x18x128xf32, #tpu.memory_space<vmem>>, vector<8x16x128xf32>
    %13 = vector.shape_cast %12 : vector<8x16x128xf32> to vector<128x128xf32>
    %c0_26 = arith.constant 0 : index
    %c0_27 = arith.constant 0 : index
    %14 = vector.load %arg9[%c0_26, %c0_27] : memref<128x1152xf32, #tpu.memory_space<vmem>>, vector<128x128xf32>
    tpu.vector_store %arg9[%c0_26, %c0_27], %13 {strides = array<i32>} : memref<128x1152xf32, #tpu.memory_space<vmem>>, vector<128x128xf32>,
    %c0_28 = arith.constant 0 : index
    %c1_29 = arith.constant 1 : index
    %c0_30 = arith.constant 0 : index
    %15 = vector.load %arg8[%c0_28, %c1_29, %c0_30] : memref<10x18x128xf32, #tpu.memory_space<vmem>>, vector<8x16x128xf32>
    %16 = vector.shape_cast %15 : vector<8x16x128xf32> to vector<128x128xf32>
    %c0_31 = arith.constant 0 : index
    %c128 = arith.constant 128 : index
    %17 = vector.load %arg9[%c0_31, %c128] : memref<128x1152xf32, #tpu.memory_space<vmem>>, vector<128x128xf32>
    tpu.vector_store %arg9[%c0_31, %c128], %16 {strides = array<i32>} : memref<128x1152xf32, #tpu.memory_space<vmem>>, vector<128x128xf32>,
    %c0_32 = arith.constant 0 : index
    %c2 = arith.constant 2 : index
    %c0_33 = arith.constant 0 : index
    %18 = vector.load %arg8[%c0_32, %c2, %c0_33] : memref<10x18x128xf32, #tpu.memory_space<vmem>>, vector<8x16x128xf32>
    %19 = vector.shape_cast %18 : vector<8x16x128xf32> to vector<128x128xf32>
    %c0_34 = arith.constant 0 : index
    %c256 = arith.constant 256 : index
    %20 = vector.load %arg9[%c0_34, %c256] : memref<128x1152xf32, #tpu.memory_space<vmem>>, vector<128x128xf32>
    tpu.vector_store %arg9[%c0_34, %c256], %19 {strides = array<i32>} : memref<128x1152xf32, #tpu.memory_space<vmem>>, vector<128x128xf32>,
    %c1_35 = arith.constant 1 : index
    %c0_36 = arith.constant 0 : index
    %c0_37 = arith.constant 0 : index
    %21 = vector.load %arg8[%c1_35, %c0_36, %c0_37] : memref<10x18x128xf32, #tpu.memory_space<vmem>>, vector<8x16x128xf32>
    %22 = vector.shape_cast %21 : vector<8x16x128xf32> to vector<128x128xf32>
    %c0_38 = arith.constant 0 : index
    %c384 = arith.constant 384 : index
    %23 = vector.load %arg9[%c0_38, %c384] : memref<128x1152xf32, #tpu.memory_space<vmem>>, vector<128x128xf32>
    tpu.vector_store %arg9[%c0_38, %c384], %22 {strides = array<i32>} : memref<128x1152xf32, #tpu.memory_space<vmem>>, vector<128x128xf32>,
    %c1_39 = arith.constant 1 : index
    %c1_40 = arith.constant 1 : index
    %c0_41 = arith.constant 0 : index
    %24 = vector.load %arg8[%c1_39, %c1_40, %c0_41] : memref<10x18x128xf32, #tpu.memory_space<vmem>>, vector<8x16x128xf32>
    %25 = vector.shape_cast %24 : vector<8x16x128xf32> to vector<128x128xf32>
    %c0_42 = arith.constant 0 : index
    %c512 = arith.constant 512 : index
    %26 = vector.load %arg9[%c0_42, %c512] : memref<128x1152xf32, #tpu.memory_space<vmem>>, vector<128x128xf32>
    tpu.vector_store %arg9[%c0_42, %c512], %25 {strides = array<i32>} : memref<128x1152xf32, #tpu.memory_space<vmem>>, vector<128x128xf32>,
    %c1_43 = arith.constant 1 : index
    %c2_44 = arith.constant 2 : index
    %c0_45 = arith.constant 0 : index
    %27 = vector.load %arg8[%c1_43, %c2_44, %c0_45] : memref<10x18x128xf32, #tpu.memory_space<vmem>>, vector<8x16x128xf32>
    %28 = vector.shape_cast %27 : vector<8x16x128xf32> to vector<128x128xf32>
    %c0_46 = arith.constant 0 : index
    %c640 = arith.constant 640 : index
    %29 = vector.load %arg9[%c0_46, %c640] : memref<128x1152xf32, #tpu.memory_space<vmem>>, vector<128x128xf32>
    tpu.vector_store %arg9[%c0_46, %c640], %28 {strides = array<i32>} : memref<128x1152xf32, #tpu.memory_space<vmem>>, vector<128x128xf32>,
    %c2_47 = arith.constant 2 : index
    %c0_48 = arith.constant 0 : index
    %c0_49 = arith.constant 0 : index
    %30 = vector.load %arg8[%c2_47, %c0_48, %c0_49] : memref<10x18x128xf32, #tpu.memory_space<vmem>>, vector<8x16x128xf32>
    %31 = vector.shape_cast %30 : vector<8x16x128xf32> to vector<128x128xf32>
    %c0_50 = arith.constant 0 : index
    %c768 = arith.constant 768 : index
    %32 = vector.load %arg9[%c0_50, %c768] : memref<128x1152xf32, #tpu.memory_space<vmem>>, vector<128x128xf32>
    tpu.vector_store %arg9[%c0_50, %c768], %31 {strides = array<i32>} : memref<128x1152xf32, #tpu.memory_space<vmem>>, vector<128x128xf32>,
    %c2_51 = arith.constant 2 : index
    %c1_52 = arith.constant 1 : index
    %c0_53 = arith.constant 0 : index
    %33 = vector.load %arg8[%c2_51, %c1_52, %c0_53] : memref<10x18x128xf32, #tpu.memory_space<vmem>>, vector<8x16x128xf32>
    %34 = vector.shape_cast %33 : vector<8x16x128xf32> to vector<128x128xf32>
    %c0_54 = arith.constant 0 : index
    %c896 = arith.constant 896 : index
    %35 = vector.load %arg9[%c0_54, %c896] : memref<128x1152xf32, #tpu.memory_space<vmem>>, vector<128x128xf32>
    tpu.vector_store %arg9[%c0_54, %c896], %34 {strides = array<i32>} : memref<128x1152xf32, #tpu.memory_space<vmem>>, vector<128x128xf32>,
    %c2_55 = arith.constant 2 : index
    %c2_56 = arith.constant 2 : index
    %c0_57 = arith.constant 0 : index
    %36 = vector.load %arg8[%c2_55, %c2_56, %c0_57] : memref<10x18x128xf32, #tpu.memory_space<vmem>>, vector<8x16x128xf32>
    %37 = vector.shape_cast %36 : vector<8x16x128xf32> to vector<128x128xf32>
    %c0_58 = arith.constant 0 : index
    %c1024 = arith.constant 1024 : index
    %38 = vector.load %arg9[%c0_58, %c1024] : memref<128x1152xf32, #tpu.memory_space<vmem>>, vector<128x128xf32>
    tpu.vector_store %arg9[%c0_58, %c1024], %37 {strides = array<i32>} : memref<128x1152xf32, #tpu.memory_space<vmem>>, vector<128x128xf32>,
    %c0_59 = arith.constant 0 : index
    %c0_60 = arith.constant 0 : index
    %39 = vector.load %arg9[%c0_59, %c0_60] : memref<128x1152xf32, #tpu.memory_space<vmem>>, vector<128x1152xf32>
    %c0_61 = arith.constant 0 : index
    %c0_62 = arith.constant 0 : index
    %40 = vector.load %arg5[%c0_61, %c0_62] : memref<1152x128xf32, #tpu.memory_space<vmem>>, vector<1152x128xf32>
    %cst_63 = arith.constant dense<0.000000e+00> : vector<128x128xf32>
    %41 = tpu.matmul %39, %40, %cst_63 {dimension_numbers = #tpu.dot_dimension_numbers<[1], [0], [0], [1], [0, 0, 1, 1], [], []>} : vector<128x1152xf32>, vector<1152x128xf32>, vector<128x128xf32> -> vector<128x128xf32>
    %c0_64 = arith.constant 0 : index
    %c0_65 = arith.constant 0 : index
    %42 = vector.load %arg6[%c0_64, %c0_65] : memref<1x128xf32, #tpu.memory_space<vmem>>, vector<1x128xf32>
    %43 = vector.shape_cast %42 : vector<1x128xf32> to vector<128xf32>
    %44 = vector.shape_cast %43 : vector<128xf32> to vector<1x128xf32>
    %45 = vector.broadcast %44 : vector<1x128xf32> to vector<128x128xf32>
    %46 = arith.addf %41, %45 : vector<128x128xf32>
    %c0_66 = arith.constant 0 : index
    %c0_67 = arith.constant 0 : index
    %c0_68 = arith.constant 0 : index
    %47 = vector.load %arg7[%c0_66, %c0_67, %c0_68] : memref<1x128x128xf32, #tpu.memory_space<vmem>>, vector<1x128x128xf32>
    %48 = vector.shape_cast %47 : vector<1x128x128xf32> to vector<128x128xf32>
    %49 = vector.shape_cast %46 : vector<128x128xf32> to vector<1x128x128xf32>
    tpu.vector_store %arg7[%c0_66, %c0_67, %c0_68], %49 {strides = array<i32>} : memref<1x128x128xf32, #tpu.memory_space<vmem>>, vector<1x128x128xf32>,
    return
  }
  func.func @transform_0(%arg0: i32, %arg1: i32) -> (i32, i32, i32, i32) {
    %c0_i32 = arith.constant 0 : i32
    %c0_i32_0 = arith.constant 0 : i32
    %c0_i32_1 = arith.constant 0 : i32
    return %arg0, %arg1, %c0_i32, %c0_i32_0 : i32, i32, i32, i32
  }
  func.func @transform_1(%arg0: i32, %arg1: i32) -> (i32, i32, i32, i32) {
    %c0_i32 = arith.constant 0 : i32
    %c0_i32_0 = arith.constant 0 : i32
    %c0_i32_1 = arith.constant 0 : i32
    return %arg0, %arg1, %c0_i32, %c0_i32_0 : i32, i32, i32, i32
  }
  func.func @transform_2(%arg0: i32, %arg1: i32) -> (i32, i32, i32, i32) {
    %c0_i32 = arith.constant 0 : i32
    %c0_i32_0 = arith.constant 0 : i32
    %c0_i32_1 = arith.constant 0 : i32
    return %arg0, %arg1, %c0_i32, %c0_i32_0 : i32, i32, i32, i32
  }
  func.func @transform_3(%arg0: i32, %arg1: i32) -> (i32, i32) {
    %c0_i32 = arith.constant 0 : i32
    %c0_i32_0 = arith.constant 0 : i32
    %c0_i32_1 = arith.constant 0 : i32
    return %c0_i32, %c0_i32_0 : i32, i32
  }
  func.func @transform_4(%arg0: i32, %arg1: i32) -> (i32, i32) {
    %c0_i32 = arith.constant 0 : i32
    %c0_i32_0 = arith.constant 0 : i32
    %c0_i32_1 = arith.constant 0 : i32
    return %c0_i32, %c0_i32_0 : i32, i32
  }
  func.func @transform_5(%arg0: i32, %arg1: i32) -> (i32, i32, i32) {
    %c0_i32 = arith.constant 0 : i32
    %c0_i32_0 = arith.constant 0 : i32
    return %arg0, %arg1, %c0_i32 : i32, i32, i32
  }
}

</mosaic_0001>

<bundles_post_ra>
// kernel: instance_branch_forward.7
= control target key start
LH: loop header
LB: loop body
LE: loop exit
PB: predicated region body
PF: predicated region fallthrough
CT: control target
= control target key end

     0   :  { %s1497_s15 = smov 0   ;;  %s1499_s16 = smov 0   ;;  %s1721_s0 = inlined_call_operand.vmem [shape: f32[2,256,128], index: 0, kind: input, shape index: {}]   ;;  %s1722_s1 = inlined_call_operand.vmem [shape: f32[2,256,128], index: 1, kind: input, shape index: {}]   ;;  %s1723_s2 = inlined_call_operand.vmem [shape: f32[128,128], index: 2, kind: input, shape index: {}]   ;;  %s1724_s3 = inlined_call_operand.vmem [shape: f32[1,128], index: 3, kind: input, shape index: {}]   ;;  %s1725_s4 = inlined_call_operand.vmem [shape: f32[2,128,128], index: 4, kind: output, shape index: {}]  }
   0x1   :  { %s1501_s17 = smov 0   ;;  %s1503_s18 = smov 0  }
   0x2   :  { %s1505_s19 = smov 0  }
   0x3 LB: > { %s23_s20 = sadd.s32 1, %s1460_s17  ;;  %s26_s21 = sadd.s32 1, %s1464_s18  ;;  %s1468_s19 = sphi %s1505_s19, %s14_s19   ;;  %s1464_s18 = sphi %s1503_s18, %s1729_s18   ;;  %s1460_s17 = sphi %s1501_s17, %s1728_s17   ;;  %s1456_s16 = sphi %s1499_s16, %s1727_s16   ;;  %s1452_s15 = sphi %s1497_s15, %s1726_s15  }
   0x4   : > { %p24_p0 = scmp.ge.s32.totalorder %s23_s20, 4  ;;  %p1090_p1 = scmp.ge.s32.totalorder %s1468_s19, 1 }
   0x5   : > { %p198_p2 = scmp.lt.s32.totalorder %s1468_s19, 9 }
   0x6   : > { %s1731_s20 = smov (%p24_p0, %s23_s20), 0  ;;  %s1733_s21 = smov (!%p24_p0, %s26_s21), %s1464_s18 }
   0x7   : > { %p199_p3 = pnand %p1090_p1, %p198_p2  ;;  %p28_p4 = scmp.ge.s32.totalorder %s1733_s21, 2 }
   0x8   : > { %s1091_s22 = sshll.u32 (!%p199_p3), %s1452_s15, 3  ;;  %p238_p5 = scmp.lt.s32.totalorder (!%p199_p3), %s1456_s16, 1 }
   0x9   : > { %s1735_s21 = smov (%p28_p4, %s1733_s21), 0  ;;  %202 = sbr.rel (%p199_p3) target bundleno = 695 (0x2b7), region = 36 }
   0xa   : > { %p240_p6 = scmp.lt.s32.totalorder (!%p199_p3), %s1091_s22, 31  ;;  %p1099_p7 = scmp.ne.s32.totalorder (!%p199_p3), %s1452_s15, 0 }
   0xe   : > { %s1737_s16 = smov (!%p238_p5, %s1456_s16), 1  ;;  %s1739_s22 = smov (!%p240_p6, %s1091_s22), 31 }
   0xf   : > { %s1092_s23 = sshll.u32 %s1737_s16, 5  ;;  %s1120_s24 = sshll.u32 %s1737_s16, 7 }
  0x10   : > { %s243_s25 = sadd.s32 %s1092_s23, %s1739_s22  ;;  %s1533_s28 = scalar_lea.vmem %s1725_s4, %s1120_s24 }
  0x11   : > { %s1093_s29 = sshll.u32 %s243_s25, 3  ;;  %265 = sbr.rel (%p1099_p7) target bundleno = 31 (0x1f), region = 40 }
  0x12   : > { %s1538_s6 = scalar_lea.vmem %s1721_s0, %s1093_s29  ;;  %s1543_s9 = scalar_lea.vmem %s1722_s1, %s1093_s29 }
  0x16   : > { %v1470_v0 = vmov 0.0  }
  0x17   : > { %266 = vst [vmem:[#allocation2 + $0x30] sm:$0xff] %v1470_v0  ;;  %267 = vst [vmem:[#allocation2] sm:$0xff] %v1470_v0 }
  0x18   : > { %268 = vst [vmem:[#allocation2 + $0x58] sm:$0xff] %v1470_v0  ;;  %269 = vst [vmem:[#allocation2 + $0x18] sm:$0xff] %v1470_v0 }
  0x19   : > { %270 = vst [vmem:[#allocation2 + $0x50] sm:$0xff] %v1470_v0  ;;  %271 = vst [vmem:[#allocation2 + $0x68] sm:$0xff] %v1470_v0 }
  0x1a   : > { %272 = vst [vmem:[#allocation2 + $0x8] sm:$0xff] %v1470_v0  ;;  %273 = vst [vmem:[#allocation2 + $0x48] sm:$0xff] %v1470_v0 }
  0x1b   : > { %274 = vst [vmem:[#allocation2 + $0x40] sm:$0xff] %v1470_v0  ;;  %275 = vst [vmem:[#allocation2 + $0x20] sm:$0xff] %v1470_v0 }
  0x1c   : > { %276 = vst [vmem:[#allocation2 + $0x10] sm:$0xff] %v1470_v0  ;;  %277 = vst [vmem:[#allocation2 + $0x38] sm:$0xff] %v1470_v0 }
  0x1d   : > { %278 = vst [vmem:[#allocation2 + $0x60] sm:$0xff] %v1470_v0  ;;  %279 = vst [vmem:[#allocation2 + $0x70] sm:$0xff] %v1470_v0 }
  0x1e   : > { %280 = vst [vmem:[#allocation2 + $0x78] sm:$0xff] %v1470_v0  ;;  %281 = vst [vmem:[#allocation2 + $0x28] sm:$0xff] %v1470_v0 }
  0x1f PF: > { %v299_v1 = vld [vmem:[%s1538_s6] sm:$0xff]  ;;  %v300_v2 = vld [vmem:[%s1538_s6 + $0x8] sm:$0xff]  ;;  %v301_v3 = vld [vmem:[%s1538_s6 + $0x10] sm:$0xff]  ;;  %v363_v8 = vlaneseq  ;;  %vm422_vm1 = vcmask 523264   ;;  %p1116_p8 = scmp.ne.s32.totalorder %s1452_s15, 3 }
  0x20   : > { %v307_v4 = vsub.f32 0.0, %v299_v1  ;;  %v308_v5 = vsub.f32 0.0, %v300_v2  ;;  %v309_v6 = vsub.f32 0.0, %v301_v3  ;;  %v302_v7 = vld [vmem:[%s1538_s6 + $0x18] sm:$0xff]  ;;  %v303_v13 = vld [vmem:[%s1538_s6 + $0x20] sm:$0xff]  ;;  %v361_v16 = vld [vmem:[%s1543_s9 + $0x30] sm:$0xff] }
  0x21   : > { %v310_v9 = vsub.f32 0.0, %v302_v7  ;;  %v362_v14 = vld [vmem:[%s1543_s9 + $0x38] sm:$0xff]  ;;  %v1552_v15 = vand.u32 127, %v363_v8  ;;  %v311_v18 = vsub.f32 0.0, %v303_v13  ;;  %v360_v19 = vld [vmem:[%s1543_s9 + $0x28] sm:$0xff]  ;;  %v359_v23 = vld [vmem:[%s1543_s9 + $0x20] sm:$0xff] }
  0x22   : > { %v315_v10 = vmul.f32 1.442695, %v307_v4  ;;  %v317_v11 = vmul.f32 1.442695, %v308_v5  ;;  %v319_v12 = vmul.f32 1.442695, %v309_v6 }
  0x23   : > { %v321_v17 = vmul.f32 1.442695, %v310_v9  ;;  %vm365_vm0 = vcmp.eq.s32.totalorder %v1552_v15, 32  ;;  %v304_v20 = vld [vmem:[%s1538_s6 + $0x28] sm:$0xff]  ;;  %v323_v25 = vmul.f32 1.442695, %v311_v18 }
  0x24   : > { %1364 = vpow2.f32 %v315_v10  ;;  %v373_v21 = vsel %vm365_vm0, 1.0, %v362_v14  ;;  %v372_v22 = vsel %vm365_vm0, 1.0, %v361_v16  ;;  %v371_v24 = vsel %vm365_vm0, 1.0, %v360_v19  ;;  %v305_v27 = vld [vmem:[%s1538_s6 + $0x30] sm:$0xff]  ;;  %v358_v28 = vld [vmem:[%s1543_s9 + $0x18] sm:$0xff]  ;;  %v356_v48 = vld [vmem:[%s1543_s9 + $0x8] sm:$0xff] }
  0x25   : > { %1366 = vpow2.f32 %v317_v11  ;;  %1177 = vmatprep.subr.mxu0 %v373_v21  ;;  %1273 = vmatprep.subr.mxu1 %v373_v21  ;;  %v312_v26 = vsub.f32 0.0, %v304_v20  ;;  %v370_v29 = vsel %vm365_vm0, 1.0, %v359_v23  ;;  %v357_v30 = vld [vmem:[%s1543_s9 + $0x10] sm:$0xff]  ;;  %v313_v31 = vsub.f32 0.0, %v305_v27  ;;  %v306_v34 = vld [vmem:[%s1538_s6 + $0x38] sm:$0xff]  ;;  %v355_v52 = vld [vmem:[%s1543_s9] sm:$0xff] }
  0x26   : > { %1368 = vpow2.f32 %v319_v12  ;;  %1178 = vmatpush3.msra.mxu0 %v373_v21  ;;  %1281 = vmatpush3.msra.mxu1 %v373_v21  ;;  %v369_v32 = vsel %vm365_vm0, 1.0, %v358_v28  ;;  %v368_v35 = vsel %vm365_vm0, 1.0, %v357_v30  ;;  %v314_v38 = vsub.f32 0.0, %v306_v34  ;;  %v375_v19 = vld [vmem:[#allocation2] sm:$0xff]  ;;  %v374_v21 = vld [vmem:[#allocation2 + $0x30] sm:$0xff]  ;;  %v376_v27 = vld [vmem:[#allocation2 + $0x58] sm:$0xff] }
  0x27   : > { %1370 = vpow2.f32 %v321_v17  ;;  %1179 = vmatprep.subr.mxu0 %v372_v22  ;;  %1274 = vmatprep.subr.mxu1 %v372_v22  ;;  %v325_v33 = vmul.f32 1.442695, %v312_v26  ;;  %v327_v37 = vmul.f32 1.442695, %v313_v31  ;;  %v367_v50 = vsel %vm365_vm0, 1.0, %v356_v48  ;;  %v379_v31 = vld [vmem:[#allocation2 + $0x68] sm:$0xff] }
  0x28   : > { %1180 = vmatpush3.msra.mxu0 %v372_v22  ;;  %1282 = vmatpush3.msra.mxu1 %v372_v22  ;;  %1372 = vpow2.f32 %v323_v25  ;;  %v329_v43 = vmul.f32 1.442695, %v314_v38  ;;  %v366_v53 = vsel %vm365_vm0, 1.0, %v355_v52  ;;  %v377_v25 = vld [vmem:[#allocation2 + $0x18] sm:$0xff] }
  0x29   : > { %1181 = vmatprep.subr.mxu0 %v371_v24  ;;  %1275 = vmatprep.subr.mxu1 %v371_v24  ;;  %1374 = vpow2.f32 %v325_v33  ;;  %v378_v33 = vld [vmem:[#allocation2 + $0x50] sm:$0xff] }
  0x2a   : > { %1182 = vmatpush3.msra.mxu0 %v371_v24  ;;  %1283 = vmatpush3.msra.mxu1 %v371_v24 }
  0x2b   : > { %1183 = vmatprep.subr.mxu0 %v370_v29  ;;  %1276 = vmatprep.subr.mxu1 %v370_v29 }
  0x2c   : > { %1184 = vmatpush3.msra.mxu0 %v370_v29  ;;  %1284 = vmatpush3.msra.mxu1 %v370_v29 }
  0x2d   : > { %1185 = vmatprep.subr.mxu0 %v369_v32  ;;  %1277 = vmatprep.subr.mxu1 %v369_v32 }
  0x2e   : > { %1186 = vmatpush3.msra.mxu0 %v369_v32  ;;  %1285 = vmatpush3.msra.mxu1 %v369_v32 }
  0x2f   : > { %1187 = vmatprep.subr.mxu0 %v368_v35  ;;  %1278 = vmatprep.subr.mxu1 %v368_v35 }
  0x30   : > { %1188 = vmatpush3.msra.mxu0 %v368_v35  ;;  %1286 = vmatpush3.msra.mxu1 %v368_v35 }
  0x31   : > { %v1365_v36 = vpop.eup %1364  ;;  %1189 = vmatprep.subr.mxu0 %v367_v50  ;;  %1279 = vmatprep.subr.mxu1 %v367_v50 }
  0x32   : > { %v1367_v39 = vpop.eup %1366  ;;  %v331_v40 = vadd.f32 1.0, %v1365_v36  ;;  %1190 = vmatpush3.msra.mxu0 %v367_v50  ;;  %1287 = vmatpush3.msra.mxu1 %v367_v50 }
  0x33   : > { %v1369_v41 = vpop.eup %1368  ;;  %v332_v42 = vadd.f32 1.0, %v1367_v39  ;;  %1191 = vmatprep.subr.mxu0 %v366_v53  ;;  %1280 = vmatprep.subr.mxu1 %v366_v53  ;;  %v380_v39 = vld [vmem:[#allocation2 + $0x8] sm:$0xff] }
  0x34   : > { %1376 = vrcp.f32 %v331_v40  ;;  %v333_v44 = vadd.f32 1.0, %v1369_v41  ;;  %v1371_v45 = vpop.eup %1370  ;;  %1192 = vmatpush3.msra.mxu0 %v366_v53  ;;  %1288 = vmatpush3.msra.mxu1 %v366_v53 }
  0x35   : > { %1378 = vpow2.f32 %v327_v37  ;;  %v334_v46 = vadd.f32 1.0, %v1371_v45  ;;  %v1373_v47 = vpop.eup %1372  ;;  %v381_v37 = vld [vmem:[#allocation2 + $0x48] sm:$0xff]  ;;  %v382_v45 = vld [vmem:[#allocation2 + $0x40] sm:$0xff] }
  0x36   : > { %1380 = vrcp.f32 %v332_v42  ;;  %v335_v49 = vadd.f32 1.0, %v1373_v47  ;;  %v1375_v51 = vpop.eup %1374 }
  0x37   : > { %1382 = vpow2.f32 %v329_v43  ;;  %v336_v56 = vadd.f32 1.0, %v1375_v51  ;;  %v383_v43 = vld [vmem:[#allocation2 + $0x20] sm:$0xff]  ;;  %v384_v51 = vld [vmem:[#allocation2 + $0x10] sm:$0xff] }
  0x38   : > { %1384 = vrcp.f32 %v333_v44 }
  0x39   : > { %1386 = vrcp.f32 %v334_v46 }
  0x3a   : > { %1388 = vrcp.f32 %v335_v49  ;;  %v385_v49 = vld [vmem:[#allocation2 + $0x38] sm:$0xff] }
  0x3b   : > { %1390 = vrcp.f32 %v336_v56 }
  0x41   : > { %v1377_v54 = vpop.eup %1376 }
  0x42   : > { %v1379_v55 = vpop.eup %1378  ;;  %390 = vxpose.xlu0.b32.start [1/8] (short) %v1377_v54, 128 }
  0x43   : > { %v1381_v57 = vpop.eup %1380  ;;  %v337_v59 = vadd.f32 1.0, %v1379_v55  ;;  %v387_v55 = vld [vmem:[#allocation2 + $0x70] sm:$0xff] }
  0x44   : > { %v1383_v58 = vpop.eup %1382 }
  0x45   : > { %v1385_v60 = vpop.eup %1384  ;;  %1392 = vrcp.f32 %v337_v59  ;;  %v338_v61 = vadd.f32 1.0, %v1383_v58 }
  0x46   : > { %391 = vxpose.xlu0.b32.cont [2/8] (short) %v1381_v57, 128  ;;  %v1387_v62 = vpop.eup %1386  ;;  %v386_v57 = vld [vmem:[#allocation2 + $0x60] sm:$0xff] }
  0x47   : > { %1394 = vrcp.f32 %v338_v61  ;;  %v1389_v63 = vpop.eup %1388  ;;  %v389_v61 = vld [vmem:[#allocation2 + $0x28] sm:$0xff] }
  0x48   : > { %v1391_v0 = vpop.eup %1390 }
  0x4a   : > { %392 = vxpose.xlu0.b32.cont [3/8] (short) %v1385_v60, 128 }
  0x4e   : > { %393 = vxpose.xlu0.b32.cont [4/8] (short) %v1387_v62, 128 }
  0x52   : > { %394 = vxpose.xlu0.b32.cont [5/8] (short) %v1389_v63, 128  ;;  %v1393_v1 = vpop.eup %1392  ;;  %v388_v63 = vld [vmem:[#allocation2 + $0x78] sm:$0xff] }
  0x54   : > { %v1395_v2 = vpop.eup %1394 }
  0x56   : > { %395 = vxpose.xlu0.b32.cont [6/8] (short) %v1391_v0, 128 }
  0x5a   : > { %396 = vxpose.xlu0.b32.cont [7/8] (short) %v1393_v1, 128 }
  0x5e   : > { %397 = vxpose.xlu0.b32.end [8/8] (short) %v1395_v2, 128 }
  0xbe   : > { %v406_v3 = vpop.trf.xlu0 }
  0xbf   : > { %1193 = vmatprep.mubr.msk.f32.mxu0 %vm422_vm1, %v406_v3 }
  0xc2   : > { %v407_v4 = vpop.trf.xlu0 }
  0xc3   : > { %1194 = vmatmul.mubr.msk.f32.vlgmr.msra.gmra.mxu0 %vm422_vm1, %v407_v4 }
  0xc6   : > { %v408_v5 = vpop.trf.xlu0 }
  0xc7   : > { %1196 = vmatprep.mubr.msk.f32.mxu0 %vm422_vm1, %v408_v5 }
  0xca   : > { %v409_v6 = vpop.trf.xlu0 }
  0xcb   : > { %1197 = vmatmul.mubr.msk.f32.gmra.mxu0 %vm422_vm1, %v409_v6 }
  0xce   : > { %v410_v7 = vpop.trf.xlu0 }
  0xcf   : > { %1199 = vmatprep.mubr.msk.f32.mxu0 %vm422_vm1, %v410_v7 }
  0xd2   : > { %v411_v8 = vpop.trf.xlu0 }
  0xd3   : > { %1200 = vmatmul.mubr.msk.f32.gmra.mxu0 %vm422_vm1, %v411_v8 }
  0xd6   : > { %v412_v9 = vpop.trf.xlu0 }
  0xd7   : > { %1202 = vmatprep.mubr.msk.f32.mxu0 %vm422_vm1, %v412_v9 }
  0xda   : > { %v413_v10 = vpop.trf.xlu0 }
  0xdb   : > { %1203 = vmatmul.mubr.msk.f32.gmra.mxu0 %vm422_vm1, %v413_v10 }
  0xde   : > { %v414_v11 = vpop.trf.xlu0 }
  0xdf   : > { %1205 = vmatprep.mubr.msk.f32.mxu1 %vm422_vm1, %v414_v11 }
  0xe2   : > { %v415_v12 = vpop.trf.xlu0 }
  0xe3   : > { %1206 = vmatmul.mubr.msk.f32.vlgmr.msra.gmra.mxu1 %vm422_vm1, %v415_v12 }
  0xe6   : > { %v416_v13 = vpop.trf.xlu0 }
  0xe7   : > { %1208 = vmatprep.mubr.msk.f32.mxu1 %vm422_vm1, %v416_v13 }
  0xea   : > { %v417_v14 = vpop.trf.xlu0 }
  0xeb   : > { %1209 = vmatmul.mubr.msk.f32.gmra.mxu1 %vm422_vm1, %v417_v14 }
  0xee   : > { %v418_v15 = vpop.trf.xlu0 }
  0xef   : > { %1211 = vmatprep.mubr.msk.f32.mxu1 %vm422_vm1, %v418_v15 }
  0xf2   : > { %v419_v16 = vpop.trf.xlu0 }
  0xf3   : > { %1212 = vmatmul.mubr.msk.f32.gmra.mxu1 %vm422_vm1, %v419_v16 }
  0xf6   : > { %v420_v17 = vpop.trf.xlu0 }
  0xf7   : > { %1214 = vmatprep.mubr.msk.f32.mxu1 %vm422_vm1, %v420_v17 }
  0xfa   : > { %v421_v18 = vpop.trf.xlu0 }
  0xfb   : > { %1215 = vmatmul.mubr.msk.f32.gmra.mxu1 %vm422_vm1, %v421_v18 }
 0x183   : > { %v1195_v20 = vpop.f32.mrf.mxu0 }
 0x184   : > { %v617_v22 = vadd.f32 %v1195_v20, %v375_v19 }
 0x185   : > { %v537_v23 = vpop.f32.mrf.mxu0 }
 0x186   : > { %633 = vst [vmem:[#allocation2] sm:$0xff] %v617_v22  ;;  %v616_v24 = vadd.f32 %v537_v23, %v374_v21 }
 0x188   : > { %632 = vst [vmem:[#allocation2 + $0x30] sm:$0xff] %v616_v24 }
 0x18b   : > { %v1198_v26 = vpop.f32.mrf.mxu0 }
 0x18c   : > { %v619_v28 = vadd.f32 %v1198_v26, %v377_v25 }
 0x18d   : > { %v547_v29 = vpop.f32.mrf.mxu0 }
 0x18e   : > { %635 = vst [vmem:[#allocation2 + $0x18] sm:$0xff] %v619_v28  ;;  %v618_v30 = vadd.f32 %v547_v29, %v376_v27 }
 0x190   : > { %634 = vst [vmem:[#allocation2 + $0x58] sm:$0xff] %v618_v30 }
 0x193   : > { %v1201_v32 = vpop.f32.mrf.mxu0 }
 0x194   : > { %v621_v34 = vadd.f32 %v1201_v32, %v379_v31 }
 0x195   : > { %v557_v35 = vpop.f32.mrf.mxu0 }
 0x196   : > { %637 = vst [vmem:[#allocation2 + $0x68] sm:$0xff] %v621_v34  ;;  %v620_v36 = vadd.f32 %v557_v35, %v378_v33 }
 0x198   : > { %636 = vst [vmem:[#allocation2 + $0x50] sm:$0xff] %v620_v36 }
 0x19b   : > { %v1204_v38 = vpop.f32.mrf.mxu0 }
 0x19c   : > { %v623_v40 = vadd.f32 %v1204_v38, %v381_v37 }
 0x19d   : > { %v567_v41 = vpop.f32.mrf.mxu0 }
 0x19e   : > { %639 = vst [vmem:[#allocation2 + $0x48] sm:$0xff] %v623_v40  ;;  %v622_v42 = vadd.f32 %v567_v41, %v380_v39 }
 0x1a0   : > { %638 = vst [vmem:[#allocation2 + $0x8] sm:$0xff] %v622_v42 }
 0x1a3   : > { %v1207_v44 = vpop.f32.mrf.mxu1 }
 0x1a4   : > { %v625_v46 = vadd.f32 %v1207_v44, %v383_v43 }
 0x1a5   : > { %v577_v47 = vpop.f32.mrf.mxu1 }
 0x1a6   : > { %641 = vst [vmem:[#allocation2 + $0x20] sm:$0xff] %v625_v46  ;;  %v624_v48 = vadd.f32 %v577_v47, %v382_v45 }
 0x1a8   : > { %640 = vst [vmem:[#allocation2 + $0x40] sm:$0xff] %v624_v48 }
 0x1ab   : > { %v1210_v50 = vpop.f32.mrf.mxu1 }
 0x1ac   : > { %v627_v52 = vadd.f32 %v1210_v50, %v385_v49 }
 0x1ad   : > { %v587_v53 = vpop.f32.mrf.mxu1 }
 0x1ae   : > { %643 = vst [vmem:[#allocation2 + $0x38] sm:$0xff] %v627_v52  ;;  %v626_v54 = vadd.f32 %v587_v53, %v384_v51 }
 0x1b0   : > { %642 = vst [vmem:[#allocation2 + $0x10] sm:$0xff] %v626_v54 }
 0x1b3   : > { %v1213_v56 = vpop.f32.mrf.mxu1 }
 0x1b4   : > { %v629_v58 = vadd.f32 %v1213_v56, %v387_v55 }
 0x1b5   : > { %v597_v59 = vpop.f32.mrf.mxu1 }
 0x1b6   : > { %645 = vst [vmem:[#allocation2 + $0x70] sm:$0xff] %v629_v58  ;;  %v628_v60 = vadd.f32 %v597_v59, %v386_v57 }
 0x1b8   : > { %644 = vst [vmem:[#allocation2 + $0x60] sm:$0xff] %v628_v60 }
 0x1bb   : > { %v1216_v62 = vpop.f32.mrf.mxu1 }
 0x1bc   : > { %v631_v0 = vadd.f32 %v1216_v62, %v389_v61  ;;  %651 = sbr.rel (%p1116_p8) target bundleno = 695 (0x2b7), region = 44 }
 0x1bd   : > { %v607_v1 = vpop.f32.mrf.mxu1 }
 0x1be   : > { %647 = vst [vmem:[#allocation2 + $0x28] sm:$0xff] %v631_v0  ;;  %v630_v2 = vadd.f32 %v607_v1, %v388_v63 }
 0x1c0   : > { %646 = vst [vmem:[#allocation2 + $0x78] sm:$0xff] %v630_v2 }
 0x1c1   : > { %v683_v3 = vld [vmem:[%s1723_s2 + $0x78] sm:$0xff]  ;;  %v682_v4 = vld [vmem:[%s1723_s2 + $0x70] sm:$0xff]  ;;  %v681_v5 = vld [vmem:[%s1723_s2 + $0x68] sm:$0xff]  ;;  %v1471_v45 = vmov 32  }
 0x1c2   : > { %1217 = vmatprep.subr.mxu0 %v683_v3  ;;  %1289 = vmatprep.subr.mxu1 %v683_v3  ;;  %v680_v6 = vld [vmem:[%s1723_s2 + $0x60] sm:$0xff]  ;;  %v679_v7 = vld [vmem:[%s1723_s2 + $0x58] sm:$0xff]  ;;  %v678_v8 = vld [vmem:[%s1723_s2 + $0x50] sm:$0xff] }
 0x1c3   : > { %1218 = vmatpush3.msra.mxu0 %v683_v3  ;;  %1305 = vmatpush3.msra.mxu1 %v683_v3  ;;  %v677_v9 = vld [vmem:[%s1723_s2 + $0x48] sm:$0xff]  ;;  %v676_v10 = vld [vmem:[%s1723_s2 + $0x40] sm:$0xff]  ;;  %v675_v11 = vld [vmem:[%s1723_s2 + $0x38] sm:$0xff] }
 0x1c4   : > { %1219 = vmatprep.subr.mxu0 %v682_v4  ;;  %1290 = vmatprep.subr.mxu1 %v682_v4  ;;  %v1625_v12 = vld [vmem:[#allocation2 + $0x30] sm:$0xff]  ;;  %v1631_v15 = vld [vmem:[#allocation2 + $0x58] sm:$0xff]  ;;  %v673_v17 = vld [vmem:[%s1723_s2 + $0x28] sm:$0xff] }
 0x1c5   : > { %1220 = vmatpush3.msra.mxu0 %v682_v4  ;;  %1306 = vmatpush3.msra.mxu1 %v682_v4  ;;  %v674_v13 = vld [vmem:[%s1723_s2 + $0x30] sm:$0xff]  ;;  %v829_v14 = vmax.f32 %v1625_v12, 1e-06  ;;  %v831_v16 = vmax.f32 %v1631_v15, 1e-06  ;;  %v653_v18 = vld [vmem:[#allocation2] sm:$0xff] }
 0x1c6   : > { %1221 = vmatprep.subr.mxu0 %v681_v5  ;;  %1291 = vmatprep.subr.mxu1 %v681_v5  ;;  %v672_v19 = vld [vmem:[%s1723_s2 + $0x20] sm:$0xff]  ;;  %v830_v20 = vmax.f32 %v653_v18, 1e-06  ;;  %v1640_v21 = vld [vmem:[#allocation2 + $0x18] sm:$0xff]  ;;  %v656_v24 = vld [vmem:[#allocation2 + $0x50] sm:$0xff] }
 0x1c7   : > { %1222 = vmatpush3.msra.mxu0 %v681_v5  ;;  %1307 = vmatpush3.msra.mxu1 %v681_v5  ;;  %1398 = vrcp.f32 %v829_v14  ;;  %v832_v22 = vmax.f32 %v1640_v21, 1e-06  ;;  %v671_v23 = vld [vmem:[%s1723_s2 + $0x18] sm:$0xff]  ;;  %v670_v25 = vld [vmem:[%s1723_s2 + $0x10] sm:$0xff]  ;;  %v833_v26 = vmax.f32 %v656_v24, 1e-06 }
 0x1c8   : > { %1223 = vmatprep.subr.mxu0 %v680_v6  ;;  %1292 = vmatprep.subr.mxu1 %v680_v6  ;;  %1400 = vrcp.f32 %v831_v16  ;;  %v1649_v27 = vld [vmem:[#allocation2 + $0x68] sm:$0xff]  ;;  %v668_v31 = vld [vmem:[%s1723_s2] sm:$0xff]  ;;  %v662_v38 = vld [vmem:[#allocation2 + $0x10] sm:$0xff] }
 0x1c9   : > { %1224 = vmatpush3.msra.mxu0 %v680_v6  ;;  %1308 = vmatpush3.msra.mxu1 %v680_v6  ;;  %1402 = vrcp.f32 %v830_v20  ;;  %v834_v28 = vmax.f32 %v1649_v27, 1e-06  ;;  %v669_v29 = vld [vmem:[%s1723_s2 + $0x8] sm:$0xff]  ;;  %v660_v35 = vld [vmem:[#allocation2 + $0x40] sm:$0xff]  ;;  %v663_v42 = vld [vmem:[#allocation2 + $0x38] sm:$0xff] }
 0x1ca   : > { %1225 = vmatprep.subr.mxu0 %v679_v7  ;;  %1293 = vmatprep.subr.mxu1 %v679_v7  ;;  %1404 = vrcp.f32 %v832_v22  ;;  %v658_v30 = vld [vmem:[#allocation2 + $0x8] sm:$0xff]  ;;  %v661_v36 = vld [vmem:[#allocation2 + $0x20] sm:$0xff]  ;;  %v837_v37 = vmax.f32 %v660_v35, 1e-06  ;;  %v839_v43 = vmax.f32 %v662_v38, 1e-06 }
 0x1cb   : > { %1226 = vmatpush3.msra.mxu0 %v679_v7  ;;  %1309 = vmatpush3.msra.mxu1 %v679_v7  ;;  %1406 = vrcp.f32 %v833_v26  ;;  %v835_v32 = vmax.f32 %v658_v30, 1e-06  ;;  %v1658_v33 = vld [vmem:[#allocation2 + $0x48] sm:$0xff]  ;;  %v838_v40 = vmax.f32 %v661_v36, 1e-06  ;;  %v664_v44 = vld [vmem:[#allocation2 + $0x60] sm:$0xff] }
 0x1cc   : > { %1227 = vmatprep.subr.mxu0 %v678_v8  ;;  %1294 = vmatprep.subr.mxu1 %v678_v8  ;;  %1408 = vrcp.f32 %v834_v28  ;;  %v836_v34 = vmax.f32 %v1658_v33, 1e-06  ;;  %v840_v47 = vmax.f32 %v663_v42, 1e-06  ;;  %v665_v49 = vld [vmem:[#allocation2 + $0x70] sm:$0xff]  ;;  %v666_v51 = vld [vmem:[#allocation2 + $0x78] sm:$0xff] }
 0x1cd   : > { %1228 = vmatpush3.msra.mxu0 %v678_v8  ;;  %1310 = vmatpush3.msra.mxu1 %v678_v8  ;;  %1410 = vrcp.f32 %v835_v32  ;;  %v841_v50 = vmax.f32 %v664_v44, 1e-06  ;;  %v842_v53 = vmax.f32 %v665_v49, 1e-06  ;;  %v667_v55 = vld [vmem:[#allocation2 + $0x28] sm:$0xff] }
 0x1ce   : > { %1229 = vmatprep.subr.mxu0 %v677_v9  ;;  %1295 = vmatprep.subr.mxu1 %v677_v9  ;;  %1412 = vrcp.f32 %v836_v34  ;;  %v843_v56 = vmax.f32 %v666_v51, 1e-06  ;;  %v844_v58 = vmax.f32 %v667_v55, 1e-06  ;;  %v1671_v16 = vld [vmem:[%s1724_s3] ss:$0 sm:$0xff] }
 0x1cf   : > { %1230 = vmatpush3.msra.mxu0 %v677_v9  ;;  %1311 = vmatpush3.msra.mxu1 %v677_v9  ;;  %1414 = vrcp.f32 %v837_v37 }
 0x1d0   : > { %1231 = vmatprep.subr.mxu0 %v676_v10  ;;  %1296 = vmatprep.subr.mxu1 %v676_v10  ;;  %1416 = vrcp.f32 %v838_v40 }
 0x1d1   : > { %1232 = vmatpush3.msra.mxu0 %v676_v10  ;;  %1312 = vmatpush3.msra.mxu1 %v676_v10  ;;  %1418 = vrcp.f32 %v839_v43 }
 0x1d2   : > { %1233 = vmatprep.subr.mxu0 %v675_v11  ;;  %1297 = vmatprep.subr.mxu1 %v675_v11  ;;  %1420 = vrcp.f32 %v840_v47 }
 0x1d3   : > { %1234 = vmatpush3.msra.mxu0 %v675_v11  ;;  %1313 = vmatpush3.msra.mxu1 %v675_v11  ;;  %1422 = vrcp.f32 %v841_v50 }
 0x1d4   : > { %1235 = vmatprep.subr.mxu0 %v674_v13  ;;  %1298 = vmatprep.subr.mxu1 %v674_v13  ;;  %v1399_v39 = vpop.eup %1398  ;;  %1424 = vrcp.f32 %v842_v53 }
 0x1d5   : > { %1236 = vmatpush3.msra.mxu0 %v674_v13  ;;  %1314 = vmatpush3.msra.mxu1 %v674_v13  ;;  %v1401_v41 = vpop.eup %1400  ;;  %1426 = vrcp.f32 %v843_v56 }
 0x1d6   : > { %1237 = vmatprep.subr.mxu0 %v673_v17  ;;  %1299 = vmatprep.subr.mxu1 %v673_v17  ;;  %v1403_v46 = vpop.eup %1402  ;;  %1428 = vrcp.f32 %v844_v58 }
 0x1d7   : > { %1238 = vmatpush3.msra.mxu0 %v673_v17  ;;  %1315 = vmatpush3.msra.mxu1 %v673_v17  ;;  %v1405_v48 = vpop.eup %1404 }
 0x1d8   : > { %1239 = vmatprep.subr.mxu0 %v672_v19  ;;  %1300 = vmatprep.subr.mxu1 %v672_v19  ;;  %v1407_v52 = vpop.eup %1406 }
 0x1d9   : > { %1240 = vmatpush3.msra.mxu0 %v672_v19  ;;  %1316 = vmatpush3.msra.mxu1 %v672_v19  ;;  %v1409_v54 = vpop.eup %1408 }
 0x1da   : > { %1241 = vmatprep.subr.mxu0 %v671_v23  ;;  %1301 = vmatprep.subr.mxu1 %v671_v23  ;;  %v1411_v57 = vpop.eup %1410 }
 0x1db   : > { %1242 = vmatpush3.msra.mxu0 %v671_v23  ;;  %1317 = vmatpush3.msra.mxu1 %v671_v23  ;;  %v1413_v59 = vpop.eup %1412 }
 0x1dc   : > { %1243 = vmatprep.subr.mxu0 %v670_v25  ;;  %1302 = vmatprep.subr.mxu1 %v670_v25  ;;  %v1415_v60 = vpop.eup %1414 }
 0x1dd   : > { %1244 = vmatpush3.msra.mxu0 %v670_v25  ;;  %1318 = vmatpush3.msra.mxu1 %v670_v25  ;;  %v1417_v61 = vpop.eup %1416 }
 0x1de   : > { %1245 = vmatprep.subr.mxu0 %v669_v29  ;;  %1303 = vmatprep.subr.mxu1 %v669_v29  ;;  %v1419_v62 = vpop.eup %1418 }
 0x1df   : > { %1246 = vmatpush3.msra.mxu0 %v669_v29  ;;  %1319 = vmatpush3.msra.mxu1 %v669_v29  ;;  %v1421_v63 = vpop.eup %1420 }
 0x1e0   : > { %1247 = vmatprep.subr.mxu0 %v668_v31  ;;  %1304 = vmatprep.subr.mxu1 %v668_v31  ;;  %v1423_v0 = vpop.eup %1422 }
 0x1e1   : > { %1248 = vmatpush3.msra.mxu0 %v668_v31  ;;  %1320 = vmatpush3.msra.mxu1 %v668_v31  ;;  %v1425_v1 = vpop.eup %1424 }
 0x1e2   : > { %1249 = vmatprep.mubr.f32.mxu0 %v1625_v12  ;;  %1261 = vmatprep.mubr.f32.mxu1 %v660_v35  ;;  %v1427_v2 = vpop.eup %1426 }
 0x1e3   : > { %1250 = vmatmul.mubr.f32.vlgmr.msra.gmra.mxu0 %v653_v18  ;;  %1262 = vmatmul.mubr.f32.vlgmr.msra.gmra.mxu1 %v661_v36  ;;  %v1429_v3 = vpop.eup %1428 }
 0x1e4   : > { %1252 = vmatprep.mubr.f32.mxu0 %v1631_v15  ;;  %1264 = vmatprep.mubr.f32.mxu1 %v662_v38 }
 0x1e5   : > { %1397 = vset.pattern.permute.xlu1 %v1471_v45  ;;  %1396 = vset.pattern.permute.xlu0 %v1471_v45 }
 0x1e6   : > { %873 = vperm.xlu1 %1397, %v1401_v41   ;;  %863 = vperm.xlu0 %1396, %v1399_v39  }
 0x1e7   : > { %1253 = vmatmul.mubr.f32.gmra.mxu0 %v1640_v21  ;;  %1265 = vmatmul.mubr.f32.gmra.mxu1 %v663_v42 }
 0x1e8   : > { %1255 = vmatprep.mubr.f32.mxu0 %v656_v24  ;;  %1267 = vmatprep.mubr.f32.mxu1 %v664_v44 }
 0x1ea   : > { %878 = vperm.xlu1 %1397, %v1405_v48   ;;  %868 = vperm.xlu0 %1396, %v1403_v46  }
 0x1eb   : > { %1256 = vmatmul.mubr.f32.gmra.mxu0 %v1649_v27  ;;  %1268 = vmatmul.mubr.f32.gmra.mxu1 %v665_v49 }
 0x1ec   : > { %1258 = vmatprep.mubr.f32.mxu0 %v658_v30  ;;  %1270 = vmatprep.mubr.f32.mxu1 %v666_v51 }
 0x1ee   : > { %888 = vperm.xlu1 %1397, %v1409_v54   ;;  %883 = vperm.xlu0 %1396, %v1407_v52  }
 0x1ef   : > { %1259 = vmatmul.mubr.f32.gmra.mxu0 %v1658_v33  ;;  %1271 = vmatmul.mubr.f32.gmra.mxu1 %v667_v55 }
 0x1f2   : > { %898 = vperm.xlu1 %1397, %v1413_v59   ;;  %893 = vperm.xlu0 %1396, %v1411_v57  }
 0x1f6   : > { %908 = vperm.xlu1 %1397, %v1417_v61   ;;  %903 = vperm.xlu0 %1396, %v1415_v60  }
 0x1fa   : > { %918 = vperm.xlu1 %1397, %v1421_v63   ;;  %913 = vperm.xlu0 %1396, %v1419_v62  }
 0x1fe   : > { %928 = vperm.xlu1 %1397, %v1425_v1   ;;  %923 = vperm.xlu0 %1396, %v1423_v0  }
 0x202   : > { %938 = vperm.xlu1 %1397, %v1429_v3   ;;  %933 = vperm.xlu0 %1396, %v1427_v2  }
 0x261   : > { %v874_v4 = vpop.permute.xlu1 %873  ;;  %v864_v5 = vpop.permute.xlu0 %863 }
 0x265   : > { %v879_v6 = vpop.permute.xlu1 %878  ;;  %v869_v7 = vpop.permute.xlu0 %868 }
 0x269   : > { %v889_v8 = vpop.permute.xlu1 %888  ;;  %v884_v9 = vpop.permute.xlu0 %883 }
 0x26d   : > { %v899_v10 = vpop.permute.xlu1 %898  ;;  %v1666_v11 = vpop.permute.xlu0 %893 }
 0x271   : > { %v909_v12 = vpop.permute.xlu1 %908  ;;  %v904_v13 = vpop.permute.xlu0 %903 }
 0x275   : > { %v919_v14 = vpop.permute.xlu1 %918  ;;  %v914_v18 = vpop.permute.xlu0 %913 }
 0x279   : > { %v929_v29 = vpop.permute.xlu1 %928  ;;  %v924_v36 = vpop.permute.xlu0 %923 }
 0x27d   : > { %v939_v49 = vpop.permute.xlu1 %938  ;;  %v934_v56 = vpop.permute.xlu0 %933 }
 0x2a3   : > { %v1251_v15 = vpop.f32.mrf.mxu0  ;;  %v1263_v17 = vpop.f32.mrf.mxu1 }
 0x2a4   : > { %v942_v19 = vmul.f32 %v1251_v15, %v869_v7  ;;  %v950_v20 = vmul.f32 %v1263_v17, %v909_v12 }
 0x2a5   : > { %v750_v21 = vpop.f32.mrf.mxu0  ;;  %v790_v22 = vpop.f32.mrf.mxu1 }
 0x2a6   : > { %v965_v23 = vadd.f32 %v1671_v16, %v942_v19  ;;  %v973_v24 = vadd.f32 %v1671_v16, %v950_v20  ;;  %v941_v25 = vmul.f32 %v864_v5, %v750_v21  ;;  %v949_v26 = vmul.f32 %v904_v13, %v790_v22 }
 0x2a7   : > { %v1254_v27 = vpop.f32.mrf.mxu0  ;;  %v1266_v28 = vpop.f32.mrf.mxu1 }
 0x2a8   : > { %981 = vst [vmem:[%s1533_s28 + $0x8] sm:$0xff] %v965_v23  ;;  %989 = vst [vmem:[%s1533_s28 + $0x48] sm:$0xff] %v973_v24  ;;  %v964_v30 = vadd.f32 %v1671_v16, %v941_v25  ;;  %v972_v31 = vadd.f32 %v1671_v16, %v949_v26  ;;  %v944_v32 = vmul.f32 %v1254_v27, %v879_v6 }
 0x2a9   : > { %v952_v33 = vmul.f32 %v1266_v28, %v919_v14  ;;  %v760_v34 = vpop.f32.mrf.mxu0  ;;  %v800_v35 = vpop.f32.mrf.mxu1 }
 0x2aa   : > { %980 = vst [vmem:[%s1533_s28] sm:$0xff] %v964_v30  ;;  %988 = vst [vmem:[%s1533_s28 + $0x40] sm:$0xff] %v972_v31  ;;  %v967_v37 = vadd.f32 %v1671_v16, %v944_v32  ;;  %v943_v39 = vmul.f32 %v874_v4, %v760_v34  ;;  %v951_v40 = vmul.f32 %v914_v18, %v800_v35 }
 0x2ab   : > { %v975_v38 = vadd.f32 %v1671_v16, %v952_v33  ;;  %v1257_v41 = vpop.f32.mrf.mxu0  ;;  %v1269_v42 = vpop.f32.mrf.mxu1 }
 0x2ac   : > { %983 = vst [vmem:[%s1533_s28 + $0x18] sm:$0xff] %v967_v37  ;;  %v966_v43 = vadd.f32 %v1671_v16, %v943_v39  ;;  %v974_v44 = vadd.f32 %v1671_v16, %v951_v40  ;;  %v946_v45 = vmul.f32 %v1257_v41, %v889_v8  ;;  %v954_v46 = vmul.f32 %v1269_v42, %v929_v29 }
 0x2ad   : > { %991 = vst [vmem:[%s1533_s28 + $0x58] sm:$0xff] %v975_v38  ;;  %v770_v47 = vpop.f32.mrf.mxu0  ;;  %v810_v48 = vpop.f32.mrf.mxu1 }
 0x2ae   : > { %982 = vst [vmem:[%s1533_s28 + $0x10] sm:$0xff] %v966_v43  ;;  %990 = vst [vmem:[%s1533_s28 + $0x50] sm:$0xff] %v974_v44  ;;  %v969_v50 = vadd.f32 %v1671_v16, %v946_v45  ;;  %v977_v51 = vadd.f32 %v1671_v16, %v954_v46  ;;  %v945_v52 = vmul.f32 %v884_v9, %v770_v47 }
 0x2af   : > { %v953_v53 = vmul.f32 %v924_v36, %v810_v48  ;;  %v1260_v54 = vpop.f32.mrf.mxu0  ;;  %v1272_v55 = vpop.f32.mrf.mxu1 }
 0x2b0   : > { %985 = vst [vmem:[%s1533_s28 + $0x28] sm:$0xff] %v969_v50  ;;  %993 = vst [vmem:[%s1533_s28 + $0x68] sm:$0xff] %v977_v51  ;;  %v968_v57 = vadd.f32 %v1671_v16, %v945_v52  ;;  %v948_v59 = vmul.f32 %v1260_v54, %v899_v10  ;;  %v956_v60 = vmul.f32 %v1272_v55, %v939_v49 }
 0x2b1   : > { %v976_v58 = vadd.f32 %v1671_v16, %v953_v53  ;;  %v780_v61 = vpop.f32.mrf.mxu0  ;;  %v820_v62 = vpop.f32.mrf.mxu1 }
 0x2b2   : > { %984 = vst [vmem:[%s1533_s28 + $0x20] sm:$0xff] %v968_v57  ;;  %v971_v63 = vadd.f32 %v1671_v16, %v948_v59  ;;  %v979_v0 = vadd.f32 %v1671_v16, %v956_v60  ;;  %v947_v1 = vmul.f32 %v1666_v11, %v780_v61  ;;  %v955_v2 = vmul.f32 %v934_v56, %v820_v62 }
 0x2b3   : > { %992 = vst [vmem:[%s1533_s28 + $0x60] sm:$0xff] %v976_v58 }
 0x2b4   : > { %987 = vst [vmem:[%s1533_s28 + $0x38] sm:$0xff] %v971_v63  ;;  %995 = vst [vmem:[%s1533_s28 + $0x78] sm:$0xff] %v979_v0  ;;  %v970_v3 = vadd.f32 %v1671_v16, %v947_v1  ;;  %v978_v4 = vadd.f32 %v1671_v16, %v955_v2 }
 0x2b6   : > { %986 = vst [vmem:[%s1533_s28 + $0x30] sm:$0xff] %v970_v3  ;;  %994 = vst [vmem:[%s1533_s28 + $0x70] sm:$0xff] %v978_v4 }
 0x2b7 PF: > { %s14_s19 = sadd.s32 1, %s1468_s19   ;;  %s1726_s15 = smov %s1460_s17 }
 0x2b8   : > { %p11_p9 = scmp.ge.s32.totalorder %s14_s19, 10   ;;  %s1727_s16 = smov %s1464_s18 }
 0x2b9   : > { %s1728_s17 = smov %s1731_s20  ;;  %s1729_s18 = smov %s1735_s21 }
 0x2ba   :  { %13 = sbr.rel (!%p11_p9) target bundleno = 3 (0x3), region = 77 }

// kernel: instance_branch_forward.4
= control target key start
LH: loop header
LB: loop body
LE: loop exit
PB: predicated region body
PF: predicated region fallthrough
CT: control target
= control target key end

     0   :  { %10 = vsyncpa [#allocation5], 0  ;;  %s2570_s0 = inlined_call_operand.vmem [shape: f32[2,16,16,4], index: 0, kind: input, shape index: {}]   ;;  %s2571_s1 = inlined_call_operand.vmem [shape: f32[2,2,16,4], index: 1, kind: input, shape index: {}]   ;;  %s2572_s2 = inlined_call_operand.vmem [shape: f32[2,2,16,4], index: 2, kind: input, shape index: {}]   ;;  %s2573_s3 = inlined_call_operand.hbm [shape: f32[36,128], index: 3, kind: input, shape index: {}]   ;;  %s2574_s4 = inlined_call_operand.hbm [shape: f32[1,128], index: 4, kind: input, shape index: {}]   ;;  %s2575_s5 = inlined_call_operand.vmem [shape: f32[2,256,128], index: 5, kind: output, shape index: {}]  }
   0x1   :  { %11 = vsyncpa [#allocation7], 0  ;;  %s1973_s18 = smov 0   ;;  %s1975_s19 = smov 0  }
   0x2   :  { %s1977_s20 = smov 0   ;;  %s1979_s21 = smov 0  }
   0x3   :  { %s1981_s22 = smov 0  }
   0x4 LB: > { %s1651_s23 = sadd.s32 4294967295, %s1928_s22   ;;  %s26_s24 = sadd.s32 1, %s1920_s20  ;;  %s1928_s22 = sphi %s1981_s22, %s17_s22   ;;  %s1924_s21 = sphi %s1979_s21, %s2583_s21   ;;  %s1920_s20 = sphi %s1977_s20, %s2582_s20   ;;  %s1916_s19 = sphi %s1975_s19, %s2581_s19   ;;  %s1912_s18 = sphi %s1973_s18, %s2580_s18  }
   0x5   : > { %p27_p0 = scmp.ge.s32.totalorder %s26_s24, 2  ;;  %s29_s25 = sadd.s32 1, %s1924_s21 }
   0x6   : > { %p1653_p1 = scmp.ge.s32.totalorder %s1928_s22, 1  ;;  %p188_p2 = scmp.lt.s32.totalorder %s1928_s22, 5 }
   0x7   : > { %s2585_s24 = smov (%p27_p0, %s26_s24), 0  ;;  %s2587_s25 = smov (!%p27_p0, %s29_s25), %s1924_s21 }
   0x8   : > { %p2006_p3 = pnand %p1653_p1, %p188_p2  ;;  %p31_p4 = scmp.ge.s32.totalorder %s2587_s25, 2 }
   0x9   : > { %p2010_p5 = scmp.eq.s32.totalorder %s1651_s23, 0  ;;  %s1930_s28 = smov [#allocation4]  }
   0xa   : > { %p1766_p6 = pneg %p2006_p3  ;;  %s2589_s25 = smov (%p31_p4, %s2587_s25), 0 }
   0xb   : > { %s200_s29 = sshll.u32 %s1930_s28, 4  ;;  %s201_s29 = int_to_ptr.vmem [resolvable:$true] %s200_s29 }
   0xc   : > { %p2020_p7 = pnand %p2010_p5, %p1766_p6  ;;  %s1841_s6 = scalar_lea.vmem %s201_s29, 640 }
   0xd   : > { %p1842_p9 = scmp.ne.s32.totalorder %s201_s29, %s1841_s6  ;;  %p1849_p12 = scmp.lt.s32.totalorder %s201_s29, %s201_s29 }
   0xe   : > { %p1832_p8 = pneg %p2020_p7  ;;  %p1850_p13 = scmp.lt.s32.totalorder %s1841_s6, %s1841_s6 }
  0x10   : > { %p1844_p10 = pnand %p1842_p9, %p1832_p8  ;;  %p1851_p0 = por %p1850_p13, %p1849_p12 }
  0x12   : > { %p1845_p11 = pneg %p1844_p10 }
  0x14   : > { %p1852_p1 = pnand %p1851_p0, %p1845_p11 }
  0x16   : > { %1855 = shalt.err (!%p1852_p1)
}
  0x17   : > { %s1931_s7 = smov 128   ;;  %s1932_s8 = smov 8  }
  0x18   : > { %1769 = dma.hbm_to_vmem [thread:$0]  (!%p2020_p7), %s2573_s3, 640, %s201_s29, [#allocation5], %s1931_s7, %s1931_s7, %s1932_s8  }
  0x19   : > { %s1933_s11 = smov [#allocation6]  }
  0x1a   : > { %s214_s12 = sshll.u32 %s1933_s11, 4  ;;  %s215_s12 = int_to_ptr.vmem [resolvable:$true] %s214_s12 }
  0x1b   : > { %s1867_s13 = scalar_lea.vmem %s215_s12, 16  ;;  %s1874_s14 = scalar_lea.vmem %s215_s12, 32 }
  0x1c   : > { %p1868_p2 = scmp.ne.s32.totalorder %s215_s12, %s1867_s13  ;;  %p1875_p9 = scmp.lt.s32.totalorder %s215_s12, %s215_s12 }
  0x1d   : > { %p1876_p10 = scmp.lt.s32.totalorder %s1874_s14, %s1867_s13 }
  0x1e   : > { %p1870_p4 = pnand %p1868_p2, %p1832_p8 }
  0x1f   : > { %p1877_p11 = por %p1876_p10, %p1875_p9 }
  0x20   : > { %p1871_p6 = pneg %p1870_p4 }
  0x22   : > { %p1878_p12 = pnand %p1877_p11, %p1871_p6 }
  0x24   : > { %1881 = shalt.err (!%p1878_p12)
}
  0x25   : > { %1772 = dma.hbm_to_vmem [thread:$0]  (!%p2020_p7), %s2574_s4, 16, %s215_s12, [#allocation7]  }
  0x26   : > { %265 = sbr.rel (%p2006_p3) target bundleno = 647 (0x287), region = 40 }
  0x2b   : > { %1903 = dma.done.wait (%p2010_p5), [#allocation5], 640  }
  0x2c   : > { %1905 = vsyncadd (%p2010_p5), [#allocation5], 4294966656 }
  0x2d   : > { %1907 = dma.done.wait (%p2010_p5), [#allocation7], 16  }
  0x2e   : > { %1909 = vsyncadd (%p2010_p5), [#allocation7], 4294967280  ;;  %s1660_s17 = sshll.u32 %s1912_s18, 3  ;;  %p325_p7 = scmp.lt.s32.totalorder %s1916_s19, 1  ;;  %vm363_vm0 = vcmask 24576   ;;  %v1934_v0 = vmov 0.0  }
  0x2f   : > { %p2054_p8 = scmp.lt.s32.totalorder %s1660_s17, 15  ;;  %374 = vst.msk [vmem:[#allocation2 + $0x11] sm:$0x1] %vm363_vm0, %v1934_v0  ;;  %364 = vst.msk [vmem:[#allocation2] sm:$0x1] %vm363_vm0, %v1934_v0  ;;  %p337_p3 = scmp.lt.s32.totalorder %s1912_s18, 1 }
  0x30   : > { %s2591_s19 = smov (!%p325_p7, %s1916_s19), 1  ;;  %365 = vst.msk [vmem:[#allocation2 + $0x18] sm:$0x1] %vm363_vm0, %v1934_v0  ;;  %366 = vst.msk [vmem:[#allocation2 + $0x30] sm:$0x1] %vm363_vm0, %v1934_v0  ;;  %vm386_vm1 = vcmask 31744  }
  0x31   : > { %367 = vst.msk [vmem:[#allocation2 + $0x48] sm:$0x1] %vm363_vm0, %v1934_v0  ;;  %368 = vst.msk [vmem:[#allocation2 + $0x60] sm:$0x1] %vm363_vm0, %v1934_v0  ;;  %s2593_s17 = smov (!%p2054_p8, %s1660_s17), 15  ;;  %s1662_s26 = sshll.u32 %s2591_s19, 5 }
  0x32   : > { %369 = vst.msk [vmem:[#allocation2 + $0x78] sm:$0x1] %vm363_vm0, %v1934_v0  ;;  %370 = vst.msk [vmem:[#allocation2 + $0x90] sm:$0x1] %vm363_vm0, %v1934_v0  ;;  %s1661_s27 = sshll.u32 %s2593_s17, 1  ;;  %s1665_s8 = sshll.u32 %s2591_s19, 2 }
  0x33   : > { %371 = vst.msk [vmem:[#allocation2 + $0xa8] sm:$0x1] %vm363_vm0, %v1934_v0  ;;  %372 = vst.msk [vmem:[#allocation2 + $0xc0] sm:$0x1] %vm363_vm0, %v1934_v0  ;;  %s331_s28 = sadd.s32 %s1662_s26, %s1661_s27  ;;  %s1935_s16 = smov 4   ;;  %vm1313_vm2 = vcmask 1043456  }
  0x34   : > { %373 = vst.msk [vmem:[#allocation2 + $0xd8] sm:$0x1] %vm363_vm0, %v1934_v0  ;;  %375 = vst.msk [vmem:[#allocation2 + $0x29] sm:$0x1] %vm363_vm0, %v1934_v0  ;;  %s1663_s29 = sshll.u32 %s331_s28, 3  ;;  %s1936_s17 = smov 8  }
  0x35   : > { %376 = vst.msk [vmem:[#allocation2 + $0x41] sm:$0x1] %vm363_vm0, %v1934_v0  ;;  %377 = vst.msk [vmem:[#allocation2 + $0x59] sm:$0x1] %vm363_vm0, %v1934_v0  ;;  %s2090_s7 = scalar_lea.vmem %s2570_s0, %s1663_s29  ;;  %s1937_s23 = smov 12   ;;  %v1255_v58 = vld [vmem:[#allocation4 + $0x18] sm:$0xff] }
  0x36   : > { %378 = vst.msk [vmem:[#allocation2 + $0x71] sm:$0x1] %vm363_vm0, %v1934_v0  ;;  %379 = vst.msk [vmem:[#allocation2 + $0x89] sm:$0x1] %vm363_vm0, %v1934_v0  ;;  %s338_s9 = scalar_select %p337_p3, %s1912_s18, 1  ;;  %v401_v1 = vld [vmem:[%s2090_s7 + $0x38] sm:$0xff] }
  0x37   : > { %380 = vst.msk [vmem:[#allocation2 + $0xa1] sm:$0x1] %vm363_vm0, %v1934_v0  ;;  %381 = vst.msk [vmem:[#allocation2 + $0xb9] sm:$0x1] %vm363_vm0, %v1934_v0  ;;  %v400_v2 = vld [vmem:[%s2090_s7 + $0x30] sm:$0xff]  ;;  %v402_v3 = vld [vmem:[%s2090_s7 + $0x40] sm:$0xff] }
  0x38   : > { %382 = vst.msk [vmem:[#allocation2 + $0xd1] sm:$0x1] %vm363_vm0, %v1934_v0  ;;  %383 = vst.msk [vmem:[#allocation2 + $0xe9] sm:$0x1] %vm363_vm0, %v1934_v0  ;;  %v394_v4 = vld [vmem:[%s2090_s7] sm:$0xff]  ;;  %v403_v5 = vld [vmem:[%s2090_s7 + $0x48] sm:$0xff] }
  0x39   : > { %418 = vst.msk [vmem:[#allocation2 + $0x69] sm:$0xff] %vm386_vm1, %v401_v1  ;;  %417 = vst.msk [vmem:[#allocation2 + $0x61] sm:$0xff] %vm386_vm1, %v400_v2  ;;  %v395_v6 = vld [vmem:[%s2090_s7 + $0x8] sm:$0xff]  ;;  %s1664_s10 = sshll.u32 %s338_s9, 1  ;;  %v404_v7 = vld [vmem:[%s2090_s7 + $0x50] sm:$0xff]  ;;  %s1938_s27 = smov 16  }
  0x3a   : > { %419 = vst.msk [vmem:[#allocation2 + $0x79] sm:$0xff] %vm386_vm1, %v402_v3  ;;  %411 = vst.msk [vmem:[#allocation2 + $0x19] sm:$0xff] %vm386_vm1, %v394_v4  ;;  %v396_v8 = vld [vmem:[%s2090_s7 + $0x10] sm:$0xff]  ;;  %v405_v9 = vld [vmem:[%s2090_s7 + $0x58] sm:$0xff]  ;;  %s2109_s11 = sadd.s32 %s1665_s8, %s1664_s10  ;;  %s1939_s28 = smov 20   ;;  %vm539_vm3 = vcmask 64544  }
  0x3b   : > { %420 = vst.msk [vmem:[#allocation2 + $0x81] sm:$0xff] %vm386_vm1, %v403_v5  ;;  %412 = vst.msk [vmem:[#allocation2 + $0x21] sm:$0xff] %vm386_vm1, %v395_v6  ;;  %v397_v10 = vld [vmem:[%s2090_s7 + $0x18] sm:$0xff]  ;;  %v406_v11 = vld [vmem:[%s2090_s7 + $0x60] sm:$0xff]  ;;  %s1666_s12 = sshll.u32 %s2109_s11, 3  ;;  %s1940_s29 = smov 24  }
  0x3c   : > { %421 = vst.msk [vmem:[#allocation2 + $0x91] sm:$0xff] %vm386_vm1, %v404_v7  ;;  %413 = vst.msk [vmem:[#allocation2 + $0x31] sm:$0xff] %vm386_vm1, %v396_v8  ;;  %v398_v12 = vld [vmem:[%s2090_s7 + $0x20] sm:$0xff]  ;;  %s343_s15 = scalar_lea.vmem %s2571_s1, %s1666_s12  ;;  %v407_v15 = vld [vmem:[%s2090_s7 + $0x68] sm:$0xff]  ;;  %s1941_s30 = smov 28   ;;  %vm636_vm4 = vcmask 97344  }
  0x3d   : > { %422 = vst.msk [vmem:[#allocation2 + $0x99] sm:$0xff] %vm386_vm1, %v405_v9  ;;  %414 = vst.msk [vmem:[#allocation2 + $0x39] sm:$0xff] %vm386_vm1, %v397_v10  ;;  %v385_v13 = vld [vmem:[%s343_s15 + $0x8] sm:$0xff]  ;;  %v384_v14 = vld [vmem:[%s343_s15] sm:$0xff]  ;;  %s1942_s6 = smov 32   ;;  %s352_s9 = scalar_lea.vmem %s2572_s2, %s1666_s12  ;;  %vm733_vm5 = vcmask 130144  }
  0x3e   : > { %423 = vst.msk [vmem:[#allocation2 + $0xa9] sm:$0xff] %vm386_vm1, %v406_v11  ;;  %415 = vst.msk [vmem:[#allocation2 + $0x49] sm:$0xff] %vm386_vm1, %v398_v12  ;;  %v399_v16 = vld [vmem:[%s2090_s7 + $0x28] sm:$0xff]  ;;  %v408_v47 = vld [vmem:[%s2090_s7 + $0x70] sm:$0xff]  ;;  %vm830_vm6 = vcmask 162944   ;;  %vm927_vm7 = vcmask 195744  }
  0x3f   : > { %388 = vst.msk [vmem:[#allocation2 + $0x9] sm:$0xff] %vm386_vm1, %v385_v13  ;;  %387 = vst.msk [vmem:[#allocation2 + $0x1] sm:$0xff] %vm386_vm1, %v384_v14  ;;  %v409_v50 = vld [vmem:[%s2090_s7 + $0x78] sm:$0xff]  ;;  %v1256_v57 = vld [vmem:[#allocation4 + $0x20] sm:$0xf]  ;;  %vm1025_vm8 = vcmask 228544  }
  0x40   : > { %424 = vst.msk [vmem:[#allocation2 + $0xb1] sm:$0xff] %vm386_vm1, %v407_v15  ;;  %416 = vst.msk [vmem:[#allocation2 + $0x51] sm:$0xff] %vm386_vm1, %v399_v16  ;;  %v2156_v27 = vld [vmem:[#allocation2 + $0x69] sm:$0xff]  ;;  %v2175_v36 = vld [vmem:[#allocation2 + $0x60] sm:$0xff]  ;;  %1714 = vmatprep.subr.msk.mxu0 %vm1313_vm2, %v1256_v57  ;;  %1748 = vmatprep.subr.msk.mxu1 %vm1313_vm2, %v1256_v57  ;;  %vm1122_vm9 = vcmask 261344   ;;  %vm1219_vm10 = vcmask 294144  }
  0x41   : > { %v2132_v17 = vld [vmem:[#allocation2 + $0x78] sm:$0xff]  ;;  %v2162_v29 = vld [vmem:[#allocation2 + $0x62] sm:$0xff]  ;;  %451 = vst.msk [vmem:[#allocation3 + $0x40] sm:$0xff] %vm386_vm1, %v2175_v36  ;;  %v2196_v39 = vld [vmem:[#allocation2 + $0x6a] sm:$0xff]  ;;  %1715 = vmatpush3.msk.msra.mxu0 %vm1313_vm2, %v1256_v57  ;;  %1753 = vmatpush3.msk.msra.mxu1 %vm1313_vm2, %v1256_v57  ;;  %vm1264_vm11 = vcmask 293888   ;;  %s1670_s10 = sshll.u32 %s1912_s18, 4 }
  0x42   : > { %v653_v18 = vld [vmem:[#allocation2 + $0x18] sm:$0xff]  ;;  %v2134_v19 = vld [vmem:[#allocation2 + $0x80] sm:$0xff]  ;;  %453 = vst.msk [vmem:[#allocation3 + $0x50] sm:$0xff] %vm386_vm1, %v2132_v17  ;;  %v2173_v35 = vld [vmem:[#allocation2 + $0x68] sm:$0xff]  ;;  %1716 = vmatprep.subr.mxu0 %v1255_v58  ;;  %1749 = vmatprep.subr.mxu1 %v1255_v58  ;;  %p356_p5 = scmp.lt.s32.totalorder %s1670_s10, 31 }
  0x43   : > { %v654_v20 = vld [vmem:[#allocation2 + $0x20] sm:$0xff]  ;;  %445 = vst.msk [vmem:[#allocation3 + $0x10] sm:$0xff] %vm386_vm1, %v653_v18  ;;  %454 = vst.msk [vmem:[#allocation3 + $0x58] sm:$0xff] %vm386_vm1, %v2134_v19  ;;  %v2142_v21 = vld [vmem:[#allocation2 + $0x90] sm:$0xff]  ;;  %1717 = vmatpush3.msra.mxu0 %v1255_v58  ;;  %1754 = vmatpush3.msra.mxu1 %v1255_v58 }
  0x44   : > { %446 = vst.msk [vmem:[#allocation3 + $0x18] sm:$0xff] %vm386_vm1, %v654_v20  ;;  %v2144_v22 = vld [vmem:[#allocation2 + $0x30] sm:$0xff]  ;;  %455 = vst.msk [vmem:[#allocation3 + $0x60] sm:$0xff] %vm386_vm1, %v2142_v21  ;;  %v2152_v25 = vld [vmem:[#allocation2 + $0x98] sm:$0xff]  ;;  %s2595_s10 = smov (!%p356_p5, %s1670_s10), 31 }
  0x45   : > { %447 = vst.msk [vmem:[#allocation3 + $0x20] sm:$0xff] %vm386_vm1, %v2144_v22  ;;  %v2154_v26 = vld [vmem:[#allocation2 + $0x38] sm:$0xff]  ;;  %456 = vst.msk [vmem:[#allocation3 + $0x68] sm:$0xff] %vm386_vm1, %v2152_v25  ;;  %v2168_v33 = vld [vmem:[#allocation2 + $0xa8] sm:$0xff]  ;;  %s359_s11 = sadd.s32 %s1662_s26, %s2595_s10 }
  0x46   : > { %v460_v23 = vld [vmem:[#allocation2 + $0x9] sm:$0xff]  ;;  %v459_v24 = vld [vmem:[#allocation2 + $0x1] sm:$0xff]  ;;  %448 = vst.msk [vmem:[#allocation3 + $0x28] sm:$0xff] %vm386_vm1, %v2154_v26  ;;  %457 = vst.msk [vmem:[#allocation3 + $0x70] sm:$0xff] %vm386_vm1, %v2168_v33  ;;  %s1672_s12 = sshll.u32 %s359_s11, 3 }
  0x47   : > { %493 = vrot.lane.b32.xlu1 %v460_v23, %s1935_s16  ;;  %491 = vrot.lane.b32.xlu0 %v459_v24, %s1935_s16  ;;  %v556_v28 = vld [vmem:[#allocation2 + $0x2] sm:$0xff]  ;;  %v557_v30 = vld [vmem:[#allocation2 + $0xa] sm:$0xff]  ;;  %452 = vst.msk [vmem:[#allocation3 + $0x48] sm:$0xff] %vm386_vm1, %v2173_v35  ;;  %v2210_v41 = vld [vmem:[#allocation2 + $0x79] sm:$0xff]  ;;  %s2537_s15 = scalar_lea.vmem %s2575_s5, %s1672_s12 }
  0x48   : > { %v428_v31 = vld [vmem:[#allocation2 + $0x8] sm:$0xff]  ;;  %v427_v32 = vld [vmem:[#allocation2] sm:$0xff]  ;;  %v2177_v37 = vld [vmem:[#allocation2 + $0xb0] sm:$0xff]  ;;  %425 = vst.msk [vmem:[#allocation2 + $0xc1] sm:$0xff] %vm386_vm1, %v408_v47 }
  0x49   : > { %444 = vst.msk [vmem:[#allocation3 + $0x8] sm:$0xff] %vm386_vm1, %v428_v31  ;;  %v2170_v34 = vld [vmem:[#allocation2 + $0x48] sm:$0xff]  ;;  %443 = vst.msk [vmem:[#allocation3] sm:$0xff] %vm386_vm1, %v427_v32  ;;  %v2187_v38 = vld [vmem:[#allocation2 + $0x50] sm:$0xff] }
  0x4a   : > { %449 = vst.msk [vmem:[#allocation3 + $0x30] sm:$0xff] %vm386_vm1, %v2170_v34  ;;  %458 = vst.msk [vmem:[#allocation3 + $0x78] sm:$0xff] %vm386_vm1, %v2177_v37  ;;  %v2198_v40 = vld [vmem:[#allocation2 + $0x61] sm:$0xff]  ;;  %v750_v42 = vld [vmem:[#allocation2 + $0x19] sm:$0xff] }
  0x4b   : > { %509 = vrot.lane.b32.xlu1 %v2156_v27, %s1935_s16  ;;  %588 = vrot.lane.b32.xlu0 %v556_v28, %s1936_s17  ;;  %450 = vst.msk [vmem:[#allocation3 + $0x38] sm:$0xff] %vm386_vm1, %v2187_v38  ;;  %v2218_v43 = vld [vmem:[#allocation2 + $0x81] sm:$0xff]  ;;  %426 = vst.msk [vmem:[#allocation2 + $0xc9] sm:$0xff] %vm386_vm1, %v409_v50  ;;  %v1050_v51 = vld [vmem:[#allocation2 + $0x91] sm:$0xff] }
  0x4c   : > { %v751_v44 = vld [vmem:[#allocation2 + $0x21] sm:$0xff]  ;;  %v1042_v52 = vld [vmem:[#allocation2 + $0x31] sm:$0xff]  ;;  %v1051_v53 = vld [vmem:[#allocation2 + $0x99] sm:$0xff] }
  0x4d   : > { %v2223_v45 = vld [vmem:[#allocation2 + $0x7a] sm:$0xff]  ;;  %v2236_v48 = vld [vmem:[#allocation2 + $0x82] sm:$0xff]  ;;  %v1147_v55 = vld [vmem:[#allocation2 + $0x92] sm:$0xff] }
  0x4e   : > { %v847_v46 = vld [vmem:[#allocation2 + $0x1a] sm:$0xff]  ;;  %v848_v49 = vld [vmem:[#allocation2 + $0x22] sm:$0xff]  ;;  %v1139_v56 = vld [vmem:[#allocation2 + $0x32] sm:$0xff] }
  0x4f   : > { %604 = vrot.lane.b32.xlu1 %v2162_v29, %s1936_s17  ;;  %590 = vrot.lane.b32.xlu0 %v557_v30, %s1936_s17  ;;  %v1043_v54 = vld [vmem:[#allocation2 + $0x39] sm:$0xff]  ;;  %v1252_v61 = vld [vmem:[#allocation4] sm:$0xff]  ;;  %v390_v1 = vld [vmem:[%s352_s9 + $0x8] sm:$0xff] }
  0x50   : > { %v1254_v59 = vld [vmem:[#allocation4 + $0x10] sm:$0xff]  ;;  %v1253_v60 = vld [vmem:[#allocation4 + $0x8] sm:$0xff]  ;;  %393 = vst.msk [vmem:[#allocation2 + $0xe1] sm:$0xff] %vm386_vm1, %v390_v1  ;;  %v1052_v10 = vld [vmem:[#allocation2 + $0xa9] sm:$0xff] }
  0x51   : > { %1718 = vmatprep.subr.mxu0 %v1254_v59  ;;  %1750 = vmatprep.subr.mxu1 %v1254_v59  ;;  %v389_v62 = vld [vmem:[%s352_s9] sm:$0xff]  ;;  %v1044_v11 = vld [vmem:[#allocation2 + $0x49] sm:$0xff] }
  0x52   : > { %1719 = vmatpush3.msra.mxu0 %v1254_v59  ;;  %1755 = vmatpush3.msra.mxu1 %v1254_v59  ;;  %392 = vst.msk [vmem:[#allocation2 + $0xd9] sm:$0xff] %vm386_vm1, %v389_v62  ;;  %v1148_v63 = vld [vmem:[#allocation2 + $0x9a] sm:$0xff]  ;;  %v1149_v24 = vld [vmem:[#allocation2 + $0xaa] sm:$0xff] }
  0x53   : > { %606 = vrot.lane.b32.xlu1 %v2196_v39, %s1936_s17  ;;  %507 = vrot.lane.b32.xlu0 %v2198_v40, %s1935_s16  ;;  %v1140_v0 = vld [vmem:[#allocation2 + $0x3a] sm:$0xff] }
  0x54   : > { %1720 = vmatprep.subr.mxu0 %v1253_v60  ;;  %1751 = vmatprep.subr.mxu1 %v1253_v60 }
  0x55   : > { %1721 = vmatpush3.msra.mxu0 %v1253_v60  ;;  %1756 = vmatpush3.msra.mxu1 %v1253_v60 }
  0x56   : > { %1722 = vmatprep.subr.mxu0 %v1252_v61  ;;  %1752 = vmatprep.subr.mxu1 %v1252_v61 }
  0x57   : > { %701 = vrot.lane.b32.xlu1 %v2132_v17, %s1937_s23  ;;  %685 = vrot.lane.b32.xlu0 %v653_v18, %s1937_s23 }
  0x58   : > { %1723 = vmatpush3.msra.mxu0 %v1252_v61  ;;  %1757 = vmatpush3.msra.mxu1 %v1252_v61  ;;  %v958_v61 = vld [vmem:[#allocation2 + $0xc8] sm:$0xff] }
  0x5b   : > { %703 = vrot.lane.b32.xlu1 %v2134_v19, %s1937_s23  ;;  %687 = vrot.lane.b32.xlu0 %v654_v20, %s1937_s23  ;;  %v1053_v20 = vld [vmem:[#allocation2 + $0xb1] sm:$0xff] }
  0x5f   : > { %798 = vrot.lane.b32.xlu1 %v2210_v41, %s1938_s27  ;;  %782 = vrot.lane.b32.xlu0 %v750_v42, %s1938_s27 }
  0x63   : > { %511 = vrot.lane.b32.xlu1 %v2210_v41, %s1935_s16  ;;  %495 = vrot.lane.b32.xlu0 %v750_v42, %s1935_s16  ;;  %v1142_v42 = vld [vmem:[#allocation2 + $0x52] sm:$0xff] }
  0x67   : > { %800 = vrot.lane.b32.xlu1 %v2218_v43, %s1938_s27  ;;  %784 = vrot.lane.b32.xlu0 %v751_v44, %s1938_s27 }
  0x6b   : > { %895 = vrot.lane.b32.xlu1 %v2223_v45, %s1939_s28  ;;  %879 = vrot.lane.b32.xlu0 %v847_v46, %s1939_s28 }
  0x6f   : > { %513 = vrot.lane.b32.xlu1 %v2218_v43, %s1935_s16  ;;  %497 = vrot.lane.b32.xlu0 %v751_v44, %s1935_s16 }
  0x73   : > { %608 = vrot.lane.b32.xlu1 %v2223_v45, %s1936_s17  ;;  %592 = vrot.lane.b32.xlu0 %v847_v46, %s1936_s17 }
  0x77   : > { %897 = vrot.lane.b32.xlu1 %v2236_v48, %s1939_s28  ;;  %881 = vrot.lane.b32.xlu0 %v848_v49, %s1939_s28 }
  0x7b   : > { %993 = vrot.lane.b32.xlu1 %v2142_v21, %s1940_s29  ;;  %977 = vrot.lane.b32.xlu0 %v2144_v22, %s1940_s29 }
  0x7f   : > { %610 = vrot.lane.b32.xlu1 %v2236_v48, %s1936_s17  ;;  %594 = vrot.lane.b32.xlu0 %v848_v49, %s1936_s17 }
  0x83   : > { %705 = vrot.lane.b32.xlu1 %v2142_v21, %s1937_s23  ;;  %689 = vrot.lane.b32.xlu0 %v2144_v22, %s1937_s23  ;;  %v1045_v21 = vld [vmem:[#allocation2 + $0x51] sm:$0xff] }
  0x87   : > { %995 = vrot.lane.b32.xlu1 %v2152_v25, %s1940_s29  ;;  %979 = vrot.lane.b32.xlu0 %v2154_v26, %s1940_s29 }
  0x8b   : > { %1090 = vrot.lane.b32.xlu1 %v1050_v51, %s1941_s30  ;;  %1074 = vrot.lane.b32.xlu0 %v1042_v52, %s1941_s30 }
  0x8f   : > { %707 = vrot.lane.b32.xlu1 %v2152_v25, %s1937_s23  ;;  %691 = vrot.lane.b32.xlu0 %v2154_v26, %s1937_s23  ;;  %v1141_v25 = vld [vmem:[#allocation2 + $0x4a] sm:$0xff] }
  0x93   : > { %802 = vrot.lane.b32.xlu1 %v1050_v51, %s1938_s27  ;;  %786 = vrot.lane.b32.xlu0 %v1042_v52, %s1938_s27 }
  0x97   : > { %1092 = vrot.lane.b32.xlu1 %v1051_v53, %s1941_s30  ;;  %1076 = vrot.lane.b32.xlu0 %v1043_v54, %s1941_s30 }
  0x9b   : > { %1187 = vrot.lane.b32.xlu1 %v1147_v55, %s1942_s6  ;;  %1171 = vrot.lane.b32.xlu0 %v1139_v56, %s1942_s6 }
  0x9f   : > { %515 = vrot.lane.b32.xlu1 %v1050_v51, %s1935_s16  ;;  %499 = vrot.lane.b32.xlu0 %v1042_v52, %s1935_s16 }
  0xa3   : > { %804 = vrot.lane.b32.xlu1 %v1051_v53, %s1938_s27  ;;  %788 = vrot.lane.b32.xlu0 %v1043_v54, %s1938_s27 }
  0xa7   : > { %899 = vrot.lane.b32.xlu1 %v1147_v55, %s1939_s28  ;;  %883 = vrot.lane.b32.xlu0 %v1139_v56, %s1939_s28 }
  0xab   : > { %1189 = vrot.lane.b32.xlu1 %v1148_v63, %s1942_s6  ;;  %1173 = vrot.lane.b32.xlu0 %v1140_v0, %s1942_s6 }
  0xaf   : > { %517 = vrot.lane.b32.xlu1 %v1051_v53, %s1935_s16  ;;  %501 = vrot.lane.b32.xlu0 %v1043_v54, %s1935_s16  ;;  %v957_v54 = vld [vmem:[#allocation2 + $0xc0] sm:$0xff] }
  0xb3   : > { %612 = vrot.lane.b32.xlu1 %v1147_v55, %s1936_s17  ;;  %596 = vrot.lane.b32.xlu0 %v1139_v56, %s1936_s17 }
  0xb7   : > { %901 = vrot.lane.b32.xlu1 %v1148_v63, %s1939_s28  ;;  %885 = vrot.lane.b32.xlu0 %v1140_v0, %s1939_s28 }
  0xb9   : > { %v494_v2 = vpop.permute.xlu1 %493  ;;  %v492_v3 = vpop.permute.xlu0 %491 }
  0xba   : > { %541 = vst.msk [vmem:[#allocation3 + $0x8] sm:$0xff] %vm539_vm3, %v494_v2  ;;  %540 = vst.msk [vmem:[#allocation3] sm:$0xff] %vm539_vm3, %v492_v3 }
  0xbb   : > { %997 = vrot.lane.b32.xlu1 %v2168_v33, %s1940_s29  ;;  %981 = vrot.lane.b32.xlu0 %v2170_v34, %s1940_s29 }
  0xbd   : > { %v510_v4 = vpop.permute.xlu1 %509  ;;  %v589_v5 = vpop.permute.xlu0 %588 }
  0xbe   : > { %549 = vst.msk [vmem:[#allocation3 + $0x48] sm:$0xff] %vm539_vm3, %v510_v4 }
  0xbf   : > { %637 = vst.msk [vmem:[#allocation3] sm:$0xff] %vm636_vm4, %v589_v5  ;;  %614 = vrot.lane.b32.xlu1 %v1148_v63, %s1936_s17  ;;  %598 = vrot.lane.b32.xlu0 %v1140_v0, %s1936_s17  ;;  %v1054_v0 = vld [vmem:[#allocation2 + $0xc1] sm:$0xff] }
  0xc1   : > { %v605_v6 = vpop.permute.xlu1 %604  ;;  %v591_v7 = vpop.permute.xlu0 %590 }
  0xc2   : > { %638 = vst.msk [vmem:[#allocation3 + $0x8] sm:$0xff] %vm636_vm4, %v591_v7 }
  0xc3   : > { %709 = vrot.lane.b32.xlu1 %v2168_v33, %s1937_s23  ;;  %693 = vrot.lane.b32.xlu0 %v2170_v34, %s1937_s23 }
  0xc5   : > { %v607_v8 = vpop.permute.xlu1 %606  ;;  %v508_v9 = vpop.permute.xlu0 %507 }
  0xc6   : > { %646 = vst.msk [vmem:[#allocation3 + $0x48] sm:$0xff] %vm636_vm4, %v607_v8 }
  0xc7   : > { %548 = vst.msk [vmem:[#allocation3 + $0x40] sm:$0xff] %vm539_vm3, %v508_v9  ;;  %999 = vrot.lane.b32.xlu1 %v2177_v37, %s1940_s29  ;;  %983 = vrot.lane.b32.xlu0 %v2187_v38, %s1940_s29 }
  0xc8   : > { %645 = vst.msk [vmem:[#allocation3 + $0x40] sm:$0xff] %vm636_vm4, %v605_v6  ;;  %v1055_v6 = vld [vmem:[#allocation2 + $0xc9] sm:$0xff] }
  0xc9   : > { %v702_v12 = vpop.permute.xlu1 %701  ;;  %v686_v13 = vpop.permute.xlu0 %685 }
  0xca   : > { %742 = vst.msk [vmem:[#allocation3 + $0x40] sm:$0xff] %vm733_vm5, %v702_v12  ;;  %734 = vst.msk [vmem:[#allocation3] sm:$0xff] %vm733_vm5, %v686_v13 }
  0xcb   : > { %1094 = vrot.lane.b32.xlu1 %v1052_v10, %s1941_s30  ;;  %1078 = vrot.lane.b32.xlu0 %v1044_v11, %s1941_s30 }
  0xcd   : > { %v704_v14 = vpop.permute.xlu1 %703  ;;  %v688_v15 = vpop.permute.xlu0 %687 }
  0xce   : > { %743 = vst.msk [vmem:[#allocation3 + $0x48] sm:$0xff] %vm733_vm5, %v704_v14  ;;  %735 = vst.msk [vmem:[#allocation3 + $0x8] sm:$0xff] %vm733_vm5, %v688_v15 }
  0xcf   : > { %711 = vrot.lane.b32.xlu1 %v2177_v37, %s1937_s23  ;;  %695 = vrot.lane.b32.xlu0 %v2187_v38, %s1937_s23  ;;  %v1150_v38 = vld [vmem:[#allocation2 + $0xb2] sm:$0xff] }
  0xd1   : > { %v799_v16 = vpop.permute.xlu1 %798  ;;  %v783_v18 = vpop.permute.xlu0 %782 }
  0xd2   : > { %839 = vst.msk [vmem:[#allocation3 + $0x40] sm:$0xff] %vm830_vm6, %v799_v16  ;;  %831 = vst.msk [vmem:[#allocation3] sm:$0xff] %vm830_vm6, %v783_v18  ;;  %v1152_v16 = vld [vmem:[#allocation2 + $0xca] sm:$0xff] }
  0xd3   : > { %806 = vrot.lane.b32.xlu1 %v1052_v10, %s1938_s27  ;;  %790 = vrot.lane.b32.xlu0 %v1044_v11, %s1938_s27 }
  0xd5   : > { %v512_v22 = vpop.permute.xlu1 %511  ;;  %v496_v23 = vpop.permute.xlu0 %495 }
  0xd6   : > { %550 = vst.msk [vmem:[#allocation3 + $0x50] sm:$0xff] %vm539_vm3, %v512_v22  ;;  %542 = vst.msk [vmem:[#allocation3 + $0x10] sm:$0xff] %vm539_vm3, %v496_v23  ;;  %v959_v23 = vld [vmem:[#allocation2 + $0xd8] sm:$0xff] }
  0xd7   : > { %1096 = vrot.lane.b32.xlu1 %v1053_v20, %s1941_s30  ;;  %1080 = vrot.lane.b32.xlu0 %v1045_v21, %s1941_s30 }
  0xd9   : > { %v801_v26 = vpop.permute.xlu1 %800  ;;  %v785_v28 = vpop.permute.xlu0 %784 }
  0xda   : > { %840 = vst.msk [vmem:[#allocation3 + $0x48] sm:$0xff] %vm830_vm6, %v801_v26  ;;  %832 = vst.msk [vmem:[#allocation3 + $0x8] sm:$0xff] %vm830_vm6, %v785_v28  ;;  %v960_v26 = vld [vmem:[#allocation2 + $0xe0] sm:$0xff] }
  0xdb   : > { %1191 = vrot.lane.b32.xlu1 %v1149_v24, %s1942_s6  ;;  %1175 = vrot.lane.b32.xlu0 %v1141_v25, %s1942_s6 }
  0xdd   : > { %v896_v30 = vpop.permute.xlu1 %895  ;;  %v880_v31 = vpop.permute.xlu0 %879 }
  0xde   : > { %936 = vst.msk [vmem:[#allocation3 + $0x40] sm:$0xff] %vm927_vm7, %v896_v30  ;;  %928 = vst.msk [vmem:[#allocation3] sm:$0xff] %vm927_vm7, %v880_v31 }
  0xdf   : > { %519 = vrot.lane.b32.xlu1 %v1052_v10, %s1935_s16  ;;  %503 = vrot.lane.b32.xlu0 %v1044_v11, %s1935_s16 }
  0xe1   : > { %v514_v32 = vpop.permute.xlu1 %513  ;;  %v498_v33 = vpop.permute.xlu0 %497 }
  0xe2   : > { %551 = vst.msk [vmem:[#allocation3 + $0x58] sm:$0xff] %vm539_vm3, %v514_v32  ;;  %543 = vst.msk [vmem:[#allocation3 + $0x18] sm:$0xff] %vm539_vm3, %v498_v33 }
  0xe3   : > { %808 = vrot.lane.b32.xlu1 %v1053_v20, %s1938_s27  ;;  %792 = vrot.lane.b32.xlu0 %v1045_v21, %s1938_s27 }
  0xe5   : > { %v609_v34 = vpop.permute.xlu1 %608  ;;  %v593_v37 = vpop.permute.xlu0 %592 }
  0xe6   : > { %647 = vst.msk [vmem:[#allocation3 + $0x50] sm:$0xff] %vm636_vm4, %v609_v34  ;;  %639 = vst.msk [vmem:[#allocation3 + $0x10] sm:$0xff] %vm636_vm4, %v593_v37 }
  0xe7   : > { %903 = vrot.lane.b32.xlu1 %v1149_v24, %s1939_s28  ;;  %887 = vrot.lane.b32.xlu0 %v1141_v25, %s1939_s28 }
  0xe9   : > { %v898_v44 = vpop.permute.xlu1 %897  ;;  %v882_v46 = vpop.permute.xlu0 %881 }
  0xea   : > { %937 = vst.msk [vmem:[#allocation3 + $0x48] sm:$0xff] %vm927_vm7, %v898_v44  ;;  %929 = vst.msk [vmem:[#allocation3 + $0x8] sm:$0xff] %vm927_vm7, %v882_v46 }
  0xeb   : > { %1193 = vrot.lane.b32.xlu1 %v1150_v38, %s1942_s6  ;;  %1177 = vrot.lane.b32.xlu0 %v1142_v42, %s1942_s6 }
  0xed   : > { %v994_v47 = vpop.permute.xlu1 %993  ;;  %v978_v49 = vpop.permute.xlu0 %977 }
  0xee   : > { %1034 = vst.msk [vmem:[#allocation3 + $0x40] sm:$0xff] %vm1025_vm8, %v994_v47  ;;  %1026 = vst.msk [vmem:[#allocation3] sm:$0xff] %vm1025_vm8, %v978_v49 }
  0xef   : > { %521 = vrot.lane.b32.xlu1 %v1053_v20, %s1935_s16  ;;  %505 = vrot.lane.b32.xlu0 %v1045_v21, %s1935_s16 }
  0xf1   : > { %v611_v50 = vpop.permute.xlu1 %610  ;;  %v595_v51 = vpop.permute.xlu0 %594 }
  0xf2   : > { %648 = vst.msk [vmem:[#allocation3 + $0x58] sm:$0xff] %vm636_vm4, %v611_v50  ;;  %640 = vst.msk [vmem:[#allocation3 + $0x18] sm:$0xff] %vm636_vm4, %v595_v51 }
  0xf3   : > { %616 = vrot.lane.b32.xlu1 %v1149_v24, %s1936_s17  ;;  %600 = vrot.lane.b32.xlu0 %v1141_v25, %s1936_s17 }
  0xf5   : > { %v706_v52 = vpop.permute.xlu1 %705  ;;  %v690_v53 = vpop.permute.xlu0 %689 }
  0xf6   : > { %744 = vst.msk [vmem:[#allocation3 + $0x50] sm:$0xff] %vm733_vm5, %v706_v52  ;;  %736 = vst.msk [vmem:[#allocation3 + $0x10] sm:$0xff] %vm733_vm5, %v690_v53 }
  0xf7   : > { %905 = vrot.lane.b32.xlu1 %v1150_v38, %s1939_s28  ;;  %889 = vrot.lane.b32.xlu0 %v1142_v42, %s1939_s28 }
  0xf9   : > { %v996_v55 = vpop.permute.xlu1 %995  ;;  %v980_v56 = vpop.permute.xlu0 %979 }
  0xfa   : > { %1035 = vst.msk [vmem:[#allocation3 + $0x48] sm:$0xff] %vm1025_vm8, %v996_v55  ;;  %1027 = vst.msk [vmem:[#allocation3 + $0x8] sm:$0xff] %vm1025_vm8, %v980_v56 }
  0xfb   : > { %1001 = vrot.lane.b32.xlu1 %v957_v54, %s1940_s29  ;;  %985 = vrot.lane.b32.xlu0 %v2175_v36, %s1940_s29 }
  0xfd   : > { %v1091_v57 = vpop.permute.xlu1 %1090  ;;  %v1075_v58 = vpop.permute.xlu0 %1074 }
  0xfe   : > { %1131 = vst.msk [vmem:[#allocation3 + $0x40] sm:$0xff] %vm1122_vm9, %v1091_v57  ;;  %1123 = vst.msk [vmem:[#allocation3] sm:$0xff] %vm1122_vm9, %v1075_v58 }
  0xff   : > { %618 = vrot.lane.b32.xlu1 %v1150_v38, %s1936_s17  ;;  %602 = vrot.lane.b32.xlu0 %v1142_v42, %s1936_s17 }
 0x101   : > { %v708_v59 = vpop.permute.xlu1 %707  ;;  %v692_v60 = vpop.permute.xlu0 %691 }
 0x102   : > { %745 = vst.msk [vmem:[#allocation3 + $0x58] sm:$0xff] %vm733_vm5, %v708_v59  ;;  %737 = vst.msk [vmem:[#allocation3 + $0x18] sm:$0xff] %vm733_vm5, %v692_v60 }
 0x103   : > { %713 = vrot.lane.b32.xlu1 %v957_v54, %s1937_s23  ;;  %697 = vrot.lane.b32.xlu0 %v2175_v36, %s1937_s23 }
 0x105   : > { %v803_v62 = vpop.permute.xlu1 %802  ;;  %v787_v63 = vpop.permute.xlu0 %786 }
 0x106   : > { %841 = vst.msk [vmem:[#allocation3 + $0x50] sm:$0xff] %vm830_vm6, %v803_v62  ;;  %833 = vst.msk [vmem:[#allocation3 + $0x10] sm:$0xff] %vm830_vm6, %v787_v63 }
 0x107   : > { %1003 = vrot.lane.b32.xlu1 %v958_v61, %s1940_s29  ;;  %987 = vrot.lane.b32.xlu0 %v2173_v35, %s1940_s29 }
 0x109   : > { %v1093_v1 = vpop.permute.xlu1 %1092  ;;  %v1077_v2 = vpop.permute.xlu0 %1076 }
 0x10a   : > { %1132 = vst.msk [vmem:[#allocation3 + $0x48] sm:$0xff] %vm1122_vm9, %v1093_v1  ;;  %1124 = vst.msk [vmem:[#allocation3 + $0x8] sm:$0xff] %vm1122_vm9, %v1077_v2 }
 0x10b   : > { %1098 = vrot.lane.b32.xlu1 %v1054_v0, %s1941_s30  ;;  %1082 = vrot.lane.b32.xlu0 %v2198_v40, %s1941_s30 }
 0x10d   : > { %v1188_v36 = vpop.permute.xlu1 %1187  ;;  %v1172_v3 = vpop.permute.xlu0 %1171 }
 0x10e   : > { %1228 = vst.msk [vmem:[#allocation3 + $0x40] sm:$0xff] %vm1219_vm10, %v1188_v36  ;;  %1220 = vst.msk [vmem:[#allocation3] sm:$0xff] %vm1219_vm10, %v1172_v3 }
 0x10f   : > { %715 = vrot.lane.b32.xlu1 %v958_v61, %s1937_s23  ;;  %699 = vrot.lane.b32.xlu0 %v2173_v35, %s1937_s23  ;;  %v1151_v35 = vld [vmem:[#allocation2 + $0xc2] sm:$0xff] }
 0x111   : > { %v516_v4 = vpop.permute.xlu1 %515  ;;  %v500_v5 = vpop.permute.xlu0 %499 }
 0x112   : > { %552 = vst.msk [vmem:[#allocation3 + $0x60] sm:$0xff] %vm539_vm3, %v516_v4  ;;  %544 = vst.msk [vmem:[#allocation3 + $0x20] sm:$0xff] %vm539_vm3, %v500_v5 }
 0x113   : > { %810 = vrot.lane.b32.xlu1 %v1054_v0, %s1938_s27  ;;  %794 = vrot.lane.b32.xlu0 %v2198_v40, %s1938_s27 }
 0x115   : > { %v805_v7 = vpop.permute.xlu1 %804  ;;  %v789_v8 = vpop.permute.xlu0 %788  ;;  %v1236_v9 = vld [vmem:[#allocation3] sm:$0xff] }
 0x116   : > { %v1244_v10 = vld [vmem:[#allocation3 + $0x40] sm:$0xff]  ;;  %842 = vst.msk [vmem:[#allocation3 + $0x58] sm:$0xff] %vm830_vm6, %v805_v7  ;;  %834 = vst.msk [vmem:[#allocation3 + $0x18] sm:$0xff] %vm830_vm6, %v789_v8  ;;  %1724 = vmatprep.mubr.msk.f32.mxu0 %vm1264_vm11, %v1236_v9 }
 0x117   : > { %1736 = vmatprep.mubr.msk.f32.mxu1 %vm1264_vm11, %v1244_v10  ;;  %1100 = vrot.lane.b32.xlu1 %v1055_v6, %s1941_s30 }
 0x118   : > { %1084 = vrot.lane.b32.xlu0 %v2156_v27, %s1941_s30 }
 0x119   : > { %v900_v40 = vpop.permute.xlu1 %899  ;;  %v884_v11 = vpop.permute.xlu0 %883 }
 0x11a   : > { %938 = vst.msk [vmem:[#allocation3 + $0x50] sm:$0xff] %vm927_vm7, %v900_v40  ;;  %930 = vst.msk [vmem:[#allocation3 + $0x10] sm:$0xff] %vm927_vm7, %v884_v11 }
 0x11b   : > { %1195 = vrot.lane.b32.xlu1 %v1151_v35, %s1942_s6 }
 0x11c   : > { %1179 = vrot.lane.b32.xlu0 %v2162_v29, %s1942_s6 }
 0x11d   : > { %v1190_v12 = vpop.permute.xlu1 %1189  ;;  %v1174_v13 = vpop.permute.xlu0 %1173 }
 0x11e   : > { %1229 = vst.msk [vmem:[#allocation3 + $0x48] sm:$0xff] %vm1219_vm10, %v1190_v12  ;;  %1221 = vst.msk [vmem:[#allocation3 + $0x8] sm:$0xff] %vm1219_vm10, %v1174_v13 }
 0x11f   : > { %812 = vrot.lane.b32.xlu1 %v1055_v6, %s1938_s27 }
 0x120   : > { %796 = vrot.lane.b32.xlu0 %v2156_v27, %s1938_s27 }
 0x121   : > { %v518_v14 = vpop.permute.xlu1 %517  ;;  %v502_v15 = vpop.permute.xlu0 %501 }
 0x122   : > { %553 = vst.msk [vmem:[#allocation3 + $0x68] sm:$0xff] %vm539_vm3, %v518_v14  ;;  %545 = vst.msk [vmem:[#allocation3 + $0x28] sm:$0xff] %vm539_vm3, %v502_v15 }
 0x123   : > { %907 = vrot.lane.b32.xlu1 %v1151_v35, %s1939_s28 }
 0x124   : > { %891 = vrot.lane.b32.xlu0 %v2162_v29, %s1939_s28 }
 0x125   : > { %v613_v18 = vpop.permute.xlu1 %612  ;;  %v597_v20 = vpop.permute.xlu0 %596  ;;  %v1237_v21 = vld [vmem:[#allocation3 + $0x8] sm:$0xff] }
 0x126   : > { %v1245_v22 = vld [vmem:[#allocation3 + $0x48] sm:$0xff]  ;;  %649 = vst.msk [vmem:[#allocation3 + $0x60] sm:$0xff] %vm636_vm4, %v613_v18  ;;  %641 = vst.msk [vmem:[#allocation3 + $0x20] sm:$0xff] %vm636_vm4, %v597_v20  ;;  %1725 = vmatmul.mubr.msk.f32.vlgmr.msra.gmra.mxu0 %vm1264_vm11, %v1237_v21 }
 0x127   : > { %1737 = vmatmul.mubr.msk.f32.vlgmr.msra.gmra.mxu1 %vm1264_vm11, %v1245_v22  ;;  %1197 = vrot.lane.b32.xlu1 %v1152_v16, %s1942_s6 }
 0x128   : > { %1181 = vrot.lane.b32.xlu0 %v2196_v39, %s1942_s6 }
 0x129   : > { %v902_v27 = vpop.permute.xlu1 %901  ;;  %v886_v29 = vpop.permute.xlu0 %885 }
 0x12a   : > { %939 = vst.msk [vmem:[#allocation3 + $0x58] sm:$0xff] %vm927_vm7, %v902_v27  ;;  %931 = vst.msk [vmem:[#allocation3 + $0x18] sm:$0xff] %vm927_vm7, %v886_v29 }
 0x12b   : > { %909 = vrot.lane.b32.xlu1 %v1152_v16, %s1939_s28 }
 0x12c   : > { %893 = vrot.lane.b32.xlu0 %v2196_v39, %s1939_s28  ;;  %v1056_v39 = vld [vmem:[#allocation2 + $0xd9] sm:$0xff] }
 0x12d   : > { %v998_v24 = vpop.permute.xlu1 %997  ;;  %v982_v25 = vpop.permute.xlu0 %981 }
 0x12e   : > { %1036 = vst.msk [vmem:[#allocation3 + $0x50] sm:$0xff] %vm1025_vm8, %v998_v24  ;;  %1028 = vst.msk [vmem:[#allocation3 + $0x10] sm:$0xff] %vm1025_vm8, %v982_v25 }
 0x12f   : > { %1005 = vrot.lane.b32.xlu1 %v959_v23, %s1940_s29 }
 0x130   : > { %989 = vrot.lane.b32.xlu0 %v2132_v17, %s1940_s29  ;;  %v1057_v17 = vld [vmem:[#allocation2 + $0xe1] sm:$0xff] }
 0x131   : > { %v615_v28 = vpop.permute.xlu1 %614  ;;  %v599_v30 = vpop.permute.xlu0 %598 }
 0x132   : > { %650 = vst.msk [vmem:[#allocation3 + $0x68] sm:$0xff] %vm636_vm4, %v615_v28  ;;  %642 = vst.msk [vmem:[#allocation3 + $0x28] sm:$0xff] %vm636_vm4, %v599_v30 }
 0x133   : > { %1007 = vrot.lane.b32.xlu1 %v960_v26, %s1940_s29 }
 0x134   : > { %991 = vrot.lane.b32.xlu0 %v2134_v19, %s1940_s29  ;;  %v1153_v19 = vld [vmem:[#allocation2 + $0xda] sm:$0xff] }
 0x135   : > { %v710_v31 = vpop.permute.xlu1 %709  ;;  %v694_v32 = vpop.permute.xlu0 %693 }
 0x136   : > { %746 = vst.msk [vmem:[#allocation3 + $0x60] sm:$0xff] %vm733_vm5, %v710_v31  ;;  %738 = vst.msk [vmem:[#allocation3 + $0x20] sm:$0xff] %vm733_vm5, %v694_v32 }
 0x137   : > { %1102 = vrot.lane.b32.xlu1 %v1056_v39, %s1941_s30 }
 0x138   : > { %1086 = vrot.lane.b32.xlu0 %v2210_v41, %s1941_s30  ;;  %v1154_v41 = vld [vmem:[#allocation2 + $0xe2] sm:$0xff] }
 0x139   : > { %v1000_v33 = vpop.permute.xlu1 %999  ;;  %v984_v34 = vpop.permute.xlu0 %983 }
 0x13a   : > { %1037 = vst.msk [vmem:[#allocation3 + $0x58] sm:$0xff] %vm1025_vm8, %v1000_v33  ;;  %1029 = vst.msk [vmem:[#allocation3 + $0x18] sm:$0xff] %vm1025_vm8, %v984_v34 }
 0x13b   : > { %1104 = vrot.lane.b32.xlu1 %v1057_v17, %s1941_s30 }
 0x13c   : > { %1088 = vrot.lane.b32.xlu0 %v2218_v43, %s1941_s30 }
 0x13d   : > { %v1095_v37 = vpop.permute.xlu1 %1094  ;;  %v1079_v38 = vpop.permute.xlu0 %1078 }
 0x13e   : > { %1133 = vst.msk [vmem:[#allocation3 + $0x50] sm:$0xff] %vm1122_vm9, %v1095_v37  ;;  %1125 = vst.msk [vmem:[#allocation3 + $0x10] sm:$0xff] %vm1122_vm9, %v1079_v38 }
 0x13f   : > { %1199 = vrot.lane.b32.xlu1 %v1153_v19, %s1942_s6 }
 0x140   : > { %1183 = vrot.lane.b32.xlu0 %v2223_v45, %s1942_s6 }
 0x141   : > { %v712_v42 = vpop.permute.xlu1 %711  ;;  %v696_v44 = vpop.permute.xlu0 %695 }
 0x142   : > { %747 = vst.msk [vmem:[#allocation3 + $0x68] sm:$0xff] %vm733_vm5, %v712_v42  ;;  %739 = vst.msk [vmem:[#allocation3 + $0x28] sm:$0xff] %vm733_vm5, %v696_v44 }
 0x143   : > { %1201 = vrot.lane.b32.xlu1 %v1154_v41, %s1942_s6 }
 0x144   : > { %1185 = vrot.lane.b32.xlu0 %v2236_v48, %s1942_s6 }
 0x145   : > { %v807_v43 = vpop.permute.xlu1 %806  ;;  %v791_v46 = vpop.permute.xlu0 %790 }
 0x146   : > { %843 = vst.msk [vmem:[#allocation3 + $0x60] sm:$0xff] %vm830_vm6, %v807_v43  ;;  %835 = vst.msk [vmem:[#allocation3 + $0x20] sm:$0xff] %vm830_vm6, %v791_v46 }
 0x149   : > { %v1097_v47 = vpop.permute.xlu1 %1096  ;;  %v1081_v45 = vpop.permute.xlu0 %1080 }
 0x14a   : > { %1134 = vst.msk [vmem:[#allocation3 + $0x58] sm:$0xff] %vm1122_vm9, %v1097_v47  ;;  %1126 = vst.msk [vmem:[#allocation3 + $0x18] sm:$0xff] %vm1122_vm9, %v1081_v45 }
 0x14d   : > { %v1192_v49 = vpop.permute.xlu1 %1191  ;;  %v1176_v50 = vpop.permute.xlu0 %1175 }
 0x14e   : > { %1230 = vst.msk [vmem:[#allocation3 + $0x50] sm:$0xff] %vm1219_vm10, %v1192_v49  ;;  %1222 = vst.msk [vmem:[#allocation3 + $0x10] sm:$0xff] %vm1219_vm10, %v1176_v50 }
 0x151   : > { %v520_v51 = vpop.permute.xlu1 %519  ;;  %v504_v48 = vpop.permute.xlu0 %503 }
 0x152   : > { %554 = vst.msk [vmem:[#allocation3 + $0x70] sm:$0xff] %vm539_vm3, %v520_v51  ;;  %546 = vst.msk [vmem:[#allocation3 + $0x30] sm:$0xff] %vm539_vm3, %v504_v48  ;;  %v1673_v51 = vld [vmem:[#allocation6] ss:$0 sm:$0xff] }
 0x155   : > { %v809_v52 = vpop.permute.xlu1 %808  ;;  %v793_v53 = vpop.permute.xlu0 %792  ;;  %v1238_v54 = vld [vmem:[#allocation3 + $0x10] sm:$0xff] }
 0x156   : > { %v1246_v55 = vld [vmem:[#allocation3 + $0x50] sm:$0xff]  ;;  %844 = vst.msk [vmem:[#allocation3 + $0x68] sm:$0xff] %vm830_vm6, %v809_v52  ;;  %836 = vst.msk [vmem:[#allocation3 + $0x28] sm:$0xff] %vm830_vm6, %v793_v53  ;;  %1727 = vmatprep.mubr.msk.f32.mxu0 %vm1264_vm11, %v1238_v54 }
 0x157   : > { %1739 = vmatprep.mubr.msk.f32.mxu1 %vm1264_vm11, %v1246_v55 }
 0x159   : > { %v904_v56 = vpop.permute.xlu1 %903  ;;  %v888_v57 = vpop.permute.xlu0 %887 }
 0x15a   : > { %940 = vst.msk [vmem:[#allocation3 + $0x60] sm:$0xff] %vm927_vm7, %v904_v56  ;;  %932 = vst.msk [vmem:[#allocation3 + $0x20] sm:$0xff] %vm927_vm7, %v888_v57 }
 0x15d   : > { %v1194_v58 = vpop.permute.xlu1 %1193  ;;  %v1178_v59 = vpop.permute.xlu0 %1177 }
 0x15e   : > { %1231 = vst.msk [vmem:[#allocation3 + $0x58] sm:$0xff] %vm1219_vm10, %v1194_v58  ;;  %1223 = vst.msk [vmem:[#allocation3 + $0x18] sm:$0xff] %vm1219_vm10, %v1178_v59 }
 0x161   : > { %v522_v60 = vpop.permute.xlu1 %521  ;;  %v506_v61 = vpop.permute.xlu0 %505 }
 0x162   : > { %555 = vst.msk [vmem:[#allocation3 + $0x78] sm:$0xff] %vm539_vm3, %v522_v60  ;;  %547 = vst.msk [vmem:[#allocation3 + $0x38] sm:$0xff] %vm539_vm3, %v506_v61 }
 0x165   : > { %v617_v62 = vpop.permute.xlu1 %616  ;;  %v601_v63 = vpop.permute.xlu0 %600  ;;  %v1239_v0 = vld [vmem:[#allocation3 + $0x18] sm:$0xff] }
 0x166   : > { %v1247_v1 = vld [vmem:[#allocation3 + $0x58] sm:$0xff]  ;;  %651 = vst.msk [vmem:[#allocation3 + $0x70] sm:$0xff] %vm636_vm4, %v617_v62  ;;  %643 = vst.msk [vmem:[#allocation3 + $0x30] sm:$0xff] %vm636_vm4, %v601_v63  ;;  %1728 = vmatmul.mubr.msk.f32.gmra.mxu0 %vm1264_vm11, %v1239_v0 }
 0x167   : > { %1740 = vmatmul.mubr.msk.f32.gmra.mxu1 %vm1264_vm11, %v1247_v1 }
 0x169   : > { %v906_v2 = vpop.permute.xlu1 %905  ;;  %v890_v36 = vpop.permute.xlu0 %889 }
 0x16a   : > { %941 = vst.msk [vmem:[#allocation3 + $0x68] sm:$0xff] %vm927_vm7, %v906_v2  ;;  %933 = vst.msk [vmem:[#allocation3 + $0x28] sm:$0xff] %vm927_vm7, %v890_v36 }
 0x16d   : > { %v1002_v3 = vpop.permute.xlu1 %1001  ;;  %v986_v4 = vpop.permute.xlu0 %985 }
 0x16e   : > { %1038 = vst.msk [vmem:[#allocation3 + $0x60] sm:$0xff] %vm1025_vm8, %v1002_v3  ;;  %1030 = vst.msk [vmem:[#allocation3 + $0x20] sm:$0xff] %vm1025_vm8, %v986_v4 }
 0x171   : > { %v619_v5 = vpop.permute.xlu1 %618  ;;  %v603_v6 = vpop.permute.xlu0 %602 }
 0x172   : > { %652 = vst.msk [vmem:[#allocation3 + $0x78] sm:$0xff] %vm636_vm4, %v619_v5  ;;  %644 = vst.msk [vmem:[#allocation3 + $0x38] sm:$0xff] %vm636_vm4, %v603_v6 }
 0x175   : > { %v714_v7 = vpop.permute.xlu1 %713  ;;  %v698_v8 = vpop.permute.xlu0 %697 }
 0x176   : > { %748 = vst.msk [vmem:[#allocation3 + $0x70] sm:$0xff] %vm733_vm5, %v714_v7  ;;  %740 = vst.msk [vmem:[#allocation3 + $0x30] sm:$0xff] %vm733_vm5, %v698_v8 }
 0x179   : > { %v1004_v9 = vpop.permute.xlu1 %1003  ;;  %v988_v10 = vpop.permute.xlu0 %987 }
 0x17a   : > { %1039 = vst.msk [vmem:[#allocation3 + $0x68] sm:$0xff] %vm1025_vm8, %v1004_v9  ;;  %1031 = vst.msk [vmem:[#allocation3 + $0x28] sm:$0xff] %vm1025_vm8, %v988_v10 }
 0x17d   : > { %v1099_v35 = vpop.permute.xlu1 %1098  ;;  %v1083_v40 = vpop.permute.xlu0 %1082 }
 0x17e   : > { %1135 = vst.msk [vmem:[#allocation3 + $0x60] sm:$0xff] %vm1122_vm9, %v1099_v35  ;;  %1127 = vst.msk [vmem:[#allocation3 + $0x20] sm:$0xff] %vm1122_vm9, %v1083_v40 }
 0x181   : > { %v716_v11 = vpop.permute.xlu1 %715  ;;  %v700_v12 = vpop.permute.xlu0 %699 }
 0x182   : > { %749 = vst.msk [vmem:[#allocation3 + $0x78] sm:$0xff] %vm733_vm5, %v716_v11  ;;  %741 = vst.msk [vmem:[#allocation3 + $0x38] sm:$0xff] %vm733_vm5, %v700_v12 }
 0x185   : > { %v811_v13 = vpop.permute.xlu1 %810  ;;  %v795_v14 = vpop.permute.xlu0 %794 }
 0x186   : > { %845 = vst.msk [vmem:[#allocation3 + $0x70] sm:$0xff] %vm830_vm6, %v811_v13  ;;  %837 = vst.msk [vmem:[#allocation3 + $0x30] sm:$0xff] %vm830_vm6, %v795_v14 }
 0x189   : > { %v1101_v15 = vpop.permute.xlu1 %1100 }
 0x18a   : > { %v1085_v16 = vpop.permute.xlu0 %1084  ;;  %1136 = vst.msk [vmem:[#allocation3 + $0x68] sm:$0xff] %vm1122_vm9, %v1101_v15 }
 0x18b   : > { %1128 = vst.msk [vmem:[#allocation3 + $0x28] sm:$0xff] %vm1122_vm9, %v1085_v16 }
 0x18d   : > { %v1196_v18 = vpop.permute.xlu1 %1195 }
 0x18e   : > { %v1180_v20 = vpop.permute.xlu0 %1179  ;;  %1232 = vst.msk [vmem:[#allocation3 + $0x60] sm:$0xff] %vm1219_vm10, %v1196_v18 }
 0x18f   : > { %1224 = vst.msk [vmem:[#allocation3 + $0x20] sm:$0xff] %vm1219_vm10, %v1180_v20 }
 0x191   : > { %v813_v21 = vpop.permute.xlu1 %812 }
 0x192   : > { %v797_v22 = vpop.permute.xlu0 %796  ;;  %846 = vst.msk [vmem:[#allocation3 + $0x78] sm:$0xff] %vm830_vm6, %v813_v21 }
 0x193   : > { %838 = vst.msk [vmem:[#allocation3 + $0x38] sm:$0xff] %vm830_vm6, %v797_v22 }
 0x195   : > { %v908_v27 = vpop.permute.xlu1 %907  ;;  %v1248_v24 = vld [vmem:[#allocation3 + $0x60] sm:$0xff] }
 0x196   : > { %v892_v29 = vpop.permute.xlu0 %891  ;;  %v1240_v23 = vld [vmem:[#allocation3 + $0x20] sm:$0xff]  ;;  %942 = vst.msk [vmem:[#allocation3 + $0x70] sm:$0xff] %vm927_vm7, %v908_v27  ;;  %1742 = vmatprep.mubr.msk.f32.mxu1 %vm1264_vm11, %v1248_v24 }
 0x197   : > { %934 = vst.msk [vmem:[#allocation3 + $0x30] sm:$0xff] %vm927_vm7, %v892_v29  ;;  %1730 = vmatprep.mubr.msk.f32.mxu0 %vm1264_vm11, %v1240_v23 }
 0x199   : > { %v1198_v25 = vpop.permute.xlu1 %1197 }
 0x19a   : > { %v1182_v26 = vpop.permute.xlu0 %1181  ;;  %1233 = vst.msk [vmem:[#allocation3 + $0x68] sm:$0xff] %vm1219_vm10, %v1198_v25 }
 0x19b   : > { %1225 = vst.msk [vmem:[#allocation3 + $0x28] sm:$0xff] %vm1219_vm10, %v1182_v26 }
 0x19d   : > { %v910_v28 = vpop.permute.xlu1 %909 }
 0x19e   : > { %v894_v30 = vpop.permute.xlu0 %893  ;;  %943 = vst.msk [vmem:[#allocation3 + $0x78] sm:$0xff] %vm927_vm7, %v910_v28 }
 0x19f   : > { %935 = vst.msk [vmem:[#allocation3 + $0x38] sm:$0xff] %vm927_vm7, %v894_v30 }
 0x1a1   : > { %v1006_v39 = vpop.permute.xlu1 %1005  ;;  %v1249_v17 = vld [vmem:[#allocation3 + $0x68] sm:$0xff] }
 0x1a2   : > { %v990_v31 = vpop.permute.xlu0 %989  ;;  %v1241_v32 = vld [vmem:[#allocation3 + $0x28] sm:$0xff]  ;;  %1040 = vst.msk [vmem:[#allocation3 + $0x70] sm:$0xff] %vm1025_vm8, %v1006_v39  ;;  %1743 = vmatmul.mubr.msk.f32.gmra.mxu1 %vm1264_vm11, %v1249_v17 }
 0x1a3   : > { %1032 = vst.msk [vmem:[#allocation3 + $0x30] sm:$0xff] %vm1025_vm8, %v990_v31  ;;  %1731 = vmatmul.mubr.msk.f32.gmra.mxu0 %vm1264_vm11, %v1241_v32 }
 0x1a5   : > { %v1008_v33 = vpop.permute.xlu1 %1007 }
 0x1a6   : > { %v992_v34 = vpop.permute.xlu0 %991  ;;  %1041 = vst.msk [vmem:[#allocation3 + $0x78] sm:$0xff] %vm1025_vm8, %v1008_v33 }
 0x1a7   : > { %1033 = vst.msk [vmem:[#allocation3 + $0x38] sm:$0xff] %vm1025_vm8, %v992_v34 }
 0x1a9   : > { %v1103_v19 = vpop.permute.xlu1 %1102 }
 0x1aa   : > { %v1087_v37 = vpop.permute.xlu0 %1086  ;;  %1137 = vst.msk [vmem:[#allocation3 + $0x70] sm:$0xff] %vm1122_vm9, %v1103_v19 }
 0x1ab   : > { %1129 = vst.msk [vmem:[#allocation3 + $0x30] sm:$0xff] %vm1122_vm9, %v1087_v37 }
 0x1ad   : > { %v1105_v38 = vpop.permute.xlu1 %1104 }
 0x1ae   : > { %v1089_v41 = vpop.permute.xlu0 %1088  ;;  %1138 = vst.msk [vmem:[#allocation3 + $0x78] sm:$0xff] %vm1122_vm9, %v1105_v38 }
 0x1af   : > { %1130 = vst.msk [vmem:[#allocation3 + $0x38] sm:$0xff] %vm1122_vm9, %v1089_v41 }
 0x1b1   : > { %v1200_v42 = vpop.permute.xlu1 %1199 }
 0x1b2   : > { %v1184_v44 = vpop.permute.xlu0 %1183  ;;  %1234 = vst.msk [vmem:[#allocation3 + $0x70] sm:$0xff] %vm1219_vm10, %v1200_v42 }
 0x1b3   : > { %1226 = vst.msk [vmem:[#allocation3 + $0x30] sm:$0xff] %vm1219_vm10, %v1184_v44 }
 0x1b5   : > { %v1202_v43 = vpop.permute.xlu1 %1201 }
 0x1b6   : > { %v1186_v46 = vpop.permute.xlu0 %1185  ;;  %1235 = vst.msk [vmem:[#allocation3 + $0x78] sm:$0xff] %vm1219_vm10, %v1202_v43 }
 0x1b7   : > { %1227 = vst.msk [vmem:[#allocation3 + $0x38] sm:$0xff] %vm1219_vm10, %v1186_v46 }
 0x1b9   : > { %v1250_v45 = vld [vmem:[#allocation3 + $0x70] sm:$0xff] }
 0x1ba   : > { %v1242_v47 = vld [vmem:[#allocation3 + $0x30] sm:$0xff]  ;;  %1745 = vmatprep.mubr.msk.f32.mxu1 %vm1264_vm11, %v1250_v45 }
 0x1bb   : > { %1733 = vmatprep.mubr.msk.f32.mxu0 %vm1264_vm11, %v1242_v47 }
 0x1bd   : > { %v1251_v50 = vld [vmem:[#allocation3 + $0x78] sm:$0xff] }
 0x1be   : > { %v1243_v49 = vld [vmem:[#allocation3 + $0x38] sm:$0xff]  ;;  %1746 = vmatmul.mubr.msk.f32.gmra.mxu1 %vm1264_vm11, %v1251_v50 }
 0x1bf   : > { %1734 = vmatmul.mubr.msk.f32.gmra.mxu0 %vm1264_vm11, %v1243_v49 }
 0x1e6   : > { %v1726_v48 = vpop.f32.mrf.mxu0 }
 0x1e7   : > { %v1738_v52 = vpop.f32.mrf.mxu1  ;;  %v1389_v53 = vadd.f32 %v1726_v48, %v1673_v51 }
 0x1e8   : > { %v1429_v54 = vadd.f32 %v1738_v52, %v1673_v51  ;;  %v1383_v55 = vpop.f32.mrf.mxu0 }
 0x1e9   : > { %v1423_v56 = vpop.f32.mrf.mxu1  ;;  %v1463_v57 = vmax.f32 %v1389_v53, 0.0  ;;  %v1384_v59 = vadd.f32 %v1673_v51, %v1383_v55 }
 0x1ea   : > { %v1471_v58 = vmax.f32 %v1429_v54, 0.0  ;;  %v1424_v60 = vadd.f32 %v1673_v51, %v1423_v56 }
 0x1eb   : > { %1479 = vst [vmem:[%s2537_s15 + $0x8] sm:$0xff] %v1463_v57  ;;  %v1462_v61 = vmax.f32 %v1384_v59, 0.0 }
 0x1ec   : > { %1487 = vst [vmem:[%s2537_s15 + $0x48] sm:$0xff] %v1471_v58  ;;  %v1470_v62 = vmax.f32 %v1424_v60, 0.0 }
 0x1ed   : > { %1478 = vst [vmem:[%s2537_s15] sm:$0xff] %v1462_v61 }
 0x1ee   : > { %1486 = vst [vmem:[%s2537_s15 + $0x40] sm:$0xff] %v1470_v62 }
 0x226   : > { %v1729_v63 = vpop.f32.mrf.mxu0 }
 0x227   : > { %v1741_v0 = vpop.f32.mrf.mxu1  ;;  %v1399_v1 = vadd.f32 %v1729_v63, %v1673_v51 }
 0x228   : > { %v1439_v2 = vadd.f32 %v1741_v0, %v1673_v51  ;;  %v1393_v36 = vpop.f32.mrf.mxu0 }
 0x229   : > { %v1433_v3 = vpop.f32.mrf.mxu1  ;;  %v1465_v4 = vmax.f32 %v1399_v1, 0.0  ;;  %v1394_v6 = vadd.f32 %v1673_v51, %v1393_v36 }
 0x22a   : > { %v1473_v5 = vmax.f32 %v1439_v2, 0.0  ;;  %v1434_v7 = vadd.f32 %v1673_v51, %v1433_v3 }
 0x22b   : > { %1481 = vst [vmem:[%s2537_s15 + $0x18] sm:$0xff] %v1465_v4  ;;  %v1464_v8 = vmax.f32 %v1394_v6, 0.0 }
 0x22c   : > { %1489 = vst [vmem:[%s2537_s15 + $0x58] sm:$0xff] %v1473_v5  ;;  %v1472_v9 = vmax.f32 %v1434_v7, 0.0 }
 0x22d   : > { %1480 = vst [vmem:[%s2537_s15 + $0x10] sm:$0xff] %v1464_v8 }
 0x22e   : > { %1488 = vst [vmem:[%s2537_s15 + $0x50] sm:$0xff] %v1472_v9 }
 0x262   : > { %v1744_v35 = vpop.f32.mrf.mxu1 }
 0x263   : > { %v1732_v10 = vpop.f32.mrf.mxu0  ;;  %v1449_v11 = vadd.f32 %v1744_v35, %v1673_v51 }
 0x264   : > { %v1409_v40 = vadd.f32 %v1732_v10, %v1673_v51  ;;  %v1443_v13 = vpop.f32.mrf.mxu1 }
 0x265   : > { %v1403_v12 = vpop.f32.mrf.mxu0  ;;  %v1475_v15 = vmax.f32 %v1449_v11, 0.0  ;;  %v1444_v18 = vadd.f32 %v1673_v51, %v1443_v13 }
 0x266   : > { %v1467_v14 = vmax.f32 %v1409_v40, 0.0  ;;  %v1404_v16 = vadd.f32 %v1673_v51, %v1403_v12 }
 0x267   : > { %1491 = vst [vmem:[%s2537_s15 + $0x68] sm:$0xff] %v1475_v15  ;;  %v1474_v21 = vmax.f32 %v1444_v18, 0.0 }
 0x268   : > { %1483 = vst [vmem:[%s2537_s15 + $0x28] sm:$0xff] %v1467_v14  ;;  %v1466_v20 = vmax.f32 %v1404_v16, 0.0 }
 0x269   : > { %1490 = vst [vmem:[%s2537_s15 + $0x60] sm:$0xff] %v1474_v21 }
 0x26a   : > { %1482 = vst [vmem:[%s2537_s15 + $0x20] sm:$0xff] %v1466_v20 }
 0x27e   : > { %v1747_v27 = vpop.f32.mrf.mxu1 }
 0x27f   : > { %v1735_v22 = vpop.f32.mrf.mxu0  ;;  %v1459_v23 = vadd.f32 %v1747_v27, %v1673_v51 }
 0x280   : > { %v1419_v29 = vadd.f32 %v1735_v22, %v1673_v51  ;;  %v1453_v25 = vpop.f32.mrf.mxu1 }
 0x281   : > { %v1413_v24 = vpop.f32.mrf.mxu0  ;;  %v1477_v28 = vmax.f32 %v1459_v23, 0.0  ;;  %v1454_v39 = vadd.f32 %v1673_v51, %v1453_v25 }
 0x282   : > { %v1469_v26 = vmax.f32 %v1419_v29, 0.0  ;;  %v1414_v30 = vadd.f32 %v1673_v51, %v1413_v24 }
 0x283   : > { %1493 = vst [vmem:[%s2537_s15 + $0x78] sm:$0xff] %v1477_v28  ;;  %v1476_v32 = vmax.f32 %v1454_v39, 0.0 }
 0x284   : > { %1485 = vst [vmem:[%s2537_s15 + $0x38] sm:$0xff] %v1469_v26  ;;  %v1468_v31 = vmax.f32 %v1414_v30, 0.0 }
 0x285   : > { %1492 = vst [vmem:[%s2537_s15 + $0x70] sm:$0xff] %v1476_v32 }
 0x286   : > { %1484 = vst [vmem:[%s2537_s15 + $0x30] sm:$0xff] %v1468_v31 }
 0x287 PF: > { %s17_s22 = sadd.s32 1, %s1928_s22   ;;  %s2580_s18 = smov %s1920_s20 }
 0x288   : > { %p14_p13 = scmp.ge.s32.totalorder %s17_s22, 6   ;;  %s2581_s19 = smov %s1924_s21 }
 0x289   : > { %s2582_s20 = smov %s2585_s24  ;;  %s2583_s21 = smov %s2589_s25 }
 0x28a   :  { %16 = sbr.rel (!%p14_p13) target bundleno = 4 (0x4), region = 88 }
 0x28f   :  { %1524 = vsyncpa [#allocation5], 1 }
 0x290   :  { %1526 = vsyncpa [#allocation5 + $0x1], 1 }
 0x291   :  { %1527 = vsyncpa [#allocation7], 1 }

// kernel: instance_branch_forward.5
= control target key start
LH: loop header
LB: loop body
LE: loop exit
PB: predicated region body
PF: predicated region fallthrough
CT: control target
= control target key end

     0   :  { %s2446_s18 = smov 0   ;;  %s2448_s19 = smov 0   ;;  %s3421_s0 = inlined_call_operand.vmem [shape: f32[2,16,16,128], index: 0, kind: input, shape index: {}]   ;;  %s3422_s1 = inlined_call_operand.vmem [shape: f32[2,2,16,128], index: 1, kind: input, shape index: {}]   ;;  %s3423_s2 = inlined_call_operand.vmem [shape: f32[2,2,16,128], index: 2, kind: input, shape index: {}]   ;;  %s3424_s3 = inlined_call_operand.vmem [shape: f32[1152,128], index: 3, kind: input, shape index: {}]   ;;  %s3425_s4 = inlined_call_operand.vmem [shape: f32[1,128], index: 4, kind: input, shape index: {}]   ;;  %s3426_s5 = inlined_call_operand.vmem [shape: f32[2,256,128], index: 5, kind: output, shape index: {}]  }
   0x1   :  { %s2450_s20 = smov 0   ;;  %s2452_s21 = smov 0  }
   0x2   :  { %s2454_s22 = smov 0  }
   0x3 LB: > { %s24_s23 = sadd.s32 1, %s2405_s20  ;;  %s27_s24 = sadd.s32 1, %s2409_s21  ;;  %s2413_s22 = sphi %s2454_s22, %s15_s22   ;;  %s2409_s21 = sphi %s2452_s21, %s3463_s21   ;;  %s2405_s20 = sphi %s2450_s20, %s3462_s20   ;;  %s2401_s19 = sphi %s2448_s19, %s3461_s19   ;;  %s2397_s18 = sphi %s2446_s18, %s3460_s18  }
   0x4   : > { %p25_p0 = scmp.ge.s32.totalorder %s24_s23, 2  ;;  %p1877_p1 = scmp.ge.s32.totalorder %s2413_s22, 1 }
   0x5   : > { %p241_p2 = scmp.lt.s32.totalorder %s2413_s22, 5 }
   0x6   : > { %s3465_s23 = smov (%p25_p0, %s24_s23), 0  ;;  %s3467_s24 = smov (!%p25_p0, %s27_s24), %s2409_s21 }
   0x7   : > { %p242_p3 = pnand %p1877_p1, %p241_p2  ;;  %p29_p4 = scmp.ge.s32.totalorder %s3467_s24, 2 }
   0x9   : > { %s3469_s24 = smov (%p29_p4, %s3467_s24), 0  ;;  %245 = sbr.rel (%p242_p3) target bundleno = 390 (0x186), region = 40 }
   0xe   : > { %v861_v0 = vld [vmem:[%s3424_s3 + $0xf8] sm:$0xff]  ;;  %s1878_s6 = sshll.u32 %s2397_s18, 3  ;;  %p297_p5 = scmp.lt.s32.totalorder %s2401_s19, 1  ;;  %v860_v4 = vld [vmem:[%s3424_s3 + $0xf0] sm:$0xff]  ;;  %v2415_v6 = vmov 0.0   ;;  %v859_v9 = vld [vmem:[%s3424_s3 + $0xe8] sm:$0xff] }
   0xf   : > { %v893_v1 = vld [vmem:[%s3424_s3 + $0x1f8] sm:$0xff]  ;;  %1894 = vmatprep.subr.mxu0 %v861_v0  ;;  %v892_v5 = vld [vmem:[%s3424_s3 + $0x1f0] sm:$0xff]  ;;  %p2502_p6 = scmp.lt.s32.totalorder %s1878_s6, 15  ;;  %336 = vst [vmem:[#allocation2 + $0x18] sm:$0x1] %v2415_v6  ;;  %v891_v10 = vld [vmem:[%s3424_s3 + $0x1e8] sm:$0xff] }
  0x10   : > { %v845_v2 = vld [vmem:[%s3424_s3 + $0x78] sm:$0xff]  ;;  %1974 = vmatprep.subr.mxu1 %v893_v1  ;;  %335 = vst [vmem:[#allocation2] sm:$0x1] %v2415_v6  ;;  %337 = vst [vmem:[#allocation2 + $0x30] sm:$0x1] %v2415_v6  ;;  %v844_v7 = vld [vmem:[%s3424_s3 + $0x70] sm:$0xff] }
  0x11   : > { %v877_v3 = vld [vmem:[%s3424_s3 + $0x178] sm:$0xff]  ;;  %338 = vst [vmem:[#allocation2 + $0x48] sm:$0x1] %v2415_v6  ;;  %339 = vst [vmem:[#allocation2 + $0x60] sm:$0x1] %v2415_v6  ;;  %1895 = vmatpush3.msra.mxu0 %v845_v2  ;;  %v876_v8 = vld [vmem:[%s3424_s3 + $0x170] sm:$0xff] }
  0x12   : > { %340 = vst [vmem:[#allocation2 + $0x78] sm:$0x1] %v2415_v6  ;;  %341 = vst [vmem:[#allocation2 + $0x90] sm:$0x1] %v2415_v6  ;;  %1975 = vmatpush3.msra.mxu1 %v877_v3  ;;  %1896 = vmatprep.subr.mxu0 %v860_v4  ;;  %v843_v11 = vld [vmem:[%s3424_s3 + $0x68] sm:$0xff]  ;;  %s3471_s19 = smov (!%p297_p5, %s2401_s19), 1 }
  0x13   : > { %342 = vst [vmem:[#allocation2 + $0xa8] sm:$0x1] %v2415_v6  ;;  %343 = vst [vmem:[#allocation2 + $0xc0] sm:$0x1] %v2415_v6  ;;  %1976 = vmatprep.subr.mxu1 %v892_v5  ;;  %v875_v12 = vld [vmem:[%s3424_s3 + $0x168] sm:$0xff]  ;;  %1897 = vmatpush3.msra.mxu0 %v844_v7  ;;  %v858_v13 = vld [vmem:[%s3424_s3 + $0xe0] sm:$0xff] }
  0x14   : > { %344 = vst [vmem:[#allocation2 + $0xd8] sm:$0x1] %v2415_v6  ;;  %345 = vst [vmem:[#allocation2 + $0x11] sm:$0x1] %v2415_v6  ;;  %1977 = vmatpush3.msra.mxu1 %v876_v8  ;;  %v890_v14 = vld [vmem:[%s3424_s3 + $0x1e0] sm:$0xff]  ;;  %s3473_s6 = smov (!%p2502_p6, %s1878_s6), 15  ;;  %1898 = vmatprep.subr.mxu0 %v859_v9 }
  0x15   : > { %346 = vst [vmem:[#allocation2 + $0x29] sm:$0x1] %v2415_v6  ;;  %347 = vst [vmem:[#allocation2 + $0x41] sm:$0x1] %v2415_v6  ;;  %1978 = vmatprep.subr.mxu1 %v891_v10  ;;  %v842_v15 = vld [vmem:[%s3424_s3 + $0x60] sm:$0xff]  ;;  %p309_p7 = scmp.lt.s32.totalorder %s2397_s18, 1  ;;  %1899 = vmatpush3.msra.mxu0 %v843_v11 }
  0x16   : > { %348 = vst [vmem:[#allocation2 + $0x59] sm:$0x1] %v2415_v6  ;;  %349 = vst [vmem:[#allocation2 + $0x71] sm:$0x1] %v2415_v6  ;;  %v874_v16 = vld [vmem:[%s3424_s3 + $0x160] sm:$0xff]  ;;  %1979 = vmatpush3.msra.mxu1 %v875_v12  ;;  %v857_v17 = vld [vmem:[%s3424_s3 + $0xd8] sm:$0xff]  ;;  %1900 = vmatprep.subr.mxu0 %v858_v13 }
  0x17   : > { %350 = vst [vmem:[#allocation2 + $0x89] sm:$0x1] %v2415_v6  ;;  %351 = vst [vmem:[#allocation2 + $0xa1] sm:$0x1] %v2415_v6  ;;  %v889_v18 = vld [vmem:[%s3424_s3 + $0x1d8] sm:$0xff]  ;;  %1980 = vmatprep.subr.mxu1 %v890_v14  ;;  %s1880_s8 = sshll.u32 %s3471_s19, 5  ;;  %1901 = vmatpush3.msra.mxu0 %v842_v15 }
  0x18   : > { %352 = vst [vmem:[#allocation2 + $0xb9] sm:$0x1] %v2415_v6  ;;  %353 = vst [vmem:[#allocation2 + $0xd1] sm:$0x1] %v2415_v6  ;;  %v841_v19 = vld [vmem:[%s3424_s3 + $0x58] sm:$0xff]  ;;  %1981 = vmatpush3.msra.mxu1 %v874_v16  ;;  %v856_v21 = vld [vmem:[%s3424_s3 + $0xd0] sm:$0xff]  ;;  %1902 = vmatprep.subr.mxu0 %v857_v17 }
  0x19   : > { %354 = vst [vmem:[#allocation2 + $0xe9] sm:$0x1] %v2415_v6  ;;  %v873_v20 = vld [vmem:[%s3424_s3 + $0x158] sm:$0xff]  ;;  %v888_v22 = vld [vmem:[%s3424_s3 + $0x1d0] sm:$0xff]  ;;  %s1879_s14 = sshll.u32 %s3473_s6, 1  ;;  %s1883_s15 = sshll.u32 %s3471_s19, 2  ;;  %1982 = vmatprep.subr.mxu1 %v889_v18  ;;  %1903 = vmatpush3.msra.mxu0 %v841_v19 }
  0x1a   : > { %v840_v23 = vld [vmem:[%s3424_s3 + $0x50] sm:$0xff]  ;;  %s310_s13 = scalar_select %p309_p7, %s2397_s18, 1  ;;  %1983 = vmatpush3.msra.mxu1 %v873_v20  ;;  %v855_v25 = vld [vmem:[%s3424_s3 + $0xc8] sm:$0xff]  ;;  %1904 = vmatprep.subr.mxu0 %v856_v21  ;;  %v854_v29 = vld [vmem:[%s3424_s3 + $0xc0] sm:$0xff] }
  0x1b   : > { %v872_v24 = vld [vmem:[%s3424_s3 + $0x150] sm:$0xff]  ;;  %v887_v26 = vld [vmem:[%s3424_s3 + $0x1c8] sm:$0xff]  ;;  %1984 = vmatprep.subr.mxu1 %v888_v22  ;;  %1905 = vmatpush3.msra.mxu0 %v840_v23  ;;  %v886_v30 = vld [vmem:[%s3424_s3 + $0x1c0] sm:$0xff]  ;;  %s2598_s26 = sadd.s32 %s1880_s8, %s1879_s14  ;;  %s1888_s10 = sshll.u32 %s2397_s18, 4 }
  0x1c   : > { %v839_v27 = vld [vmem:[%s3424_s3 + $0x48] sm:$0xff]  ;;  %s1882_s11 = sshll.u32 %s310_s13, 1  ;;  %1985 = vmatpush3.msra.mxu1 %v872_v24  ;;  %1906 = vmatprep.subr.mxu0 %v855_v25  ;;  %v838_v31 = vld [vmem:[%s3424_s3 + $0x40] sm:$0xff]  ;;  %v853_v33 = vld [vmem:[%s3424_s3 + $0xb8] sm:$0xff]  ;;  %s1881_s16 = sshll.u32 %s2598_s26, 3 }
  0x1d   : > { %v871_v28 = vld [vmem:[%s3424_s3 + $0x148] sm:$0xff]  ;;  %s2600_s27 = sadd.s32 %s1883_s15, %s1882_s11  ;;  %1986 = vmatprep.subr.mxu1 %v887_v26  ;;  %v870_v32 = vld [vmem:[%s3424_s3 + $0x140] sm:$0xff]  ;;  %1907 = vmatpush3.msra.mxu0 %v839_v27  ;;  %v885_v34 = vld [vmem:[%s3424_s3 + $0x1b8] sm:$0xff]  ;;  %s2643_s25 = scalar_lea.vmem %s3421_s0, %s1881_s16 }
  0x1e   : > { %1987 = vmatpush3.msra.mxu1 %v871_v28  ;;  %1908 = vmatprep.subr.mxu0 %v854_v29  ;;  %v837_v35 = vld [vmem:[%s3424_s3 + $0x38] sm:$0xff]  ;;  %s1884_s17 = sshll.u32 %s2600_s27, 3  ;;  %v852_v37 = vld [vmem:[%s3424_s3 + $0xb0] sm:$0xff]  ;;  %v851_v41 = vld [vmem:[%s3424_s3 + $0xa8] sm:$0xff]  ;;  %p328_p8 = scmp.lt.s32.totalorder %s1888_s10, 31 }
  0x1f   : > { %1988 = vmatprep.subr.mxu1 %v886_v30  ;;  %v869_v36 = vld [vmem:[%s3424_s3 + $0x138] sm:$0xff]  ;;  %1909 = vmatpush3.msra.mxu0 %v838_v31  ;;  %v884_v38 = vld [vmem:[%s3424_s3 + $0x1b0] sm:$0xff]  ;;  %v883_v42 = vld [vmem:[%s3424_s3 + $0x1a8] sm:$0xff]  ;;  %s315_s6 = scalar_lea.vmem %s3422_s1, %s1884_s17  ;;  %s324_s13 = scalar_lea.vmem %s3423_s2, %s1884_s17 }
  0x20   : > { %1989 = vmatpush3.msra.mxu1 %v870_v32  ;;  %1910 = vmatprep.subr.mxu0 %v853_v33  ;;  %v836_v39 = vld [vmem:[%s3424_s3 + $0x30] sm:$0xff]  ;;  %v835_v43 = vld [vmem:[%s3424_s3 + $0x28] sm:$0xff]  ;;  %v850_v45 = vld [vmem:[%s3424_s3 + $0xa0] sm:$0xff]  ;;  %s3475_s10 = smov (!%p328_p8, %s1888_s10), 31 }
  0x21   : > { %1990 = vmatprep.subr.mxu1 %v885_v34  ;;  %v868_v40 = vld [vmem:[%s3424_s3 + $0x130] sm:$0xff]  ;;  %1911 = vmatpush3.msra.mxu0 %v837_v35  ;;  %v867_v44 = vld [vmem:[%s3424_s3 + $0x128] sm:$0xff]  ;;  %v882_v46 = vld [vmem:[%s3424_s3 + $0x1a0] sm:$0xff]  ;;  %s3342_s18 = sadd.s32 %s1880_s8, %s3475_s10 }
  0x22   : > { %1991 = vmatpush3.msra.mxu1 %v869_v36  ;;  %1912 = vmatprep.subr.mxu0 %v852_v37  ;;  %v834_v47 = vld [vmem:[%s3424_s3 + $0x20] sm:$0xff]  ;;  %v849_v51 = vld [vmem:[%s3424_s3 + $0x98] sm:$0xff]  ;;  %v2678_v53 = vld [vmem:[%s315_s6 + $0x8] sm:$0xff]  ;;  %s1890_s19 = sshll.u32 %s3342_s18, 3 }
  0x23   : > { %1992 = vmatprep.subr.mxu1 %v884_v38  ;;  %1913 = vmatpush3.msra.mxu0 %v836_v39  ;;  %v866_v48 = vld [vmem:[%s3424_s3 + $0x120] sm:$0xff]  ;;  %v881_v52 = vld [vmem:[%s3424_s3 + $0x198] sm:$0xff]  ;;  %358 = vst [vmem:[#allocation2 + $0x9] sm:$0xff] %v2678_v53  ;;  %v2688_v56 = vld [vmem:[%s2643_s25 + $0x8] sm:$0xff]  ;;  %s3368_s12 = scalar_lea.vmem %s3426_s5, %s1890_s19 }
  0x24   : > { %1993 = vmatpush3.msra.mxu1 %v868_v40  ;;  %1914 = vmatprep.subr.mxu0 %v851_v41  ;;  %v355_v49 = vld [vmem:[%s315_s6] sm:$0xff]  ;;  %v833_v54 = vld [vmem:[%s3424_s3 + $0x18] sm:$0xff]  ;;  %v848_v57 = vld [vmem:[%s3424_s3 + $0x90] sm:$0xff]  ;;  %382 = vst [vmem:[#allocation2 + $0x21] sm:$0xff] %v2688_v56 }
  0x25   : > { %1994 = vmatprep.subr.mxu1 %v883_v42  ;;  %v2669_v50 = vld [vmem:[%s2643_s25] sm:$0xff]  ;;  %1915 = vmatpush3.msra.mxu0 %v835_v43  ;;  %357 = vst [vmem:[#allocation2 + $0x1] sm:$0xff] %v355_v49  ;;  %v865_v55 = vld [vmem:[%s3424_s3 + $0x118] sm:$0xff]  ;;  %v880_v58 = vld [vmem:[%s3424_s3 + $0x190] sm:$0xff] }
  0x26   : > { %1995 = vmatpush3.msra.mxu1 %v867_v44  ;;  %381 = vst [vmem:[#allocation2 + $0x19] sm:$0xff] %v2669_v50  ;;  %1916 = vmatprep.subr.mxu0 %v850_v45  ;;  %v832_v59 = vld [vmem:[%s3424_s3 + $0x10] sm:$0xff]  ;;  %v847_v62 = vld [vmem:[%s3424_s3 + $0x88] sm:$0xff]  ;;  %v2720_v2 = vld [vmem:[%s2643_s25 + $0x18] sm:$0xff] }
  0x27   : > { %1996 = vmatprep.subr.mxu1 %v882_v46  ;;  %1917 = vmatpush3.msra.mxu0 %v834_v47  ;;  %v864_v60 = vld [vmem:[%s3424_s3 + $0x110] sm:$0xff]  ;;  %v879_v63 = vld [vmem:[%s3424_s3 + $0x188] sm:$0xff]  ;;  %v846_v3 = vld [vmem:[%s3424_s3 + $0x80] sm:$0xff]  ;;  %384 = vst [vmem:[#allocation2 + $0x39] sm:$0xff] %v2720_v2 }
  0x28   : > { %1997 = vmatpush3.msra.mxu1 %v866_v48  ;;  %1918 = vmatprep.subr.mxu0 %v849_v51  ;;  %v2704_v61 = vld [vmem:[%s2643_s25 + $0x10] sm:$0xff]  ;;  %v831_v0 = vld [vmem:[%s3424_s3 + $0x8] sm:$0xff]  ;;  %v878_v4 = vld [vmem:[%s3424_s3 + $0x180] sm:$0xff] }
  0x29   : > { %1998 = vmatprep.subr.mxu1 %v881_v52  ;;  %1919 = vmatpush3.msra.mxu0 %v833_v54  ;;  %383 = vst [vmem:[#allocation2 + $0x31] sm:$0xff] %v2704_v61  ;;  %v863_v1 = vld [vmem:[%s3424_s3 + $0x108] sm:$0xff]  ;;  %v2730_v5 = vld [vmem:[%s2643_s25 + $0x20] sm:$0xff]  ;;  %v925_v11 = vld [vmem:[%s3424_s3 + $0x2f8] sm:$0xff] }
  0x2a   : > { %1999 = vmatpush3.msra.mxu1 %v865_v55  ;;  %1920 = vmatprep.subr.mxu0 %v848_v57  ;;  %v830_v6 = vld [vmem:[%s3424_s3] sm:$0xff]  ;;  %385 = vst [vmem:[#allocation2 + $0x49] sm:$0xff] %v2730_v5  ;;  %v957_v12 = vld [vmem:[%s3424_s3 + $0x3f8] sm:$0xff]  ;;  %v2752_v15 = vld [vmem:[%s2643_s25 + $0x28] sm:$0xff] }
  0x2b   : > { %2000 = vmatprep.subr.mxu1 %v880_v58  ;;  %1921 = vmatpush3.msra.mxu0 %v832_v59  ;;  %v862_v7 = vld [vmem:[%s3424_s3 + $0x100] sm:$0xff]  ;;  %v909_v13 = vld [vmem:[%s3424_s3 + $0x278] sm:$0xff]  ;;  %386 = vst [vmem:[#allocation2 + $0x51] sm:$0xff] %v2752_v15  ;;  %v462_v18 = vld [vmem:[#allocation2 + $0xa] sm:$0xff] }
  0x2c   : > { %2001 = vmatpush3.msra.mxu1 %v864_v60  ;;  %1922 = vmatprep.subr.mxu0 %v847_v62  ;;  %v397_v9 = vld [vmem:[#allocation2] sm:$0xff]  ;;  %v941_v14 = vld [vmem:[%s3424_s3 + $0x378] sm:$0xff]  ;;  %v398_v17 = vld [vmem:[#allocation2 + $0x8] sm:$0xff] }
  0x2d   : > { %2002 = vmatprep.subr.mxu1 %v879_v63  ;;  %1923 = vmatpush3.msra.mxu0 %v831_v0  ;;  %v493_v8 = vld [vmem:[#allocation2 + $0x18] sm:$0xff]  ;;  %v461_v10 = vld [vmem:[#allocation2 + $0x2] sm:$0xff]  ;;  %v924_v19 = vld [vmem:[%s3424_s3 + $0x2f0] sm:$0xff] }
  0x2e   : > { %2003 = vmatpush3.msra.mxu1 %v863_v1  ;;  %1924 = vmatprep.subr.mxu0 %v846_v3  ;;  %v494_v16 = vld [vmem:[#allocation2 + $0x20] sm:$0xff]  ;;  %v956_v20 = vld [vmem:[%s3424_s3 + $0x3f0] sm:$0xff]  ;;  %v2775_v25 = vld [vmem:[%s2643_s25 + $0x38] sm:$0xff] }
  0x2f   : > { %2004 = vmatprep.subr.mxu1 %v878_v4  ;;  %1925 = vmatpush3.msra.mxu0 %v830_v6  ;;  %v2762_v21 = vld [vmem:[%s2643_s25 + $0x30] sm:$0xff]  ;;  %v2777_v26 = vld [vmem:[#allocation2 + $0x1a] sm:$0xff]  ;;  %388 = vst [vmem:[#allocation2 + $0x69] sm:$0xff] %v2775_v25  ;;  %v923_v28 = vld [vmem:[%s3424_s3 + $0x2e8] sm:$0xff] }
  0x30   : > { %1045 = vmatprep.mubr.f32.mxu0 %v355_v49  ;;  %2005 = vmatpush3.msra.mxu1 %v862_v7  ;;  %v908_v22 = vld [vmem:[%s3424_s3 + $0x270] sm:$0xff]  ;;  %387 = vst [vmem:[#allocation2 + $0x61] sm:$0xff] %v2762_v21  ;;  %v2781_v27 = vld [vmem:[%s2643_s25 + $0x40] sm:$0xff]  ;;  %v955_v29 = vld [vmem:[%s3424_s3 + $0x3e8] sm:$0xff] }
  0x31   : > { %1190 = vmatprep.mubr.f32.mxu1 %v493_v8  ;;  %1046 = vmatmul.mubr.f32.vlgmr.msra.gmra.mxu0 %v397_v9  ;;  %v940_v23 = vld [vmem:[%s3424_s3 + $0x370] sm:$0xff]  ;;  %389 = vst [vmem:[#allocation2 + $0x79] sm:$0xff] %v2781_v27  ;;  %v907_v30 = vld [vmem:[%s3424_s3 + $0x268] sm:$0xff]  ;;  %v2799_v32 = vld [vmem:[#allocation2 + $0x38] sm:$0xff] }
  0x32   : > { %1191 = vmatmul.mubr.f32.vlgmr.msra.gmra.mxu1 %v461_v10  ;;  %2054 = vmatprep.subr.mxu0 %v925_v11  ;;  %v2772_v24 = vld [vmem:[#allocation2 + $0x30] sm:$0xff]  ;;  %v939_v31 = vld [vmem:[%s3424_s3 + $0x368] sm:$0xff]  ;;  %v922_v35 = vld [vmem:[%s3424_s3 + $0x2e0] sm:$0xff] }
  0x33   : > { %2134 = vmatprep.subr.mxu1 %v957_v12  ;;  %2055 = vmatpush3.msra.mxu0 %v909_v13  ;;  %v2802_v33 = vld [vmem:[%s2643_s25 + $0x48] sm:$0xff]  ;;  %v954_v36 = vld [vmem:[%s3424_s3 + $0x3e0] sm:$0xff]  ;;  %v2814_v37 = vld [vmem:[%s2643_s25 + $0x50] sm:$0xff] }
  0x34   : > { %2135 = vmatpush3.msra.mxu1 %v941_v14  ;;  %1050 = vmatprep.mubr.f32.mxu0 %v2678_v53  ;;  %v2804_v34 = vld [vmem:[#allocation2 + $0x22] sm:$0xff]  ;;  %390 = vst [vmem:[#allocation2 + $0x81] sm:$0xff] %v2802_v33  ;;  %391 = vst [vmem:[#allocation2 + $0x91] sm:$0xff] %v2814_v37  ;;  %v2828_v41 = vld [vmem:[#allocation2 + $0x32] sm:$0xff] }
  0x35   : > { %1195 = vmatprep.mubr.f32.mxu1 %v494_v16  ;;  %1051 = vmatmul.mubr.f32.gmra.mxu0 %v398_v17  ;;  %v906_v38 = vld [vmem:[%s3424_s3 + $0x260] sm:$0xff]  ;;  %v2826_v40 = vld [vmem:[#allocation2 + $0x48] sm:$0xff]  ;;  %v2831_v42 = vld [vmem:[%s2643_s25 + $0x58] sm:$0xff] }
  0x36   : > { %1196 = vmatmul.mubr.f32.gmra.mxu1 %v462_v18  ;;  %2056 = vmatprep.subr.mxu0 %v924_v19  ;;  %v938_v39 = vld [vmem:[%s3424_s3 + $0x360] sm:$0xff]  ;;  %v921_v43 = vld [vmem:[%s3424_s3 + $0x2d8] sm:$0xff]  ;;  %392 = vst [vmem:[#allocation2 + $0x99] sm:$0xff] %v2831_v42  ;;  %v2853_v48 = vld [vmem:[#allocation2 + $0x50] sm:$0xff] }
  0x37   : > { %2136 = vmatprep.subr.mxu1 %v956_v20  ;;  %2057 = vmatpush3.msra.mxu0 %v908_v22  ;;  %v953_v44 = vld [vmem:[%s3424_s3 + $0x3d8] sm:$0xff]  ;;  %v2849_v47 = vld [vmem:[%s2643_s25 + $0x60] sm:$0xff]  ;;  %v2859_v51 = vld [vmem:[%s2643_s25 + $0x68] sm:$0xff] }
  0x38   : > { %2137 = vmatpush3.msra.mxu1 %v940_v23  ;;  %1055 = vmatprep.mubr.f32.mxu0 %v2669_v50  ;;  %v905_v45 = vld [vmem:[%s3424_s3 + $0x258] sm:$0xff]  ;;  %393 = vst [vmem:[#allocation2 + $0xa9] sm:$0xff] %v2849_v47  ;;  %v920_v52 = vld [vmem:[%s3424_s3 + $0x2d0] sm:$0xff]  ;;  %394 = vst [vmem:[#allocation2 + $0xb1] sm:$0xff] %v2859_v51 }
  0x39   : > { %1200 = vmatprep.mubr.f32.mxu1 %v2772_v24  ;;  %1056 = vmatmul.mubr.f32.gmra.mxu0 %v493_v8  ;;  %v937_v46 = vld [vmem:[%s3424_s3 + $0x358] sm:$0xff]  ;;  %v952_v53 = vld [vmem:[%s3424_s3 + $0x3d0] sm:$0xff]  ;;  %v2881_v58 = vld [vmem:[#allocation2 + $0x60] sm:$0xff] }
  0x3a   : > { %1201 = vmatmul.mubr.f32.gmra.mxu1 %v2777_v26  ;;  %2058 = vmatprep.subr.mxu0 %v923_v28  ;;  %v2856_v49 = vld [vmem:[#allocation2 + $0x3a] sm:$0xff]  ;;  %v904_v54 = vld [vmem:[%s3424_s3 + $0x250] sm:$0xff]  ;;  %v919_v60 = vld [vmem:[%s3424_s3 + $0x2c8] sm:$0xff] }
  0x3b   : > { %2138 = vmatprep.subr.mxu1 %v955_v29  ;;  %2059 = vmatpush3.msra.mxu0 %v907_v30  ;;  %v936_v55 = vld [vmem:[%s3424_s3 + $0x350] sm:$0xff]  ;;  %v951_v62 = vld [vmem:[%s3424_s3 + $0x3c8] sm:$0xff]  ;;  %v2893_v63 = vld [vmem:[%s2643_s25 + $0x78] sm:$0xff] }
  0x3c   : > { %2139 = vmatpush3.msra.mxu1 %v939_v31  ;;  %1060 = vmatprep.mubr.f32.mxu0 %v2688_v56  ;;  %v2877_v57 = vld [vmem:[%s2643_s25 + $0x70] sm:$0xff]  ;;  %v903_v0 = vld [vmem:[%s3424_s3 + $0x248] sm:$0xff]  ;;  %396 = vst [vmem:[#allocation2 + $0xc9] sm:$0xff] %v2893_v63  ;;  %v918_v6 = vld [vmem:[%s3424_s3 + $0x2c0] sm:$0xff] }
  0x3d   : > { %1205 = vmatprep.mubr.f32.mxu1 %v2799_v32  ;;  %1061 = vmatmul.mubr.f32.gmra.mxu0 %v494_v16  ;;  %395 = vst [vmem:[#allocation2 + $0xc1] sm:$0xff] %v2877_v57  ;;  %v2884_v59 = vld [vmem:[#allocation2 + $0x4a] sm:$0xff]  ;;  %v2908_v4 = vld [vmem:[#allocation2 + $0x52] sm:$0xff]  ;;  %v950_v7 = vld [vmem:[%s3424_s3 + $0x3c0] sm:$0xff] }
  0x3e   : > { %1206 = vmatmul.mubr.f32.gmra.mxu1 %v2804_v34  ;;  %2060 = vmatprep.subr.mxu0 %v922_v35  ;;  %v935_v1 = vld [vmem:[%s3424_s3 + $0x348] sm:$0xff]  ;;  %v902_v8 = vld [vmem:[%s3424_s3 + $0x240] sm:$0xff]  ;;  %v2926_v10 = vld [vmem:[#allocation2 + $0x78] sm:$0xff] }
  0x3f   : > { %2140 = vmatprep.subr.mxu1 %v954_v36  ;;  %2061 = vmatpush3.msra.mxu0 %v906_v38  ;;  %v2906_v3 = vld [vmem:[#allocation2 + $0x68] sm:$0xff]  ;;  %v934_v9 = vld [vmem:[%s3424_s3 + $0x340] sm:$0xff]  ;;  %v917_v12 = vld [vmem:[%s3424_s3 + $0x2b8] sm:$0xff] }
  0x40   : > { %2141 = vmatpush3.msra.mxu1 %v938_v39  ;;  %1065 = vmatprep.mubr.f32.mxu0 %v2704_v61  ;;  %v2933_v11 = vld [vmem:[#allocation2 + $0x62] sm:$0xff]  ;;  %v949_v13 = vld [vmem:[%s3424_s3 + $0x3b8] sm:$0xff]  ;;  %v2958_v20 = vld [vmem:[#allocation2 + $0x6a] sm:$0xff] }
  0x41   : > { %1210 = vmatprep.mubr.f32.mxu1 %v2826_v40  ;;  %1066 = vmatmul.mubr.f32.gmra.mxu0 %v2772_v24  ;;  %v901_v14 = vld [vmem:[%s3424_s3 + $0x238] sm:$0xff]  ;;  %v2949_v17 = vld [vmem:[%s324_s13] sm:$0xff]  ;;  %v2956_v19 = vld [vmem:[%s324_s13 + $0x8] sm:$0xff] }
  0x42   : > { %1211 = vmatmul.mubr.f32.gmra.mxu1 %v2828_v41  ;;  %2062 = vmatprep.subr.mxu0 %v921_v43  ;;  %v933_v16 = vld [vmem:[%s3424_s3 + $0x338] sm:$0xff]  ;;  %v2953_v18 = vld [vmem:[#allocation2 + $0x80] sm:$0xff]  ;;  %362 = vst [vmem:[#allocation2 + $0xd9] sm:$0xff] %v2949_v17  ;;  %363 = vst [vmem:[#allocation2 + $0xe1] sm:$0xff] %v2956_v19 }
  0x43   : > { %2142 = vmatprep.subr.mxu1 %v953_v44  ;;  %2063 = vmatpush3.msra.mxu0 %v905_v45  ;;  %v916_v22 = vld [vmem:[%s3424_s3 + $0x2b0] sm:$0xff]  ;;  %v2979_v31 = vld [vmem:[#allocation2 + $0x7a] sm:$0xff]  ;;  %v915_v35 = vld [vmem:[%s3424_s3 + $0x2a8] sm:$0xff] }
  0x44   : > { %2143 = vmatpush3.msra.mxu1 %v937_v46  ;;  %1070 = vmatprep.mubr.f32.mxu0 %v2720_v2  ;;  %v948_v23 = vld [vmem:[%s3424_s3 + $0x3b0] sm:$0xff]  ;;  %v947_v36 = vld [vmem:[%s3424_s3 + $0x3a8] sm:$0xff]  ;;  %v2997_v43 = vld [vmem:[#allocation2 + $0x98] sm:$0xff] }
  0x45   : > { %1215 = vmatprep.mubr.f32.mxu1 %v2853_v48  ;;  %1071 = vmatmul.mubr.f32.gmra.mxu0 %v2799_v32  ;;  %v900_v28 = vld [vmem:[%s3424_s3 + $0x230] sm:$0xff]  ;;  %v899_v38 = vld [vmem:[%s3424_s3 + $0x228] sm:$0xff]  ;;  %v914_v45 = vld [vmem:[%s3424_s3 + $0x2a0] sm:$0xff] }
  0x46   : > { %1216 = vmatmul.mubr.f32.gmra.mxu1 %v2856_v49  ;;  %2064 = vmatprep.subr.mxu0 %v920_v52  ;;  %v932_v29 = vld [vmem:[%s3424_s3 + $0x330] sm:$0xff]  ;;  %v931_v39 = vld [vmem:[%s3424_s3 + $0x328] sm:$0xff]  ;;  %v946_v46 = vld [vmem:[%s3424_s3 + $0x3a0] sm:$0xff] }
  0x47   : > { %2144 = vmatprep.subr.mxu1 %v952_v53  ;;  %2065 = vmatpush3.msra.mxu0 %v904_v54  ;;  %v2977_v30 = vld [vmem:[#allocation2 + $0x90] sm:$0xff]  ;;  %v2999_v44 = vld [vmem:[#allocation2 + $0x82] sm:$0xff] }
  0x48   : > { %2145 = vmatpush3.msra.mxu1 %v936_v55  ;;  %1075 = vmatprep.mubr.f32.mxu0 %v2730_v5  ;;  %v898_v52 = vld [vmem:[%s3424_s3 + $0x220] sm:$0xff]  ;;  %v3017_v54 = vld [vmem:[#allocation2 + $0xa8] sm:$0xff]  ;;  %v3019_v55 = vld [vmem:[#allocation2 + $0x92] sm:$0xff] }
  0x49   : > { %1220 = vmatprep.mubr.f32.mxu1 %v2881_v58  ;;  %1076 = vmatmul.mubr.f32.gmra.mxu0 %v2826_v40  ;;  %v930_v53 = vld [vmem:[%s3424_s3 + $0x320] sm:$0xff] }
  0x4a   : > { %1221 = vmatmul.mubr.f32.gmra.mxu1 %v2884_v59  ;;  %2066 = vmatprep.subr.mxu0 %v919_v60  ;;  %v913_v60 = vld [vmem:[%s3424_s3 + $0x298] sm:$0xff] }
  0x4b   : > { %2146 = vmatprep.subr.mxu1 %v951_v62  ;;  %2067 = vmatpush3.msra.mxu0 %v903_v0  ;;  %v945_v62 = vld [vmem:[%s3424_s3 + $0x398] sm:$0xff] }
  0x4c   : > { %2147 = vmatpush3.msra.mxu1 %v935_v1  ;;  %1080 = vmatprep.mubr.f32.mxu0 %v2752_v15  ;;  %v897_v0 = vld [vmem:[%s3424_s3 + $0x218] sm:$0xff] }
  0x4d   : > { %1225 = vmatprep.mubr.f32.mxu1 %v2906_v3  ;;  %1081 = vmatmul.mubr.f32.gmra.mxu0 %v2853_v48  ;;  %v929_v1 = vld [vmem:[%s3424_s3 + $0x318] sm:$0xff] }
  0x4e   : > { %1226 = vmatmul.mubr.f32.gmra.mxu1 %v2908_v4  ;;  %2068 = vmatprep.subr.mxu0 %v918_v6  ;;  %v3037_v6 = vld [vmem:[#allocation2 + $0xb0] sm:$0xff] }
  0x4f   : > { %2148 = vmatprep.subr.mxu1 %v950_v7  ;;  %2069 = vmatpush3.msra.mxu0 %v902_v8  ;;  %v3039_v7 = vld [vmem:[#allocation2 + $0x9a] sm:$0xff]  ;;  %v912_v8 = vld [vmem:[%s3424_s3 + $0x290] sm:$0xff] }
  0x50   : > { %2149 = vmatpush3.msra.mxu1 %v934_v9  ;;  %1085 = vmatprep.mubr.f32.mxu0 %v2762_v21  ;;  %v944_v9 = vld [vmem:[%s3424_s3 + $0x390] sm:$0xff] }
  0x51   : > { %1230 = vmatprep.mubr.f32.mxu1 %v2926_v10  ;;  %1086 = vmatmul.mubr.f32.gmra.mxu0 %v2881_v58 }
  0x52   : > { %1231 = vmatmul.mubr.f32.gmra.mxu1 %v2933_v11  ;;  %2070 = vmatprep.subr.mxu0 %v917_v12  ;;  %v896_v12 = vld [vmem:[%s3424_s3 + $0x210] sm:$0xff] }
  0x53   : > { %2150 = vmatprep.subr.mxu1 %v949_v13  ;;  %2071 = vmatpush3.msra.mxu0 %v901_v14  ;;  %v928_v13 = vld [vmem:[%s3424_s3 + $0x310] sm:$0xff]  ;;  %v3057_v14 = vld [vmem:[#allocation2 + $0xc0] sm:$0xff] }
  0x54   : > { %2151 = vmatpush3.msra.mxu1 %v933_v16  ;;  %1090 = vmatprep.mubr.f32.mxu0 %v2775_v25  ;;  %v3059_v16 = vld [vmem:[#allocation2 + $0xaa] sm:$0xff] }
  0x55   : > { %1235 = vmatprep.mubr.f32.mxu1 %v2953_v18  ;;  %1091 = vmatmul.mubr.f32.gmra.mxu0 %v2906_v3 }
  0x56   : > { %1236 = vmatmul.mubr.f32.gmra.mxu1 %v2958_v20  ;;  %2072 = vmatprep.subr.mxu0 %v916_v22  ;;  %v911_v22 = vld [vmem:[%s3424_s3 + $0x288] sm:$0xff] }
  0x57   : > { %2152 = vmatprep.subr.mxu1 %v948_v23  ;;  %2073 = vmatpush3.msra.mxu0 %v900_v28  ;;  %v943_v23 = vld [vmem:[%s3424_s3 + $0x388] sm:$0xff] }
  0x58   : > { %2153 = vmatpush3.msra.mxu1 %v932_v29  ;;  %1095 = vmatprep.mubr.f32.mxu0 %v2781_v27  ;;  %v895_v28 = vld [vmem:[%s3424_s3 + $0x208] sm:$0xff] }
  0x59   : > { %1240 = vmatprep.mubr.f32.mxu1 %v2977_v30  ;;  %1096 = vmatmul.mubr.f32.gmra.mxu0 %v2926_v10  ;;  %v927_v29 = vld [vmem:[%s3424_s3 + $0x308] sm:$0xff] }
  0x5a   : > { %1241 = vmatmul.mubr.f32.gmra.mxu1 %v2979_v31  ;;  %2074 = vmatprep.subr.mxu0 %v915_v35  ;;  %v3077_v35 = vld [vmem:[#allocation2 + $0xc8] sm:$0xff] }
  0x5b   : > { %2154 = vmatprep.subr.mxu1 %v947_v36  ;;  %2075 = vmatpush3.msra.mxu0 %v899_v38  ;;  %v3079_v36 = vld [vmem:[#allocation2 + $0xb2] sm:$0xff]  ;;  %v910_v38 = vld [vmem:[%s3424_s3 + $0x280] sm:$0xff] }
  0x5c   : > { %2155 = vmatpush3.msra.mxu1 %v931_v39  ;;  %1100 = vmatprep.mubr.f32.mxu0 %v2802_v33  ;;  %v942_v39 = vld [vmem:[%s3424_s3 + $0x380] sm:$0xff] }
  0x5d   : > { %1245 = vmatprep.mubr.f32.mxu1 %v2997_v43  ;;  %1101 = vmatmul.mubr.f32.gmra.mxu0 %v2953_v18 }
  0x5e   : > { %1246 = vmatmul.mubr.f32.gmra.mxu1 %v2999_v44  ;;  %2076 = vmatprep.subr.mxu0 %v914_v45  ;;  %v894_v45 = vld [vmem:[%s3424_s3 + $0x200] sm:$0xff] }
  0x5f   : > { %2156 = vmatprep.subr.mxu1 %v946_v46  ;;  %2077 = vmatpush3.msra.mxu0 %v898_v52  ;;  %v926_v46 = vld [vmem:[%s3424_s3 + $0x300] sm:$0xff]  ;;  %v973_v52 = vld [vmem:[%s3424_s3 + $0x478] sm:$0xff] }
  0x60   : > { %2157 = vmatpush3.msra.mxu1 %v930_v53  ;;  %1105 = vmatprep.mubr.f32.mxu0 %v2814_v37  ;;  %v972_v53 = vld [vmem:[%s3424_s3 + $0x470] sm:$0xff] }
  0x61   : > { %1250 = vmatprep.mubr.f32.mxu1 %v3017_v54  ;;  %1106 = vmatmul.mubr.f32.gmra.mxu0 %v2977_v30 }
  0x62   : > { %1251 = vmatmul.mubr.f32.gmra.mxu1 %v3019_v55  ;;  %2078 = vmatprep.subr.mxu0 %v913_v60 }
  0x63   : > { %2158 = vmatprep.subr.mxu1 %v945_v62  ;;  %2079 = vmatpush3.msra.mxu0 %v897_v0 }
  0x64   : > { %2159 = vmatpush3.msra.mxu1 %v929_v1  ;;  %1110 = vmatprep.mubr.f32.mxu0 %v2831_v42 }
  0x65   : > { %1255 = vmatprep.mubr.f32.mxu1 %v3037_v6  ;;  %1111 = vmatmul.mubr.f32.gmra.mxu0 %v2997_v43 }
  0x66   : > { %1256 = vmatmul.mubr.f32.gmra.mxu1 %v3039_v7  ;;  %2080 = vmatprep.subr.mxu0 %v912_v8 }
  0x67   : > { %2160 = vmatprep.subr.mxu1 %v944_v9  ;;  %2081 = vmatpush3.msra.mxu0 %v896_v12 }
  0x68   : > { %2161 = vmatpush3.msra.mxu1 %v928_v13  ;;  %1115 = vmatprep.mubr.f32.mxu0 %v2849_v47 }
  0x69   : > { %1260 = vmatprep.mubr.f32.mxu1 %v3057_v14  ;;  %1116 = vmatmul.mubr.f32.gmra.mxu0 %v3017_v54 }
  0x6a   : > { %1261 = vmatmul.mubr.f32.gmra.mxu1 %v3059_v16  ;;  %2082 = vmatprep.subr.mxu0 %v911_v22 }
  0x6b   : > { %2162 = vmatprep.subr.mxu1 %v943_v23  ;;  %2083 = vmatpush3.msra.mxu0 %v895_v28 }
  0x6c   : > { %2163 = vmatpush3.msra.mxu1 %v927_v29  ;;  %1120 = vmatprep.mubr.f32.mxu0 %v2859_v51 }
  0x6d   : > { %1265 = vmatprep.mubr.f32.mxu1 %v3077_v35  ;;  %1121 = vmatmul.mubr.f32.gmra.mxu0 %v3037_v6 }
  0x6e   : > { %1266 = vmatmul.mubr.f32.gmra.mxu1 %v3079_v36  ;;  %2084 = vmatprep.subr.mxu0 %v910_v38 }
  0x6f   : > { %2164 = vmatprep.subr.mxu1 %v942_v39  ;;  %2085 = vmatpush3.msra.mxu0 %v894_v45 }
  0x70   : > { %2165 = vmatpush3.msra.mxu1 %v926_v46  ;;  %1335 = vmatprep.mubr.f32.mxu0 %v2777_v26  ;;  %v962_v26 = vld [vmem:[%s3424_s3 + $0x420] sm:$0xff] }
  0x71   : > { %1480 = vmatprep.mubr.f32.mxu1 %v2704_v61  ;;  %1336 = vmatmul.mubr.f32.vlgmr.msra.gmra.mxu0 %v2669_v50  ;;  %v971_v50 = vld [vmem:[%s3424_s3 + $0x468] sm:$0xff] }
  0x72   : > { %1481 = vmatmul.mubr.f32.vlgmr.msra.gmra.mxu1 %v2772_v24  ;;  %2246 = vmatprep.subr.mxu0 %v973_v52  ;;  %v964_v24 = vld [vmem:[%s3424_s3 + $0x430] sm:$0xff] }
  0x73   : > { %2302 = vmatprep.subr.mxu1 %v973_v52  ;;  %2247 = vmatpush3.msra.mxu0 %v973_v52 }
  0x74   : > { %2318 = vmatpush3.msra.mxu1 %v973_v52  ;;  %1340 = vmatprep.mubr.f32.mxu0 %v2804_v34  ;;  %v604_v34 = vld [vmem:[#allocation2 + $0xd8] sm:$0xff] }
  0x75   : > { %1485 = vmatprep.mubr.f32.mxu1 %v2720_v2  ;;  %1341 = vmatmul.mubr.f32.gmra.mxu0 %v2688_v56  ;;  %v970_v56 = vld [vmem:[%s3424_s3 + $0x460] sm:$0xff] }
  0x76   : > { %1486 = vmatmul.mubr.f32.gmra.mxu1 %v2799_v32  ;;  %2248 = vmatprep.subr.mxu0 %v972_v53  ;;  %v960_v32 = vld [vmem:[%s3424_s3 + $0x410] sm:$0xff] }
  0x77   : > { %2303 = vmatprep.subr.mxu1 %v972_v53  ;;  %2249 = vmatpush3.msra.mxu0 %v972_v53 }
  0x78   : > { %2319 = vmatpush3.msra.mxu1 %v972_v53  ;;  %1345 = vmatprep.mubr.f32.mxu0 %v2828_v41 }
  0x79   : > { %1490 = vmatprep.mubr.f32.mxu1 %v2730_v5  ;;  %1346 = vmatmul.mubr.f32.gmra.mxu0 %v2704_v61  ;;  %v969_v61 = vld [vmem:[%s3424_s3 + $0x458] sm:$0xff] }
  0x7a   : > { %1491 = vmatmul.mubr.f32.gmra.mxu1 %v2826_v40  ;;  %2250 = vmatprep.subr.mxu0 %v971_v50  ;;  %v572_v40 = vld [vmem:[#allocation2 + $0xca] sm:$0xff] }
  0x7b   : > { %2304 = vmatprep.subr.mxu1 %v971_v50  ;;  %2251 = vmatpush3.msra.mxu0 %v971_v50 }
  0x7c   : > { %2320 = vmatpush3.msra.mxu1 %v971_v50  ;;  %1350 = vmatprep.mubr.f32.mxu0 %v2856_v49 }
  0x7d   : > { %1495 = vmatprep.mubr.f32.mxu1 %v2752_v15  ;;  %1351 = vmatmul.mubr.f32.gmra.mxu0 %v2720_v2  ;;  %v968_v2 = vld [vmem:[%s3424_s3 + $0x450] sm:$0xff] }
  0x7e   : > { %1496 = vmatmul.mubr.f32.gmra.mxu1 %v2853_v48  ;;  %2252 = vmatprep.subr.mxu0 %v970_v56  ;;  %v668_v48 = vld [vmem:[#allocation2 + $0xda] sm:$0xff] }
  0x7f   : > { %2305 = vmatprep.subr.mxu1 %v970_v56  ;;  %2253 = vmatpush3.msra.mxu0 %v970_v56 }
  0x80   : > { %2321 = vmatpush3.msra.mxu1 %v970_v56  ;;  %1355 = vmatprep.mubr.f32.mxu0 %v2884_v59 }
  0x81   : > { %1500 = vmatprep.mubr.f32.mxu1 %v2762_v21  ;;  %1356 = vmatmul.mubr.f32.gmra.mxu0 %v2730_v5  ;;  %v967_v5 = vld [vmem:[%s3424_s3 + $0x448] sm:$0xff] }
  0x82   : > { %1501 = vmatmul.mubr.f32.gmra.mxu1 %v2881_v58  ;;  %2254 = vmatprep.subr.mxu0 %v969_v61 }
  0x83   : > { %2306 = vmatprep.subr.mxu1 %v969_v61  ;;  %2255 = vmatpush3.msra.mxu0 %v969_v61 }
  0x84   : > { %2322 = vmatpush3.msra.mxu1 %v969_v61  ;;  %1360 = vmatprep.mubr.f32.mxu0 %v2908_v4 }
  0x85   : > { %1505 = vmatprep.mubr.f32.mxu1 %v2775_v25  ;;  %1361 = vmatmul.mubr.f32.gmra.mxu0 %v2752_v15  ;;  %v966_v15 = vld [vmem:[%s3424_s3 + $0x440] sm:$0xff] }
  0x86   : > { %1506 = vmatmul.mubr.f32.gmra.mxu1 %v2906_v3  ;;  %2256 = vmatprep.subr.mxu0 %v968_v2 }
  0x87   : > { %2307 = vmatprep.subr.mxu1 %v968_v2  ;;  %2257 = vmatpush3.msra.mxu0 %v968_v2 }
  0x88   : > { %2323 = vmatpush3.msra.mxu1 %v968_v2  ;;  %1365 = vmatprep.mubr.f32.mxu0 %v2933_v11 }
  0x89   : > { %1510 = vmatprep.mubr.f32.mxu1 %v2781_v27  ;;  %1366 = vmatmul.mubr.f32.gmra.mxu0 %v2762_v21  ;;  %v965_v21 = vld [vmem:[%s3424_s3 + $0x438] sm:$0xff] }
  0x8a   : > { %1511 = vmatmul.mubr.f32.gmra.mxu1 %v2926_v10  ;;  %2258 = vmatprep.subr.mxu0 %v967_v5 }
  0x8b   : > { %2308 = vmatprep.subr.mxu1 %v967_v5  ;;  %2259 = vmatpush3.msra.mxu0 %v967_v5 }
  0x8c   : > { %2324 = vmatpush3.msra.mxu1 %v967_v5  ;;  %1370 = vmatprep.mubr.f32.mxu0 %v2958_v20 }
  0x8d   : > { %1515 = vmatprep.mubr.f32.mxu1 %v2802_v33  ;;  %1371 = vmatmul.mubr.f32.gmra.mxu0 %v2775_v25  ;;  %v963_v25 = vld [vmem:[%s3424_s3 + $0x428] sm:$0xff] }
  0x8e   : > { %1516 = vmatmul.mubr.f32.gmra.mxu1 %v2953_v18  ;;  %2260 = vmatprep.subr.mxu0 %v966_v15 }
  0x8f   : > { %2309 = vmatprep.subr.mxu1 %v966_v15  ;;  %2261 = vmatpush3.msra.mxu0 %v966_v15 }
  0x90   : > { %2325 = vmatpush3.msra.mxu1 %v966_v15  ;;  %1375 = vmatprep.mubr.f32.mxu0 %v2979_v31 }
  0x91   : > { %1520 = vmatprep.mubr.f32.mxu1 %v2814_v37  ;;  %1376 = vmatmul.mubr.f32.gmra.mxu0 %v2781_v27  ;;  %v961_v27 = vld [vmem:[%s3424_s3 + $0x418] sm:$0xff] }
  0x92   : > { %1521 = vmatmul.mubr.f32.gmra.mxu1 %v2977_v30  ;;  %2262 = vmatprep.subr.mxu0 %v965_v21 }
  0x93   : > { %2310 = vmatprep.subr.mxu1 %v965_v21  ;;  %2263 = vmatpush3.msra.mxu0 %v965_v21 }
  0x94   : > { %2326 = vmatpush3.msra.mxu1 %v965_v21  ;;  %1380 = vmatprep.mubr.f32.mxu0 %v2999_v44 }
  0x95   : > { %1525 = vmatprep.mubr.f32.mxu1 %v2831_v42  ;;  %1381 = vmatmul.mubr.f32.gmra.mxu0 %v2802_v33  ;;  %v571_v33 = vld [vmem:[#allocation2 + $0xc2] sm:$0xff] }
  0x96   : > { %1526 = vmatmul.mubr.f32.gmra.mxu1 %v2997_v43  ;;  %2264 = vmatprep.subr.mxu0 %v964_v24 }
  0x97   : > { %2311 = vmatprep.subr.mxu1 %v964_v24  ;;  %2265 = vmatpush3.msra.mxu0 %v964_v24 }
  0x98   : > { %2327 = vmatpush3.msra.mxu1 %v964_v24  ;;  %1385 = vmatprep.mubr.f32.mxu0 %v3019_v55 }
  0x99   : > { %1530 = vmatprep.mubr.f32.mxu1 %v2849_v47  ;;  %1386 = vmatmul.mubr.f32.gmra.mxu0 %v2814_v37  ;;  %v959_v37 = vld [vmem:[%s3424_s3 + $0x408] sm:$0xff] }
  0x9a   : > { %1531 = vmatmul.mubr.f32.gmra.mxu1 %v3017_v54  ;;  %2266 = vmatprep.subr.mxu0 %v963_v25 }
  0x9b   : > { %2312 = vmatprep.subr.mxu1 %v963_v25  ;;  %2267 = vmatpush3.msra.mxu0 %v963_v25 }
  0x9c   : > { %2328 = vmatpush3.msra.mxu1 %v963_v25  ;;  %1390 = vmatprep.mubr.f32.mxu0 %v3039_v7 }
  0x9d   : > { %1535 = vmatprep.mubr.f32.mxu1 %v2859_v51  ;;  %1391 = vmatmul.mubr.f32.gmra.mxu0 %v2831_v42  ;;  %v605_v42 = vld [vmem:[#allocation2 + $0xe0] sm:$0xff] }
  0x9e   : > { %1536 = vmatmul.mubr.f32.gmra.mxu1 %v3037_v6  ;;  %2268 = vmatprep.subr.mxu0 %v962_v26 }
  0x9f   : > { %2313 = vmatprep.subr.mxu1 %v962_v26  ;;  %2269 = vmatpush3.msra.mxu0 %v962_v26 }
  0xa0   : > { %2329 = vmatpush3.msra.mxu1 %v962_v26  ;;  %1395 = vmatprep.mubr.f32.mxu0 %v3059_v16 }
  0xa1   : > { %1540 = vmatprep.mubr.f32.mxu1 %v2877_v57  ;;  %1396 = vmatmul.mubr.f32.gmra.mxu0 %v2849_v47  ;;  %v958_v47 = vld [vmem:[%s3424_s3 + $0x400] sm:$0xff] }
  0xa2   : > { %1541 = vmatmul.mubr.f32.gmra.mxu1 %v3057_v14  ;;  %2270 = vmatprep.subr.mxu0 %v961_v27 }
  0xa3   : > { %2314 = vmatprep.subr.mxu1 %v961_v27  ;;  %2271 = vmatpush3.msra.mxu0 %v961_v27 }
  0xa4   : > { %2330 = vmatpush3.msra.mxu1 %v961_v27  ;;  %1400 = vmatprep.mubr.f32.mxu0 %v3079_v36 }
  0xa5   : > { %1545 = vmatprep.mubr.f32.mxu1 %v2893_v63  ;;  %1401 = vmatmul.mubr.f32.gmra.mxu0 %v2859_v51 }
  0xa6   : > { %1546 = vmatmul.mubr.f32.gmra.mxu1 %v3077_v35  ;;  %2272 = vmatprep.subr.mxu0 %v960_v32 }
  0xa7   : > { %2315 = vmatprep.subr.mxu1 %v960_v32  ;;  %2273 = vmatpush3.msra.mxu0 %v960_v32 }
  0xa8   : > { %2331 = vmatpush3.msra.mxu1 %v960_v32  ;;  %1405 = vmatprep.mubr.f32.mxu0 %v571_v33 }
  0xa9   : > { %1550 = vmatprep.mubr.f32.mxu1 %v2949_v17  ;;  %1406 = vmatmul.mubr.f32.gmra.mxu0 %v2877_v57  ;;  %v3220_v57 = vld [vmem:[%s3425_s4] ss:$0 sm:$0xff] }
  0xaa   : > { %1551 = vmatmul.mubr.f32.gmra.mxu1 %v604_v34  ;;  %2274 = vmatprep.subr.mxu0 %v959_v37 }
  0xab   : > { %2316 = vmatprep.subr.mxu1 %v959_v37  ;;  %2275 = vmatpush3.msra.mxu0 %v959_v37 }
  0xac   : > { %2332 = vmatpush3.msra.mxu1 %v959_v37  ;;  %1410 = vmatprep.mubr.f32.mxu0 %v572_v40 }
  0xad   : > { %1555 = vmatprep.mubr.f32.mxu1 %v2956_v19  ;;  %1411 = vmatmul.mubr.f32.gmra.mxu0 %v2893_v63 }
  0xae   : > { %1556 = vmatmul.mubr.f32.gmra.mxu1 %v605_v42  ;;  %2276 = vmatprep.subr.mxu0 %v958_v47 }
  0xaf   : > { %2317 = vmatprep.subr.mxu1 %v958_v47  ;;  %2277 = vmatpush3.msra.mxu0 %v958_v47 }
  0xb0   : > { %2333 = vmatpush3.msra.mxu1 %v958_v47  ;;  %2278 = vmatprep.mubr.f32.mxu0 %v2828_v41  ;;  %v669_v41 = vld [vmem:[#allocation2 + $0xe2] sm:$0xff] }
  0xb1   : > { %2290 = vmatprep.mubr.f32.mxu1 %v3019_v55  ;;  %2279 = vmatmul.mubr.f32.vlgmr.msra.gmra.mxu0 %v2856_v49 }
  0xb2   : > { %2291 = vmatmul.mubr.f32.vlgmr.msra.gmra.mxu1 %v3039_v7  ;;  %2281 = vmatprep.mubr.f32.mxu0 %v2884_v59 }
  0xb3   : > { %2293 = vmatprep.mubr.f32.mxu1 %v3059_v16 }
  0xb5   : > { %2282 = vmatmul.mubr.f32.gmra.mxu0 %v2908_v4 }
  0xb6   : > { %2294 = vmatmul.mubr.f32.gmra.mxu1 %v3079_v36  ;;  %2284 = vmatprep.mubr.f32.mxu0 %v2933_v11 }
  0xb7   : > { %2296 = vmatprep.mubr.f32.mxu1 %v571_v33 }
  0xb9   : > { %2285 = vmatmul.mubr.f32.gmra.mxu0 %v2958_v20 }
  0xba   : > { %2297 = vmatmul.mubr.f32.gmra.mxu1 %v572_v40  ;;  %2287 = vmatprep.mubr.f32.mxu0 %v2979_v31 }
  0xbb   : > { %2299 = vmatprep.mubr.f32.mxu1 %v668_v48 }
  0xbd   : > { %2288 = vmatmul.mubr.f32.gmra.mxu0 %v2999_v44 }
  0xbe   : > { %2300 = vmatmul.mubr.f32.gmra.mxu1 %v669_v41 }
  0xf1   : > { %v1926_v49 = vpop.f32.mrf.mxu0 }
  0xf2   : > { %v2006_v51 = vpop.f32.mrf.mxu1 }
  0xf3   : > { %v1927_v58 = vpop.f32.mrf.mxu0 }
  0xf4   : > { %v2007_v59 = vpop.f32.mrf.mxu1  ;;  %v1928_v63 = vadd.f32 %v1927_v58, %v1926_v49 }
  0xf5   : > { %v2008_v3 = vadd.f32 %v2007_v59, %v2006_v51  ;;  %v1929_v4 = vpop.f32.mrf.mxu0 }
  0xf6   : > { %v2009_v10 = vpop.f32.mrf.mxu1  ;;  %v1048_v11 = vadd.f32 %v1928_v63, %v3220_v57 }
  0xf7   : > { %v1930_v17 = vpop.f32.mrf.mxu0 }
  0xf8   : > { %v2010_v18 = vpop.f32.mrf.mxu1  ;;  %v3223_v19 = vadd.f32 %v2008_v3, %v1048_v11  ;;  %v1931_v20 = vadd.f32 %v1930_v17, %v1929_v4 }
  0xf9   : > { %v2011_v30 = vadd.f32 %v2010_v18, %v2009_v10  ;;  %v1932_v31 = vpop.f32.mrf.mxu0 }
  0xfa   : > { %v2012_v43 = vpop.f32.mrf.mxu1  ;;  %v1053_v44 = vadd.f32 %v1931_v20, %v3220_v57 }
  0xfb   : > { %v1933_v54 = vpop.f32.mrf.mxu0 }
  0xfc   : > { %v2013_v55 = vpop.f32.mrf.mxu1  ;;  %v3226_v60 = vadd.f32 %v2011_v30, %v1053_v44  ;;  %v1934_v62 = vadd.f32 %v1933_v54, %v1932_v31 }
  0xfd   : > { %v2014_v0 = vadd.f32 %v2013_v55, %v2012_v43  ;;  %v1935_v1 = vpop.f32.mrf.mxu0 }
  0xfe   : > { %v2015_v6 = vpop.f32.mrf.mxu1  ;;  %v1058_v7 = vadd.f32 %v1934_v62, %v3220_v57 }
  0xff   : > { %v1936_v8 = vpop.f32.mrf.mxu0 }
 0x100   : > { %v2016_v9 = vpop.f32.mrf.mxu1  ;;  %v3229_v12 = vadd.f32 %v2014_v0, %v1058_v7  ;;  %v1937_v13 = vadd.f32 %v1936_v8, %v1935_v1 }
 0x101   : > { %v2017_v14 = vadd.f32 %v2016_v9, %v2015_v6  ;;  %v1938_v16 = vpop.f32.mrf.mxu0 }
 0x102   : > { %v2018_v22 = vpop.f32.mrf.mxu1  ;;  %v1063_v23 = vadd.f32 %v1937_v13, %v3220_v57 }
 0x103   : > { %v1939_v28 = vpop.f32.mrf.mxu0 }
 0x104   : > { %v2019_v29 = vpop.f32.mrf.mxu1  ;;  %v3232_v35 = vadd.f32 %v2017_v14, %v1063_v23  ;;  %v1940_v36 = vadd.f32 %v1939_v28, %v1938_v16 }
 0x105   : > { %v2020_v38 = vadd.f32 %v2019_v29, %v2018_v22  ;;  %v1941_v39 = vpop.f32.mrf.mxu0 }
 0x106   : > { %v2021_v45 = vpop.f32.mrf.mxu1  ;;  %v1068_v46 = vadd.f32 %v1940_v36, %v3220_v57 }
 0x107   : > { %v1942_v52 = vpop.f32.mrf.mxu0 }
 0x108   : > { %v2022_v53 = vpop.f32.mrf.mxu1  ;;  %v3235_v50 = vadd.f32 %v2020_v38, %v1068_v46  ;;  %v1943_v56 = vadd.f32 %v1942_v52, %v1941_v39 }
 0x109   : > { %v2023_v61 = vadd.f32 %v2022_v53, %v2021_v45  ;;  %v1944_v2 = vpop.f32.mrf.mxu0 }
 0x10a   : > { %v2024_v5 = vpop.f32.mrf.mxu1  ;;  %v1073_v15 = vadd.f32 %v1943_v56, %v3220_v57 }
 0x10b   : > { %v1945_v21 = vpop.f32.mrf.mxu0 }
 0x10c   : > { %v2025_v24 = vpop.f32.mrf.mxu1  ;;  %v3238_v25 = vadd.f32 %v2023_v61, %v1073_v15  ;;  %v1946_v26 = vadd.f32 %v1945_v21, %v1944_v2 }
 0x10d   : > { %v2026_v27 = vadd.f32 %v2025_v24, %v2024_v5  ;;  %v1947_v32 = vpop.f32.mrf.mxu0 }
 0x10e   : > { %v2027_v33 = vpop.f32.mrf.mxu1  ;;  %v1078_v34 = vadd.f32 %v1946_v26, %v3220_v57 }
 0x10f   : > { %v1948_v37 = vpop.f32.mrf.mxu0 }
 0x110   : > { %v2028_v40 = vpop.f32.mrf.mxu1  ;;  %v3241_v42 = vadd.f32 %v2026_v27, %v1078_v34  ;;  %v1949_v47 = vadd.f32 %v1948_v37, %v1947_v32 }
 0x111   : > { %v2029_v48 = vadd.f32 %v2028_v40, %v2027_v33  ;;  %v1950_v41 = vpop.f32.mrf.mxu0 }
 0x112   : > { %3428 = vst [vmem:[#allocation4_spill] sm:$0xff] %v3241_v42  ;;  %v2030_v49 = vpop.f32.mrf.mxu1  ;;  %v1083_v51 = vadd.f32 %v1949_v47, %v3220_v57 }
 0x113   : > { %v1951_v58 = vpop.f32.mrf.mxu0 }
 0x114   : > { %v2031_v59 = vpop.f32.mrf.mxu1  ;;  %v3244_v63 = vadd.f32 %v2029_v48, %v1083_v51  ;;  %v1952_v3 = vadd.f32 %v1951_v58, %v1950_v41 }
 0x115   : > { %v2032_v4 = vadd.f32 %v2031_v59, %v2030_v49  ;;  %v1953_v10 = vpop.f32.mrf.mxu0 }
 0x116   : > { %3429 = vst [vmem:[#allocation5_spill] sm:$0xff] %v3244_v63  ;;  %v2033_v11 = vpop.f32.mrf.mxu1  ;;  %v1088_v17 = vadd.f32 %v1952_v3, %v3220_v57 }
 0x117   : > { %v1954_v18 = vpop.f32.mrf.mxu0 }
 0x118   : > { %v2034_v20 = vpop.f32.mrf.mxu1  ;;  %v3247_v30 = vadd.f32 %v2032_v4, %v1088_v17  ;;  %v1955_v31 = vadd.f32 %v1954_v18, %v1953_v10 }
 0x119   : > { %v2035_v43 = vadd.f32 %v2034_v20, %v2033_v11  ;;  %v1956_v44 = vpop.f32.mrf.mxu0 }
 0x11a   : > { %v2036_v54 = vpop.f32.mrf.mxu1  ;;  %v1093_v55 = vadd.f32 %v1955_v31, %v3220_v57 }
 0x11b   : > { %v1957_v62 = vpop.f32.mrf.mxu0 }
 0x11c   : > { %v2037_v0 = vpop.f32.mrf.mxu1  ;;  %v3250_v1 = vadd.f32 %v2035_v43, %v1093_v55  ;;  %v1958_v6 = vadd.f32 %v1957_v62, %v1956_v44 }
 0x11d   : > { %v2038_v7 = vadd.f32 %v2037_v0, %v2036_v54  ;;  %v1959_v8 = vpop.f32.mrf.mxu0 }
 0x11e   : > { %v2039_v9 = vpop.f32.mrf.mxu1  ;;  %v1098_v13 = vadd.f32 %v1958_v6, %v3220_v57 }
 0x11f   : > { %v1960_v14 = vpop.f32.mrf.mxu0 }
 0x120   : > { %v2040_v16 = vpop.f32.mrf.mxu1  ;;  %v3253_v22 = vadd.f32 %v2038_v7, %v1098_v13  ;;  %v1961_v23 = vadd.f32 %v1960_v14, %v1959_v8 }
 0x121   : > { %v2041_v28 = vadd.f32 %v2040_v16, %v2039_v9  ;;  %v1962_v29 = vpop.f32.mrf.mxu0 }
 0x122   : > { %3430 = vst [vmem:[#allocation6_spill] sm:$0xff] %v3253_v22  ;;  %v2042_v36 = vpop.f32.mrf.mxu1  ;;  %v1103_v38 = vadd.f32 %v1961_v23, %v3220_v57 }
 0x123   : > { %v1963_v39 = vpop.f32.mrf.mxu0 }
 0x124   : > { %v2043_v45 = vpop.f32.mrf.mxu1  ;;  %v3256_v46 = vadd.f32 %v2041_v28, %v1103_v38  ;;  %v1964_v52 = vadd.f32 %v1963_v39, %v1962_v29 }
 0x125   : > { %v2044_v53 = vadd.f32 %v2043_v45, %v2042_v36  ;;  %v1965_v56 = vpop.f32.mrf.mxu0 }
 0x126   : > { %v2045_v61 = vpop.f32.mrf.mxu1  ;;  %v1108_v2 = vadd.f32 %v1964_v52, %v3220_v57 }
 0x127   : > { %v1966_v5 = vpop.f32.mrf.mxu0 }
 0x128   : > { %v2046_v15 = vpop.f32.mrf.mxu1  ;;  %v3259_v21 = vadd.f32 %v2044_v53, %v1108_v2  ;;  %v1967_v24 = vadd.f32 %v1966_v5, %v1965_v56 }
 0x129   : > { %v2047_v26 = vadd.f32 %v2046_v15, %v2045_v61  ;;  %v1968_v27 = vpop.f32.mrf.mxu0 }
 0x12a   : > { %3431 = vst [vmem:[#allocation7_spill] sm:$0xff] %v3259_v21  ;;  %v2048_v32 = vpop.f32.mrf.mxu1  ;;  %v1113_v33 = vadd.f32 %v1967_v24, %v3220_v57 }
 0x12b   : > { %v1969_v34 = vpop.f32.mrf.mxu0 }
 0x12c   : > { %v2049_v37 = vpop.f32.mrf.mxu1  ;;  %v3262_v40 = vadd.f32 %v2047_v26, %v1113_v33  ;;  %v1970_v47 = vadd.f32 %v1969_v34, %v1968_v27 }
 0x12d   : > { %v2050_v48 = vadd.f32 %v2049_v37, %v2048_v32  ;;  %v1971_v41 = vpop.f32.mrf.mxu0 }
 0x12e   : > { %3432 = vst [vmem:[#allocation8_spill] sm:$0xff] %v3262_v40  ;;  %v2051_v49 = vpop.f32.mrf.mxu1  ;;  %v1118_v51 = vadd.f32 %v1970_v47, %v3220_v57 }
 0x12f   : > { %v1972_v58 = vpop.f32.mrf.mxu0 }
 0x130   : > { %v2052_v59 = vpop.f32.mrf.mxu1  ;;  %v3265_v3 = vadd.f32 %v2050_v48, %v1118_v51  ;;  %v1973_v4 = vadd.f32 %v1972_v58, %v1971_v41 }
 0x131   : > { %v2053_v10 = vadd.f32 %v2052_v59, %v2051_v49  ;;  %v2086_v11 = vpop.f32.mrf.mxu0 }
 0x132   : > { %3433 = vst [vmem:[#allocation9_spill] sm:$0xff] %v3265_v3  ;;  %v3267_v17 = vpop.f32.mrf.mxu1  ;;  %v1123_v18 = vadd.f32 %v1973_v4, %v3220_v57 }
 0x133   : > { %v2087_v20 = vpop.f32.mrf.mxu0 }
 0x134   : > { %v3270_v31 = vpop.f32.mrf.mxu1  ;;  %v3272_v43 = vadd.f32 %v2053_v10, %v1123_v18  ;;  %v2088_v3 = vadd.f32 %v2087_v20, %v2086_v11 }
 0x135   : > { %v2089_v44 = vpop.f32.mrf.mxu0  ;;  %v2168_v11 = vadd.f32 %v3270_v31, %v3267_v17 }
 0x136   : > { %3434 = vst [vmem:[#allocation10_spill] sm:$0xff] %v3272_v43  ;;  %v3274_v54 = vpop.f32.mrf.mxu1  ;;  %v1338_v40 = vadd.f32 %v2088_v3, %v3223_v19 }
 0x137   : > { %v2090_v55 = vpop.f32.mrf.mxu0 }
 0x138   : > { %v3276_v62 = vpop.f32.mrf.mxu1  ;;  %v2091_v43 = vadd.f32 %v2090_v55, %v2089_v44 }
 0x139   : > { %v2092_v0 = vpop.f32.mrf.mxu0  ;;  %v2171_v19 = vadd.f32 %v3276_v62, %v3274_v54 }
 0x13a   : > { %v3278_v6 = vpop.f32.mrf.mxu1  ;;  %v1343_v20 = vadd.f32 %v2091_v43, %v3226_v60 }
 0x13b   : > { %v2093_v7 = vpop.f32.mrf.mxu0 }
 0x13c   : > { %v3280_v8 = vpop.f32.mrf.mxu1 }
 0x13d   : > { %v2095_v9 = vpop.f32.mrf.mxu0  ;;  %v2174_v17 = vadd.f32 %v3280_v8, %v3278_v6 }
 0x13e   : > { %v3282_v13 = vpop.f32.mrf.mxu1 }
 0x13f   : > { %v2096_v57 = vpop.f32.mrf.mxu0 }
 0x140   : > { %v3284_v14 = vpop.f32.mrf.mxu1 }
 0x141   : > { %v2098_v16 = vpop.f32.mrf.mxu0 }
 0x142   : > { %v3286_v23 = vpop.f32.mrf.mxu1 }
 0x143   : > { %v2099_v28 = vpop.f32.mrf.mxu0 }
 0x144   : > { %v3288_v29 = vpop.f32.mrf.mxu1  ;;  %v2100_v22 = vadd.f32 %v2099_v28, %v2098_v16  ;;  %v1483_v28 = vadd.f32 %v2168_v11, %v1338_v40 }
 0x145   : > { %v2101_v36 = vpop.f32.mrf.mxu0 }
 0x146   : > { %v3290_v38 = vpop.f32.mrf.mxu1  ;;  %v1358_v60 = vadd.f32 %v2100_v22, %v3235_v50  ;;  %v2180_v50 = vadd.f32 %v3288_v29, %v3286_v23  ;;  %v3444_v29 = vld [vmem:[#allocation4_spill] sm:$0xff] }
 0x147   : > { %v2102_v39 = vpop.f32.mrf.mxu0 }
 0x148   : > { %v3292_v45 = vpop.f32.mrf.mxu1  ;;  %v2103_v42 = vadd.f32 %v2102_v39, %v2101_v36  ;;  %v1488_v36 = vadd.f32 %v2171_v19, %v1343_v20  ;;  %v3357_v23 = vadd.f32 %v2180_v50, %v1358_v60  ;;  %v3451_v19 = vld [vmem:[#allocation7_spill] sm:$0xff]  ;;  %v3454_v50 = vld [vmem:[#allocation10_spill] sm:$0xff] }
 0x149   : > { %v2104_v52 = vpop.f32.mrf.mxu0 }
 0x14a   : > { %v3294_v53 = vpop.f32.mrf.mxu1  ;;  %v1363_v31 = vadd.f32 %v2103_v42, %v3238_v25  ;;  %v2183_v25 = vadd.f32 %v3292_v45, %v3290_v38 }
 0x14b   : > { %3435 = vst [vmem:[#allocation11_spill] sm:$0xff] %v3294_v53  ;;  %v2105_v56 = vpop.f32.mrf.mxu0 }
 0x14c   : > { %v3296_v61 = vpop.f32.mrf.mxu1 }
 0x14d   : > { %3436 = vst [vmem:[#allocation12_spill] sm:$0xff] %v3296_v61  ;;  %v3298_v2 = vpop.f32.mrf.mxu0 }
 0x14e   : > { %3437 = vst [vmem:[#allocation13_spill] sm:$0xff] %v3298_v2  ;;  %v3300_v5 = vpop.f32.mrf.mxu1 }
 0x14f   : > { %3438 = vst [vmem:[#allocation14_spill] sm:$0xff] %v3300_v5  ;;  %v3302_v15 = vpop.f32.mrf.mxu0 }
 0x150   : > { %3439 = vst [vmem:[#allocation15_spill] sm:$0xff] %v3302_v15  ;;  %v3304_v24 = vpop.f32.mrf.mxu1 }
 0x151   : > { %3440 = vst [vmem:[#allocation16_spill] sm:$0xff] %v3304_v24  ;;  %v2110_v26 = vpop.f32.mrf.mxu0 }
 0x152   : > { %v3306_v27 = vpop.f32.mrf.mxu1 }
 0x153   : > { %v2111_v32 = vpop.f32.mrf.mxu0 }
 0x154   : > { %v3308_v33 = vpop.f32.mrf.mxu1  ;;  %v2112_v3 = vadd.f32 %v2111_v32, %v2110_v26 }
 0x155   : > { %v2113_v34 = vpop.f32.mrf.mxu0  ;;  %v3446_v32 = vld [vmem:[#allocation13_spill] sm:$0xff] }
 0x156   : > { %v2193_v37 = vpop.f32.mrf.mxu1  ;;  %v1378_v42 = vadd.f32 %v2112_v3, %v3247_v30  ;;  %v3445_v30 = vld [vmem:[#allocation6_spill] sm:$0xff] }
 0x157   : > { %v2114_v47 = vpop.f32.mrf.mxu0 }
 0x158   : > { %v2194_v48 = vpop.f32.mrf.mxu1 }
 0x159   : > { %v2116_v41 = vpop.f32.mrf.mxu0 }
 0x15a   : > { %v3310_v49 = vpop.f32.mrf.mxu1 }
 0x15b   : > { %3441 = vst [vmem:[#allocation17_spill] sm:$0xff] %v3310_v49  ;;  %v2117_v51 = vpop.f32.mrf.mxu0  ;;  %v2097_v49 = vadd.f32 %v2096_v57, %v2095_v9 }
 0x15c   : > { %v3312_v58 = vpop.f32.mrf.mxu1  ;;  %v2118_v54 = vadd.f32 %v2117_v51, %v2116_v41  ;;  %v3450_v51 = vld [vmem:[#allocation8_spill] sm:$0xff] }
 0x15d   : > { %3442 = vst [vmem:[#allocation18_spill] sm:$0xff] %v3312_v58  ;;  %v2119_v59 = vpop.f32.mrf.mxu0  ;;  %v2094_v58 = vadd.f32 %v2093_v7, %v2092_v0  ;;  %v1353_v7 = vadd.f32 %v2097_v49, %v3232_v35  ;;  %v2106_v35 = vadd.f32 %v2105_v56, %v2104_v52  ;;  %v2192_v52 = vadd.f32 %v3308_v33, %v3306_v27 }
 0x15e   : > { %v2199_v4 = vpop.f32.mrf.mxu1  ;;  %v1508_v56 = vadd.f32 %v2183_v25, %v1363_v31  ;;  %v1388_v45 = vadd.f32 %v2118_v54, %v3445_v30  ;;  %v3452_v54 = vld [vmem:[#allocation5_spill] sm:$0xff] }
 0x15f   : > { %v2120_v10 = vpop.f32.mrf.mxu0  ;;  %v1348_v0 = vadd.f32 %v2094_v58, %v3229_v12  ;;  %v2177_v12 = vadd.f32 %v3284_v14, %v3282_v13  ;;  %v3360_v38 = vadd.f32 %v2106_v35, %v3444_v29  ;;  %v1523_v41 = vadd.f32 %v2192_v52, %v1378_v42  ;;  %v3457_v52 = vld [vmem:[#allocation9_spill] sm:$0xff] }
 0x160   : > { %v2200_v18 = vpop.f32.mrf.mxu1  ;;  %v2121_v9 = vadd.f32 %v2120_v10, %v2119_v59 }
 0x161   : > { %v2122_v61 = vpop.f32.mrf.mxu0  ;;  %v1498_v14 = vadd.f32 %v2177_v12, %v1353_v7  ;;  %v1493_v39 = vadd.f32 %v2174_v17, %v1348_v0  ;;  %v2201_v26 = vadd.f32 %v2200_v18, %v2199_v4 }
 0x162   : > { %v3314_v53 = vpop.f32.mrf.mxu1  ;;  %v1393_v22 = vadd.f32 %v2121_v9, %v3256_v46  ;;  %v3448_v27 = vld [vmem:[#allocation17_spill] sm:$0xff] }
 0x163   : > { %3443 = vst [vmem:[#allocation19_spill] sm:$0xff] %v3314_v53  ;;  %v2123_v24 = vpop.f32.mrf.mxu0  ;;  %v2115_v53 = vadd.f32 %v2114_v47, %v2113_v34  ;;  %v3447_v34 = vld [vmem:[#allocation15_spill] sm:$0xff] }
 0x164   : > { %v3317_v5 = vpop.f32.mrf.mxu1  ;;  %v2124_v46 = vadd.f32 %v2123_v24, %v2122_v61  ;;  %v3449_v33 = vld [vmem:[#allocation18_spill] sm:$0xff]  ;;  %v1538_v4 = vadd.f32 %v2201_v26, %v1393_v22 }
 0x165   : > { %v2125_v63 = vpop.f32.mrf.mxu0  ;;  %v1383_v43 = vadd.f32 %v2115_v53, %v3250_v1  ;;  %v2195_v1 = vadd.f32 %v2194_v48, %v2193_v37  ;;  %v2109_v37 = vadd.f32 %v3447_v34, %v3446_v32  ;;  %v2198_v49 = vadd.f32 %v3449_v33, %v3448_v27  ;;  %v3459_v32 = vld [vmem:[#allocation12_spill] sm:$0xff] }
 0x166   : > { %v3319_v21 = vpop.f32.mrf.mxu1  ;;  %v1398_v3 = vadd.f32 %v2124_v46, %v3451_v19 }
 0x167   : > { %v2126_v15 = vpop.f32.mrf.mxu0  ;;  %v1528_v53 = vadd.f32 %v2195_v1, %v1383_v43  ;;  %v1533_v60 = vadd.f32 %v2198_v49, %v1388_v45 }
 0x168   : > { %v3322_v2 = vpop.f32.mrf.mxu1  ;;  %v2127_v6 = vadd.f32 %v2126_v15, %v2125_v63 }
 0x169   : > { %v2128_v44 = vpop.f32.mrf.mxu0  ;;  %v2207_v0 = vadd.f32 %v3322_v2, %v3319_v21 }
 0x16a   : > { %v3327_v55 = vpop.f32.mrf.mxu1  ;;  %v1403_v58 = vadd.f32 %v2127_v6, %v3450_v51  ;;  %v3455_v6 = vld [vmem:[#allocation14_spill] sm:$0xff] }
 0x16b   : > { %v2129_v57 = vpop.f32.mrf.mxu0 }
 0x16c   : > { %v3333_v16 = vpop.f32.mrf.mxu1  ;;  %v2130_v7 = vadd.f32 %v2129_v57, %v2128_v44  ;;  %v1548_v44 = vadd.f32 %v2207_v0, %v1403_v58 }
 0x16d   : > { %v2131_v62 = vpop.f32.mrf.mxu0 }
 0x16e   : > { %v3346_v40 = vpop.f32.mrf.mxu1 }
 0x16f   : > { %v2132_v8 = vpop.f32.mrf.mxu0 }
 0x170   : > { %v2212_v13 = vpop.f32.mrf.mxu1  ;;  %v2133_v61 = vadd.f32 %v2132_v8, %v2131_v62  ;;  %v3453_v62 = vld [vmem:[#allocation19_spill] sm:$0xff]  ;;  %v3456_v8 = vld [vmem:[#allocation16_spill] sm:$0xff] }
 0x171   : > { %v2280_v63 = vpop.f32.mrf.mxu0 }
 0x172   : > { %v2292_v15 = vpop.f32.mrf.mxu1  ;;  %v1633_v47 = vadd.f32 %v2280_v63, %v1488_v36  ;;  %v2204_v36 = vadd.f32 %v3317_v5, %v3453_v62  ;;  %v1413_v25 = vadd.f32 %v2133_v61, %v3454_v50  ;;  %v2213_v5 = vadd.f32 %v2212_v13, %v3346_v40 }
 0x173   : > { %v1673_v48 = vadd.f32 %v2292_v15, %v1528_v53  ;;  %v1627_v24 = vpop.f32.mrf.mxu0  ;;  %v1408_v53 = vadd.f32 %v2130_v7, %v3457_v52 }
 0x174   : > { %v1667_v59 = vpop.f32.mrf.mxu1  ;;  %v1707_v10 = vmax.f32 %v1633_v47, 0.0  ;;  %v1628_v11 = vadd.f32 %v1627_v24, %v1483_v28  ;;  %v1373_v28 = vadd.f32 %v2109_v37, %v3452_v54  ;;  %v1543_v45 = vadd.f32 %v2204_v36, %v1398_v3 }
 0x175   : > { %v1715_v18 = vmax.f32 %v1673_v48, 0.0  ;;  %v1668_v20 = vadd.f32 %v1667_v59, %v1523_v41  ;;  %v2283_v9 = vpop.f32.mrf.mxu0  ;;  %v2210_v37 = vadd.f32 %v3333_v16, %v3327_v55  ;;  %v1558_v48 = vadd.f32 %v2213_v5, %v1413_v25 }
 0x176   : > { %v2295_v17 = vpop.f32.mrf.mxu1  ;;  %1723 = vst [vmem:[%s3368_s12 + $0x8] sm:$0xff] %v1707_v10  ;;  %v1706_v31 = vmax.f32 %v1628_v11, 0.0  ;;  %v1643_v12 = vadd.f32 %v2283_v9, %v1498_v14  ;;  %v2189_v14 = vadd.f32 %v3456_v8, %v3455_v6 }
 0x177   : > { %1731 = vst [vmem:[%s3368_s12 + $0x48] sm:$0xff] %v1715_v18  ;;  %v1714_v43 = vmax.f32 %v1668_v20, 0.0  ;;  %v1683_v35 = vadd.f32 %v2295_v17, %v1538_v4  ;;  %v1637_v21 = vpop.f32.mrf.mxu0  ;;  %v1553_v55 = vadd.f32 %v2210_v37, %v1408_v53 }
 0x178   : > { %v1677_v2 = vpop.f32.mrf.mxu1  ;;  %1722 = vst [vmem:[%s3368_s12] sm:$0xff] %v1706_v31  ;;  %v1709_v57 = vmax.f32 %v1643_v12, 0.0  ;;  %v1638_v1 = vadd.f32 %v1637_v21, %v1493_v39  ;;  %v3458_v39 = vld [vmem:[#allocation11_spill] sm:$0xff]  ;;  %v1518_v47 = vadd.f32 %v2189_v14, %v1373_v28 }
 0x179   : > { %1730 = vst [vmem:[%s3368_s12 + $0x40] sm:$0xff] %v1714_v43  ;;  %v1717_v42 = vmax.f32 %v1683_v35, 0.0  ;;  %v1678_v22 = vadd.f32 %v1677_v2, %v1533_v60  ;;  %v2286_v29 = vpop.f32.mrf.mxu0  ;;  %v2186_v34 = vadd.f32 %v3459_v32, %v3458_v39 }
 0x17a   : > { %v2298_v30 = vpop.f32.mrf.mxu1  ;;  %1725 = vst [vmem:[%s3368_s12 + $0x18] sm:$0xff] %v1709_v57  ;;  %v1708_v26 = vmax.f32 %v1638_v1, 0.0  ;;  %v1653_v63 = vadd.f32 %v2286_v29, %v1508_v56 }
 0x17b   : > { %1733 = vst [vmem:[%s3368_s12 + $0x58] sm:$0xff] %v1717_v42  ;;  %v1716_v46 = vmax.f32 %v1678_v22, 0.0  ;;  %v1693_v15 = vadd.f32 %v2298_v30, %v1548_v44  ;;  %v1647_v40 = vpop.f32.mrf.mxu0  ;;  %v1513_v58 = vadd.f32 %v2186_v34, %v3360_v38 }
 0x17c   : > { %v1687_v13 = vpop.f32.mrf.mxu1  ;;  %1724 = vst [vmem:[%s3368_s12 + $0x10] sm:$0xff] %v1708_v26  ;;  %v1711_v41 = vmax.f32 %v1653_v63, 0.0  ;;  %v1648_v56 = vadd.f32 %v1647_v40, %v3357_v23 }
 0x17d   : > { %1732 = vst [vmem:[%s3368_s12 + $0x50] sm:$0xff] %v1716_v46  ;;  %v1719_v27 = vmax.f32 %v1693_v15, 0.0  ;;  %v1688_v33 = vadd.f32 %v1687_v13, %v1543_v45  ;;  %v2289_v49 = vpop.f32.mrf.mxu0 }
 0x17e   : > { %v2301_v51 = vpop.f32.mrf.mxu1  ;;  %1727 = vst [vmem:[%s3368_s12 + $0x28] sm:$0xff] %v1711_v41  ;;  %v1710_v16 = vmax.f32 %v1648_v56, 0.0  ;;  %v1663_v24 = vadd.f32 %v2289_v49, %v1518_v47 }
 0x17f   : > { %1735 = vst [vmem:[%s3368_s12 + $0x68] sm:$0xff] %v1719_v27  ;;  %v1718_v61 = vmax.f32 %v1688_v33, 0.0  ;;  %v1703_v59 = vadd.f32 %v2301_v51, %v1558_v48  ;;  %v1657_v4 = vpop.f32.mrf.mxu0 }
 0x180   : > { %v1697_v10 = vpop.f32.mrf.mxu1  ;;  %1726 = vst [vmem:[%s3368_s12 + $0x20] sm:$0xff] %v1710_v16  ;;  %v1713_v23 = vmax.f32 %v1663_v24, 0.0  ;;  %v1658_v11 = vadd.f32 %v1657_v4, %v1513_v58 }
 0x181   : > { %1734 = vst [vmem:[%s3368_s12 + $0x60] sm:$0xff] %v1718_v61  ;;  %v1721_v18 = vmax.f32 %v1703_v59, 0.0  ;;  %v1698_v20 = vadd.f32 %v1697_v10, %v1553_v55 }
 0x182   : > { %1729 = vst [vmem:[%s3368_s12 + $0x38] sm:$0xff] %v1713_v23  ;;  %v1712_v38 = vmax.f32 %v1658_v11, 0.0 }
 0x183   : > { %1737 = vst [vmem:[%s3368_s12 + $0x78] sm:$0xff] %v1721_v18  ;;  %v1720_v19 = vmax.f32 %v1698_v20, 0.0 }
 0x184   : > { %1728 = vst [vmem:[%s3368_s12 + $0x30] sm:$0xff] %v1712_v38 }
 0x185   : > { %1736 = vst [vmem:[%s3368_s12 + $0x70] sm:$0xff] %v1720_v19 }
 0x186 PF: > { %s15_s22 = sadd.s32 1, %s2413_s22   ;;  %s3460_s18 = smov %s2405_s20 }
 0x187   : > { %p12_p9 = scmp.ge.s32.totalorder %s15_s22, 6   ;;  %s3461_s19 = smov %s2409_s21 }
 0x188   : > { %s3462_s20 = smov %s3465_s23  ;;  %s3463_s21 = smov %s3469_s24 }
 0x189   :  { %14 = sbr.rel (!%p12_p9) target bundleno = 3 (0x3), region = 79 }

// kernel: instance_branch_forward.6
= control target key start
LH: loop header
LB: loop body
LE: loop exit
PB: predicated region body
PF: predicated region fallthrough
CT: control target
= control target key end

     0   :  { %s2430_s18 = smov 0   ;;  %s2432_s19 = smov 0   ;;  %s3411_s0 = inlined_call_operand.vmem [shape: f32[2,16,16,128], index: 0, kind: input, shape index: {}]   ;;  %s3412_s1 = inlined_call_operand.vmem [shape: f32[2,2,16,128], index: 1, kind: input, shape index: {}]   ;;  %s3413_s2 = inlined_call_operand.vmem [shape: f32[2,2,16,128], index: 2, kind: input, shape index: {}]   ;;  %s3414_s3 = inlined_call_operand.vmem [shape: f32[1152,128], index: 3, kind: input, shape index: {}]   ;;  %s3415_s4 = inlined_call_operand.vmem [shape: f32[1,128], index: 4, kind: input, shape index: {}]   ;;  %s3416_s5 = inlined_call_operand.vmem [shape: f32[2,256,128], index: 5, kind: output, shape index: {}]  }
   0x1   :  { %s2434_s20 = smov 0   ;;  %s2436_s21 = smov 0  }
   0x2   :  { %s2438_s22 = smov 0  }
   0x3 LB: > { %s24_s23 = sadd.s32 1, %s2389_s20  ;;  %s27_s24 = sadd.s32 1, %s2393_s21  ;;  %s2397_s22 = sphi %s2438_s22, %s15_s22   ;;  %s2393_s21 = sphi %s2436_s21, %s3455_s21   ;;  %s2389_s20 = sphi %s2434_s20, %s3454_s20   ;;  %s2385_s19 = sphi %s2432_s19, %s3453_s19   ;;  %s2381_s18 = sphi %s2430_s18, %s3452_s18  }
   0x4   : > { %p25_p0 = scmp.ge.s32.totalorder %s24_s23, 2  ;;  %p1861_p1 = scmp.ge.s32.totalorder %s2397_s22, 1 }
   0x5   : > { %p241_p2 = scmp.lt.s32.totalorder %s2397_s22, 5 }
   0x6   : > { %s3457_s23 = smov (%p25_p0, %s24_s23), 0  ;;  %s3459_s24 = smov (!%p25_p0, %s27_s24), %s2393_s21 }
   0x7   : > { %p242_p3 = pnand %p1861_p1, %p241_p2  ;;  %p29_p4 = scmp.ge.s32.totalorder %s3459_s24, 2 }
   0x9   : > { %s3461_s24 = smov (%p29_p4, %s3459_s24), 0  ;;  %245 = sbr.rel (%p242_p3) target bundleno = 388 (0x184), region = 40 }
   0xe   : > { %v861_v0 = vld [vmem:[%s3414_s3 + $0xf8] sm:$0xff]  ;;  %s1862_s6 = sshll.u32 %s2381_s18, 3  ;;  %p297_p5 = scmp.lt.s32.totalorder %s2385_s19, 1  ;;  %v860_v4 = vld [vmem:[%s3414_s3 + $0xf0] sm:$0xff]  ;;  %v2399_v6 = vmov 0.0   ;;  %v859_v9 = vld [vmem:[%s3414_s3 + $0xe8] sm:$0xff] }
   0xf   : > { %v893_v1 = vld [vmem:[%s3414_s3 + $0x1f8] sm:$0xff]  ;;  %1878 = vmatprep.subr.mxu0 %v861_v0  ;;  %v892_v5 = vld [vmem:[%s3414_s3 + $0x1f0] sm:$0xff]  ;;  %p2486_p6 = scmp.lt.s32.totalorder %s1862_s6, 15  ;;  %336 = vst [vmem:[#allocation2 + $0x18] sm:$0x1] %v2399_v6  ;;  %v891_v10 = vld [vmem:[%s3414_s3 + $0x1e8] sm:$0xff] }
  0x10   : > { %v845_v2 = vld [vmem:[%s3414_s3 + $0x78] sm:$0xff]  ;;  %1958 = vmatprep.subr.mxu1 %v893_v1  ;;  %335 = vst [vmem:[#allocation2] sm:$0x1] %v2399_v6  ;;  %337 = vst [vmem:[#allocation2 + $0x30] sm:$0x1] %v2399_v6  ;;  %v844_v7 = vld [vmem:[%s3414_s3 + $0x70] sm:$0xff] }
  0x11   : > { %v877_v3 = vld [vmem:[%s3414_s3 + $0x178] sm:$0xff]  ;;  %338 = vst [vmem:[#allocation2 + $0x48] sm:$0x1] %v2399_v6  ;;  %339 = vst [vmem:[#allocation2 + $0x60] sm:$0x1] %v2399_v6  ;;  %1879 = vmatpush3.msra.mxu0 %v845_v2  ;;  %v876_v8 = vld [vmem:[%s3414_s3 + $0x170] sm:$0xff] }
  0x12   : > { %340 = vst [vmem:[#allocation2 + $0x78] sm:$0x1] %v2399_v6  ;;  %341 = vst [vmem:[#allocation2 + $0x90] sm:$0x1] %v2399_v6  ;;  %1959 = vmatpush3.msra.mxu1 %v877_v3  ;;  %1880 = vmatprep.subr.mxu0 %v860_v4  ;;  %v843_v11 = vld [vmem:[%s3414_s3 + $0x68] sm:$0xff]  ;;  %s3463_s19 = smov (!%p297_p5, %s2385_s19), 1 }
  0x13   : > { %342 = vst [vmem:[#allocation2 + $0xa8] sm:$0x1] %v2399_v6  ;;  %343 = vst [vmem:[#allocation2 + $0xc0] sm:$0x1] %v2399_v6  ;;  %1960 = vmatprep.subr.mxu1 %v892_v5  ;;  %v875_v12 = vld [vmem:[%s3414_s3 + $0x168] sm:$0xff]  ;;  %1881 = vmatpush3.msra.mxu0 %v844_v7  ;;  %v858_v13 = vld [vmem:[%s3414_s3 + $0xe0] sm:$0xff] }
  0x14   : > { %344 = vst [vmem:[#allocation2 + $0xd8] sm:$0x1] %v2399_v6  ;;  %345 = vst [vmem:[#allocation2 + $0x11] sm:$0x1] %v2399_v6  ;;  %1961 = vmatpush3.msra.mxu1 %v876_v8  ;;  %v890_v14 = vld [vmem:[%s3414_s3 + $0x1e0] sm:$0xff]  ;;  %s3465_s6 = smov (!%p2486_p6, %s1862_s6), 15  ;;  %1882 = vmatprep.subr.mxu0 %v859_v9 }
  0x15   : > { %346 = vst [vmem:[#allocation2 + $0x29] sm:$0x1] %v2399_v6  ;;  %347 = vst [vmem:[#allocation2 + $0x41] sm:$0x1] %v2399_v6  ;;  %1962 = vmatprep.subr.mxu1 %v891_v10  ;;  %v842_v15 = vld [vmem:[%s3414_s3 + $0x60] sm:$0xff]  ;;  %p309_p7 = scmp.lt.s32.totalorder %s2381_s18, 1  ;;  %1883 = vmatpush3.msra.mxu0 %v843_v11 }
  0x16   : > { %348 = vst [vmem:[#allocation2 + $0x59] sm:$0x1] %v2399_v6  ;;  %349 = vst [vmem:[#allocation2 + $0x71] sm:$0x1] %v2399_v6  ;;  %v874_v16 = vld [vmem:[%s3414_s3 + $0x160] sm:$0xff]  ;;  %1963 = vmatpush3.msra.mxu1 %v875_v12  ;;  %v857_v17 = vld [vmem:[%s3414_s3 + $0xd8] sm:$0xff]  ;;  %1884 = vmatprep.subr.mxu0 %v858_v13 }
  0x17   : > { %350 = vst [vmem:[#allocation2 + $0x89] sm:$0x1] %v2399_v6  ;;  %351 = vst [vmem:[#allocation2 + $0xa1] sm:$0x1] %v2399_v6  ;;  %v889_v18 = vld [vmem:[%s3414_s3 + $0x1d8] sm:$0xff]  ;;  %1964 = vmatprep.subr.mxu1 %v890_v14  ;;  %s1864_s8 = sshll.u32 %s3463_s19, 5  ;;  %1885 = vmatpush3.msra.mxu0 %v842_v15 }
  0x18   : > { %352 = vst [vmem:[#allocation2 + $0xb9] sm:$0x1] %v2399_v6  ;;  %353 = vst [vmem:[#allocation2 + $0xd1] sm:$0x1] %v2399_v6  ;;  %v841_v19 = vld [vmem:[%s3414_s3 + $0x58] sm:$0xff]  ;;  %1965 = vmatpush3.msra.mxu1 %v874_v16  ;;  %v856_v21 = vld [vmem:[%s3414_s3 + $0xd0] sm:$0xff]  ;;  %1886 = vmatprep.subr.mxu0 %v857_v17 }
  0x19   : > { %354 = vst [vmem:[#allocation2 + $0xe9] sm:$0x1] %v2399_v6  ;;  %v873_v20 = vld [vmem:[%s3414_s3 + $0x158] sm:$0xff]  ;;  %v888_v22 = vld [vmem:[%s3414_s3 + $0x1d0] sm:$0xff]  ;;  %s1863_s14 = sshll.u32 %s3465_s6, 1  ;;  %s1867_s15 = sshll.u32 %s3463_s19, 2  ;;  %1966 = vmatprep.subr.mxu1 %v889_v18  ;;  %1887 = vmatpush3.msra.mxu0 %v841_v19 }
  0x1a   : > { %v840_v23 = vld [vmem:[%s3414_s3 + $0x50] sm:$0xff]  ;;  %s310_s13 = scalar_select %p309_p7, %s2381_s18, 1  ;;  %1967 = vmatpush3.msra.mxu1 %v873_v20  ;;  %v855_v25 = vld [vmem:[%s3414_s3 + $0xc8] sm:$0xff]  ;;  %1888 = vmatprep.subr.mxu0 %v856_v21  ;;  %v854_v29 = vld [vmem:[%s3414_s3 + $0xc0] sm:$0xff] }
  0x1b   : > { %v872_v24 = vld [vmem:[%s3414_s3 + $0x150] sm:$0xff]  ;;  %v887_v26 = vld [vmem:[%s3414_s3 + $0x1c8] sm:$0xff]  ;;  %1968 = vmatprep.subr.mxu1 %v888_v22  ;;  %1889 = vmatpush3.msra.mxu0 %v840_v23  ;;  %v886_v30 = vld [vmem:[%s3414_s3 + $0x1c0] sm:$0xff]  ;;  %s2582_s26 = sadd.s32 %s1864_s8, %s1863_s14  ;;  %s1872_s10 = sshll.u32 %s2381_s18, 4 }
  0x1c   : > { %v839_v27 = vld [vmem:[%s3414_s3 + $0x48] sm:$0xff]  ;;  %s1866_s11 = sshll.u32 %s310_s13, 1  ;;  %1969 = vmatpush3.msra.mxu1 %v872_v24  ;;  %1890 = vmatprep.subr.mxu0 %v855_v25  ;;  %v838_v31 = vld [vmem:[%s3414_s3 + $0x40] sm:$0xff]  ;;  %v853_v33 = vld [vmem:[%s3414_s3 + $0xb8] sm:$0xff]  ;;  %s1865_s16 = sshll.u32 %s2582_s26, 3 }
  0x1d   : > { %v871_v28 = vld [vmem:[%s3414_s3 + $0x148] sm:$0xff]  ;;  %s2584_s27 = sadd.s32 %s1867_s15, %s1866_s11  ;;  %1970 = vmatprep.subr.mxu1 %v887_v26  ;;  %v870_v32 = vld [vmem:[%s3414_s3 + $0x140] sm:$0xff]  ;;  %1891 = vmatpush3.msra.mxu0 %v839_v27  ;;  %v885_v34 = vld [vmem:[%s3414_s3 + $0x1b8] sm:$0xff]  ;;  %s2627_s25 = scalar_lea.vmem %s3411_s0, %s1865_s16 }
  0x1e   : > { %1971 = vmatpush3.msra.mxu1 %v871_v28  ;;  %1892 = vmatprep.subr.mxu0 %v854_v29  ;;  %v837_v35 = vld [vmem:[%s3414_s3 + $0x38] sm:$0xff]  ;;  %s1868_s17 = sshll.u32 %s2584_s27, 3  ;;  %v852_v37 = vld [vmem:[%s3414_s3 + $0xb0] sm:$0xff]  ;;  %v851_v41 = vld [vmem:[%s3414_s3 + $0xa8] sm:$0xff]  ;;  %p328_p8 = scmp.lt.s32.totalorder %s1872_s10, 31 }
  0x1f   : > { %1972 = vmatprep.subr.mxu1 %v886_v30  ;;  %v869_v36 = vld [vmem:[%s3414_s3 + $0x138] sm:$0xff]  ;;  %1893 = vmatpush3.msra.mxu0 %v838_v31  ;;  %v884_v38 = vld [vmem:[%s3414_s3 + $0x1b0] sm:$0xff]  ;;  %v883_v42 = vld [vmem:[%s3414_s3 + $0x1a8] sm:$0xff]  ;;  %s315_s6 = scalar_lea.vmem %s3412_s1, %s1868_s17  ;;  %s324_s13 = scalar_lea.vmem %s3413_s2, %s1868_s17 }
  0x20   : > { %1973 = vmatpush3.msra.mxu1 %v870_v32  ;;  %1894 = vmatprep.subr.mxu0 %v853_v33  ;;  %v836_v39 = vld [vmem:[%s3414_s3 + $0x30] sm:$0xff]  ;;  %v835_v43 = vld [vmem:[%s3414_s3 + $0x28] sm:$0xff]  ;;  %v850_v45 = vld [vmem:[%s3414_s3 + $0xa0] sm:$0xff]  ;;  %s3467_s10 = smov (!%p328_p8, %s1872_s10), 31 }
  0x21   : > { %1974 = vmatprep.subr.mxu1 %v885_v34  ;;  %v868_v40 = vld [vmem:[%s3414_s3 + $0x130] sm:$0xff]  ;;  %1895 = vmatpush3.msra.mxu0 %v837_v35  ;;  %v867_v44 = vld [vmem:[%s3414_s3 + $0x128] sm:$0xff]  ;;  %v882_v46 = vld [vmem:[%s3414_s3 + $0x1a0] sm:$0xff]  ;;  %s3320_s18 = sadd.s32 %s1864_s8, %s3467_s10 }
  0x22   : > { %1975 = vmatpush3.msra.mxu1 %v869_v36  ;;  %1896 = vmatprep.subr.mxu0 %v852_v37  ;;  %v834_v47 = vld [vmem:[%s3414_s3 + $0x20] sm:$0xff]  ;;  %v849_v51 = vld [vmem:[%s3414_s3 + $0x98] sm:$0xff]  ;;  %v2662_v53 = vld [vmem:[%s315_s6 + $0x8] sm:$0xff]  ;;  %s1874_s19 = sshll.u32 %s3320_s18, 3 }
  0x23   : > { %1976 = vmatprep.subr.mxu1 %v884_v38  ;;  %1897 = vmatpush3.msra.mxu0 %v836_v39  ;;  %v866_v48 = vld [vmem:[%s3414_s3 + $0x120] sm:$0xff]  ;;  %v881_v52 = vld [vmem:[%s3414_s3 + $0x198] sm:$0xff]  ;;  %358 = vst [vmem:[#allocation2 + $0x9] sm:$0xff] %v2662_v53  ;;  %v2672_v56 = vld [vmem:[%s2627_s25 + $0x8] sm:$0xff]  ;;  %s3348_s12 = scalar_lea.vmem %s3416_s5, %s1874_s19 }
  0x24   : > { %1977 = vmatpush3.msra.mxu1 %v868_v40  ;;  %1898 = vmatprep.subr.mxu0 %v851_v41  ;;  %v355_v49 = vld [vmem:[%s315_s6] sm:$0xff]  ;;  %v833_v54 = vld [vmem:[%s3414_s3 + $0x18] sm:$0xff]  ;;  %v848_v57 = vld [vmem:[%s3414_s3 + $0x90] sm:$0xff]  ;;  %382 = vst [vmem:[#allocation2 + $0x21] sm:$0xff] %v2672_v56 }
  0x25   : > { %1978 = vmatprep.subr.mxu1 %v883_v42  ;;  %v2653_v50 = vld [vmem:[%s2627_s25] sm:$0xff]  ;;  %1899 = vmatpush3.msra.mxu0 %v835_v43  ;;  %357 = vst [vmem:[#allocation2 + $0x1] sm:$0xff] %v355_v49  ;;  %v865_v55 = vld [vmem:[%s3414_s3 + $0x118] sm:$0xff]  ;;  %v880_v58 = vld [vmem:[%s3414_s3 + $0x190] sm:$0xff] }
  0x26   : > { %1979 = vmatpush3.msra.mxu1 %v867_v44  ;;  %381 = vst [vmem:[#allocation2 + $0x19] sm:$0xff] %v2653_v50  ;;  %1900 = vmatprep.subr.mxu0 %v850_v45  ;;  %v832_v59 = vld [vmem:[%s3414_s3 + $0x10] sm:$0xff]  ;;  %v847_v62 = vld [vmem:[%s3414_s3 + $0x88] sm:$0xff]  ;;  %v2704_v2 = vld [vmem:[%s2627_s25 + $0x18] sm:$0xff] }
  0x27   : > { %1980 = vmatprep.subr.mxu1 %v882_v46  ;;  %1901 = vmatpush3.msra.mxu0 %v834_v47  ;;  %v864_v60 = vld [vmem:[%s3414_s3 + $0x110] sm:$0xff]  ;;  %v879_v63 = vld [vmem:[%s3414_s3 + $0x188] sm:$0xff]  ;;  %v846_v3 = vld [vmem:[%s3414_s3 + $0x80] sm:$0xff]  ;;  %384 = vst [vmem:[#allocation2 + $0x39] sm:$0xff] %v2704_v2 }
  0x28   : > { %1981 = vmatpush3.msra.mxu1 %v866_v48  ;;  %1902 = vmatprep.subr.mxu0 %v849_v51  ;;  %v2688_v61 = vld [vmem:[%s2627_s25 + $0x10] sm:$0xff]  ;;  %v831_v0 = vld [vmem:[%s3414_s3 + $0x8] sm:$0xff]  ;;  %v878_v4 = vld [vmem:[%s3414_s3 + $0x180] sm:$0xff] }
  0x29   : > { %1982 = vmatprep.subr.mxu1 %v881_v52  ;;  %1903 = vmatpush3.msra.mxu0 %v833_v54  ;;  %383 = vst [vmem:[#allocation2 + $0x31] sm:$0xff] %v2688_v61  ;;  %v863_v1 = vld [vmem:[%s3414_s3 + $0x108] sm:$0xff]  ;;  %v2714_v5 = vld [vmem:[%s2627_s25 + $0x20] sm:$0xff]  ;;  %v925_v11 = vld [vmem:[%s3414_s3 + $0x2f8] sm:$0xff] }
  0x2a   : > { %1983 = vmatpush3.msra.mxu1 %v865_v55  ;;  %1904 = vmatprep.subr.mxu0 %v848_v57  ;;  %v830_v6 = vld [vmem:[%s3414_s3] sm:$0xff]  ;;  %385 = vst [vmem:[#allocation2 + $0x49] sm:$0xff] %v2714_v5  ;;  %v957_v12 = vld [vmem:[%s3414_s3 + $0x3f8] sm:$0xff]  ;;  %v2736_v15 = vld [vmem:[%s2627_s25 + $0x28] sm:$0xff] }
  0x2b   : > { %1984 = vmatprep.subr.mxu1 %v880_v58  ;;  %1905 = vmatpush3.msra.mxu0 %v832_v59  ;;  %v862_v7 = vld [vmem:[%s3414_s3 + $0x100] sm:$0xff]  ;;  %v909_v13 = vld [vmem:[%s3414_s3 + $0x278] sm:$0xff]  ;;  %386 = vst [vmem:[#allocation2 + $0x51] sm:$0xff] %v2736_v15  ;;  %v462_v18 = vld [vmem:[#allocation2 + $0xa] sm:$0xff] }
  0x2c   : > { %1985 = vmatpush3.msra.mxu1 %v864_v60  ;;  %1906 = vmatprep.subr.mxu0 %v847_v62  ;;  %v397_v9 = vld [vmem:[#allocation2] sm:$0xff]  ;;  %v941_v14 = vld [vmem:[%s3414_s3 + $0x378] sm:$0xff]  ;;  %v398_v17 = vld [vmem:[#allocation2 + $0x8] sm:$0xff] }
  0x2d   : > { %1986 = vmatprep.subr.mxu1 %v879_v63  ;;  %1907 = vmatpush3.msra.mxu0 %v831_v0  ;;  %v493_v8 = vld [vmem:[#allocation2 + $0x18] sm:$0xff]  ;;  %v461_v10 = vld [vmem:[#allocation2 + $0x2] sm:$0xff]  ;;  %v924_v19 = vld [vmem:[%s3414_s3 + $0x2f0] sm:$0xff] }
  0x2e   : > { %1987 = vmatpush3.msra.mxu1 %v863_v1  ;;  %1908 = vmatprep.subr.mxu0 %v846_v3  ;;  %v494_v16 = vld [vmem:[#allocation2 + $0x20] sm:$0xff]  ;;  %v956_v20 = vld [vmem:[%s3414_s3 + $0x3f0] sm:$0xff]  ;;  %v2759_v25 = vld [vmem:[%s2627_s25 + $0x38] sm:$0xff] }
  0x2f   : > { %1988 = vmatprep.subr.mxu1 %v878_v4  ;;  %1909 = vmatpush3.msra.mxu0 %v830_v6  ;;  %v2746_v21 = vld [vmem:[%s2627_s25 + $0x30] sm:$0xff]  ;;  %v2761_v26 = vld [vmem:[#allocation2 + $0x1a] sm:$0xff]  ;;  %388 = vst [vmem:[#allocation2 + $0x69] sm:$0xff] %v2759_v25  ;;  %v923_v28 = vld [vmem:[%s3414_s3 + $0x2e8] sm:$0xff] }
  0x30   : > { %1045 = vmatprep.mubr.f32.mxu0 %v355_v49  ;;  %1989 = vmatpush3.msra.mxu1 %v862_v7  ;;  %v908_v22 = vld [vmem:[%s3414_s3 + $0x270] sm:$0xff]  ;;  %387 = vst [vmem:[#allocation2 + $0x61] sm:$0xff] %v2746_v21  ;;  %v2765_v27 = vld [vmem:[%s2627_s25 + $0x40] sm:$0xff]  ;;  %v955_v29 = vld [vmem:[%s3414_s3 + $0x3e8] sm:$0xff] }
  0x31   : > { %1190 = vmatprep.mubr.f32.mxu1 %v493_v8  ;;  %1046 = vmatmul.mubr.f32.vlgmr.msra.gmra.mxu0 %v397_v9  ;;  %v940_v23 = vld [vmem:[%s3414_s3 + $0x370] sm:$0xff]  ;;  %389 = vst [vmem:[#allocation2 + $0x79] sm:$0xff] %v2765_v27  ;;  %v907_v30 = vld [vmem:[%s3414_s3 + $0x268] sm:$0xff]  ;;  %v2783_v32 = vld [vmem:[#allocation2 + $0x38] sm:$0xff] }
  0x32   : > { %1191 = vmatmul.mubr.f32.vlgmr.msra.gmra.mxu1 %v461_v10  ;;  %2038 = vmatprep.subr.mxu0 %v925_v11  ;;  %v2756_v24 = vld [vmem:[#allocation2 + $0x30] sm:$0xff]  ;;  %v939_v31 = vld [vmem:[%s3414_s3 + $0x368] sm:$0xff]  ;;  %v922_v35 = vld [vmem:[%s3414_s3 + $0x2e0] sm:$0xff] }
  0x33   : > { %2118 = vmatprep.subr.mxu1 %v957_v12  ;;  %2039 = vmatpush3.msra.mxu0 %v909_v13  ;;  %v2786_v33 = vld [vmem:[%s2627_s25 + $0x48] sm:$0xff]  ;;  %v954_v36 = vld [vmem:[%s3414_s3 + $0x3e0] sm:$0xff]  ;;  %v2798_v37 = vld [vmem:[%s2627_s25 + $0x50] sm:$0xff] }
  0x34   : > { %2119 = vmatpush3.msra.mxu1 %v941_v14  ;;  %1050 = vmatprep.mubr.f32.mxu0 %v2662_v53  ;;  %v2788_v34 = vld [vmem:[#allocation2 + $0x22] sm:$0xff]  ;;  %390 = vst [vmem:[#allocation2 + $0x81] sm:$0xff] %v2786_v33  ;;  %391 = vst [vmem:[#allocation2 + $0x91] sm:$0xff] %v2798_v37  ;;  %v2812_v41 = vld [vmem:[#allocation2 + $0x32] sm:$0xff] }
  0x35   : > { %1195 = vmatprep.mubr.f32.mxu1 %v494_v16  ;;  %1051 = vmatmul.mubr.f32.gmra.mxu0 %v398_v17  ;;  %v906_v38 = vld [vmem:[%s3414_s3 + $0x260] sm:$0xff]  ;;  %v2810_v40 = vld [vmem:[#allocation2 + $0x48] sm:$0xff]  ;;  %v2815_v42 = vld [vmem:[%s2627_s25 + $0x58] sm:$0xff] }
  0x36   : > { %1196 = vmatmul.mubr.f32.gmra.mxu1 %v462_v18  ;;  %2040 = vmatprep.subr.mxu0 %v924_v19  ;;  %v938_v39 = vld [vmem:[%s3414_s3 + $0x360] sm:$0xff]  ;;  %v921_v43 = vld [vmem:[%s3414_s3 + $0x2d8] sm:$0xff]  ;;  %392 = vst [vmem:[#allocation2 + $0x99] sm:$0xff] %v2815_v42  ;;  %v2837_v48 = vld [vmem:[#allocation2 + $0x50] sm:$0xff] }
  0x37   : > { %2120 = vmatprep.subr.mxu1 %v956_v20  ;;  %2041 = vmatpush3.msra.mxu0 %v908_v22  ;;  %v953_v44 = vld [vmem:[%s3414_s3 + $0x3d8] sm:$0xff]  ;;  %v2833_v47 = vld [vmem:[%s2627_s25 + $0x60] sm:$0xff]  ;;  %v2843_v51 = vld [vmem:[%s2627_s25 + $0x68] sm:$0xff] }
  0x38   : > { %2121 = vmatpush3.msra.mxu1 %v940_v23  ;;  %1055 = vmatprep.mubr.f32.mxu0 %v2653_v50  ;;  %v905_v45 = vld [vmem:[%s3414_s3 + $0x258] sm:$0xff]  ;;  %393 = vst [vmem:[#allocation2 + $0xa9] sm:$0xff] %v2833_v47  ;;  %v920_v52 = vld [vmem:[%s3414_s3 + $0x2d0] sm:$0xff]  ;;  %394 = vst [vmem:[#allocation2 + $0xb1] sm:$0xff] %v2843_v51 }
  0x39   : > { %1200 = vmatprep.mubr.f32.mxu1 %v2756_v24  ;;  %1056 = vmatmul.mubr.f32.gmra.mxu0 %v493_v8  ;;  %v937_v46 = vld [vmem:[%s3414_s3 + $0x358] sm:$0xff]  ;;  %v952_v53 = vld [vmem:[%s3414_s3 + $0x3d0] sm:$0xff]  ;;  %v2865_v58 = vld [vmem:[#allocation2 + $0x60] sm:$0xff] }
  0x3a   : > { %1201 = vmatmul.mubr.f32.gmra.mxu1 %v2761_v26  ;;  %2042 = vmatprep.subr.mxu0 %v923_v28  ;;  %v2840_v49 = vld [vmem:[#allocation2 + $0x3a] sm:$0xff]  ;;  %v904_v54 = vld [vmem:[%s3414_s3 + $0x250] sm:$0xff]  ;;  %v919_v60 = vld [vmem:[%s3414_s3 + $0x2c8] sm:$0xff] }
  0x3b   : > { %2122 = vmatprep.subr.mxu1 %v955_v29  ;;  %2043 = vmatpush3.msra.mxu0 %v907_v30  ;;  %v936_v55 = vld [vmem:[%s3414_s3 + $0x350] sm:$0xff]  ;;  %v951_v62 = vld [vmem:[%s3414_s3 + $0x3c8] sm:$0xff]  ;;  %v2877_v63 = vld [vmem:[%s2627_s25 + $0x78] sm:$0xff] }
  0x3c   : > { %2123 = vmatpush3.msra.mxu1 %v939_v31  ;;  %1060 = vmatprep.mubr.f32.mxu0 %v2672_v56  ;;  %v2861_v57 = vld [vmem:[%s2627_s25 + $0x70] sm:$0xff]  ;;  %v903_v0 = vld [vmem:[%s3414_s3 + $0x248] sm:$0xff]  ;;  %396 = vst [vmem:[#allocation2 + $0xc9] sm:$0xff] %v2877_v63  ;;  %v918_v6 = vld [vmem:[%s3414_s3 + $0x2c0] sm:$0xff] }
  0x3d   : > { %1205 = vmatprep.mubr.f32.mxu1 %v2783_v32  ;;  %1061 = vmatmul.mubr.f32.gmra.mxu0 %v494_v16  ;;  %395 = vst [vmem:[#allocation2 + $0xc1] sm:$0xff] %v2861_v57  ;;  %v2868_v59 = vld [vmem:[#allocation2 + $0x4a] sm:$0xff]  ;;  %v2892_v4 = vld [vmem:[#allocation2 + $0x52] sm:$0xff]  ;;  %v950_v7 = vld [vmem:[%s3414_s3 + $0x3c0] sm:$0xff] }
  0x3e   : > { %1206 = vmatmul.mubr.f32.gmra.mxu1 %v2788_v34  ;;  %2044 = vmatprep.subr.mxu0 %v922_v35  ;;  %v935_v1 = vld [vmem:[%s3414_s3 + $0x348] sm:$0xff]  ;;  %v902_v8 = vld [vmem:[%s3414_s3 + $0x240] sm:$0xff]  ;;  %v2910_v10 = vld [vmem:[#allocation2 + $0x78] sm:$0xff] }
  0x3f   : > { %2124 = vmatprep.subr.mxu1 %v954_v36  ;;  %2045 = vmatpush3.msra.mxu0 %v906_v38  ;;  %v2890_v3 = vld [vmem:[#allocation2 + $0x68] sm:$0xff]  ;;  %v934_v9 = vld [vmem:[%s3414_s3 + $0x340] sm:$0xff]  ;;  %v917_v12 = vld [vmem:[%s3414_s3 + $0x2b8] sm:$0xff] }
  0x40   : > { %2125 = vmatpush3.msra.mxu1 %v938_v39  ;;  %1065 = vmatprep.mubr.f32.mxu0 %v2688_v61  ;;  %v2917_v11 = vld [vmem:[#allocation2 + $0x62] sm:$0xff]  ;;  %v949_v13 = vld [vmem:[%s3414_s3 + $0x3b8] sm:$0xff]  ;;  %v2942_v20 = vld [vmem:[#allocation2 + $0x6a] sm:$0xff] }
  0x41   : > { %1210 = vmatprep.mubr.f32.mxu1 %v2810_v40  ;;  %1066 = vmatmul.mubr.f32.gmra.mxu0 %v2756_v24  ;;  %v901_v14 = vld [vmem:[%s3414_s3 + $0x238] sm:$0xff]  ;;  %v2933_v17 = vld [vmem:[%s324_s13] sm:$0xff]  ;;  %v2940_v19 = vld [vmem:[%s324_s13 + $0x8] sm:$0xff] }
  0x42   : > { %1211 = vmatmul.mubr.f32.gmra.mxu1 %v2812_v41  ;;  %2046 = vmatprep.subr.mxu0 %v921_v43  ;;  %v933_v16 = vld [vmem:[%s3414_s3 + $0x338] sm:$0xff]  ;;  %v2937_v18 = vld [vmem:[#allocation2 + $0x80] sm:$0xff]  ;;  %362 = vst [vmem:[#allocation2 + $0xd9] sm:$0xff] %v2933_v17  ;;  %363 = vst [vmem:[#allocation2 + $0xe1] sm:$0xff] %v2940_v19 }
  0x43   : > { %2126 = vmatprep.subr.mxu1 %v953_v44  ;;  %2047 = vmatpush3.msra.mxu0 %v905_v45  ;;  %v916_v22 = vld [vmem:[%s3414_s3 + $0x2b0] sm:$0xff]  ;;  %v2963_v31 = vld [vmem:[#allocation2 + $0x7a] sm:$0xff]  ;;  %v915_v35 = vld [vmem:[%s3414_s3 + $0x2a8] sm:$0xff] }
  0x44   : > { %2127 = vmatpush3.msra.mxu1 %v937_v46  ;;  %1070 = vmatprep.mubr.f32.mxu0 %v2704_v2  ;;  %v948_v23 = vld [vmem:[%s3414_s3 + $0x3b0] sm:$0xff]  ;;  %v947_v36 = vld [vmem:[%s3414_s3 + $0x3a8] sm:$0xff]  ;;  %v2981_v43 = vld [vmem:[#allocation2 + $0x98] sm:$0xff] }
  0x45   : > { %1215 = vmatprep.mubr.f32.mxu1 %v2837_v48  ;;  %1071 = vmatmul.mubr.f32.gmra.mxu0 %v2783_v32  ;;  %v900_v28 = vld [vmem:[%s3414_s3 + $0x230] sm:$0xff]  ;;  %v899_v38 = vld [vmem:[%s3414_s3 + $0x228] sm:$0xff]  ;;  %v914_v45 = vld [vmem:[%s3414_s3 + $0x2a0] sm:$0xff] }
  0x46   : > { %1216 = vmatmul.mubr.f32.gmra.mxu1 %v2840_v49  ;;  %2048 = vmatprep.subr.mxu0 %v920_v52  ;;  %v932_v29 = vld [vmem:[%s3414_s3 + $0x330] sm:$0xff]  ;;  %v931_v39 = vld [vmem:[%s3414_s3 + $0x328] sm:$0xff]  ;;  %v946_v46 = vld [vmem:[%s3414_s3 + $0x3a0] sm:$0xff] }
  0x47   : > { %2128 = vmatprep.subr.mxu1 %v952_v53  ;;  %2049 = vmatpush3.msra.mxu0 %v904_v54  ;;  %v2961_v30 = vld [vmem:[#allocation2 + $0x90] sm:$0xff]  ;;  %v2983_v44 = vld [vmem:[#allocation2 + $0x82] sm:$0xff] }
  0x48   : > { %2129 = vmatpush3.msra.mxu1 %v936_v55  ;;  %1075 = vmatprep.mubr.f32.mxu0 %v2714_v5  ;;  %v898_v52 = vld [vmem:[%s3414_s3 + $0x220] sm:$0xff]  ;;  %v3001_v54 = vld [vmem:[#allocation2 + $0xa8] sm:$0xff]  ;;  %v3003_v55 = vld [vmem:[#allocation2 + $0x92] sm:$0xff] }
  0x49   : > { %1220 = vmatprep.mubr.f32.mxu1 %v2865_v58  ;;  %1076 = vmatmul.mubr.f32.gmra.mxu0 %v2810_v40  ;;  %v930_v53 = vld [vmem:[%s3414_s3 + $0x320] sm:$0xff] }
  0x4a   : > { %1221 = vmatmul.mubr.f32.gmra.mxu1 %v2868_v59  ;;  %2050 = vmatprep.subr.mxu0 %v919_v60  ;;  %v913_v60 = vld [vmem:[%s3414_s3 + $0x298] sm:$0xff] }
  0x4b   : > { %2130 = vmatprep.subr.mxu1 %v951_v62  ;;  %2051 = vmatpush3.msra.mxu0 %v903_v0  ;;  %v945_v62 = vld [vmem:[%s3414_s3 + $0x398] sm:$0xff] }
  0x4c   : > { %2131 = vmatpush3.msra.mxu1 %v935_v1  ;;  %1080 = vmatprep.mubr.f32.mxu0 %v2736_v15  ;;  %v897_v0 = vld [vmem:[%s3414_s3 + $0x218] sm:$0xff] }
  0x4d   : > { %1225 = vmatprep.mubr.f32.mxu1 %v2890_v3  ;;  %1081 = vmatmul.mubr.f32.gmra.mxu0 %v2837_v48  ;;  %v929_v1 = vld [vmem:[%s3414_s3 + $0x318] sm:$0xff] }
  0x4e   : > { %1226 = vmatmul.mubr.f32.gmra.mxu1 %v2892_v4  ;;  %2052 = vmatprep.subr.mxu0 %v918_v6  ;;  %v3021_v6 = vld [vmem:[#allocation2 + $0xb0] sm:$0xff] }
  0x4f   : > { %2132 = vmatprep.subr.mxu1 %v950_v7  ;;  %2053 = vmatpush3.msra.mxu0 %v902_v8  ;;  %v3023_v7 = vld [vmem:[#allocation2 + $0x9a] sm:$0xff]  ;;  %v912_v8 = vld [vmem:[%s3414_s3 + $0x290] sm:$0xff] }
  0x50   : > { %2133 = vmatpush3.msra.mxu1 %v934_v9  ;;  %1085 = vmatprep.mubr.f32.mxu0 %v2746_v21  ;;  %v944_v9 = vld [vmem:[%s3414_s3 + $0x390] sm:$0xff] }
  0x51   : > { %1230 = vmatprep.mubr.f32.mxu1 %v2910_v10  ;;  %1086 = vmatmul.mubr.f32.gmra.mxu0 %v2865_v58 }
  0x52   : > { %1231 = vmatmul.mubr.f32.gmra.mxu1 %v2917_v11  ;;  %2054 = vmatprep.subr.mxu0 %v917_v12  ;;  %v896_v12 = vld [vmem:[%s3414_s3 + $0x210] sm:$0xff] }
  0x53   : > { %2134 = vmatprep.subr.mxu1 %v949_v13  ;;  %2055 = vmatpush3.msra.mxu0 %v901_v14  ;;  %v928_v13 = vld [vmem:[%s3414_s3 + $0x310] sm:$0xff]  ;;  %v3041_v14 = vld [vmem:[#allocation2 + $0xc0] sm:$0xff] }
  0x54   : > { %2135 = vmatpush3.msra.mxu1 %v933_v16  ;;  %1090 = vmatprep.mubr.f32.mxu0 %v2759_v25  ;;  %v3043_v16 = vld [vmem:[#allocation2 + $0xaa] sm:$0xff] }
  0x55   : > { %1235 = vmatprep.mubr.f32.mxu1 %v2937_v18  ;;  %1091 = vmatmul.mubr.f32.gmra.mxu0 %v2890_v3 }
  0x56   : > { %1236 = vmatmul.mubr.f32.gmra.mxu1 %v2942_v20  ;;  %2056 = vmatprep.subr.mxu0 %v916_v22  ;;  %v911_v22 = vld [vmem:[%s3414_s3 + $0x288] sm:$0xff] }
  0x57   : > { %2136 = vmatprep.subr.mxu1 %v948_v23  ;;  %2057 = vmatpush3.msra.mxu0 %v900_v28  ;;  %v943_v23 = vld [vmem:[%s3414_s3 + $0x388] sm:$0xff] }
  0x58   : > { %2137 = vmatpush3.msra.mxu1 %v932_v29  ;;  %1095 = vmatprep.mubr.f32.mxu0 %v2765_v27  ;;  %v895_v28 = vld [vmem:[%s3414_s3 + $0x208] sm:$0xff] }
  0x59   : > { %1240 = vmatprep.mubr.f32.mxu1 %v2961_v30  ;;  %1096 = vmatmul.mubr.f32.gmra.mxu0 %v2910_v10  ;;  %v927_v29 = vld [vmem:[%s3414_s3 + $0x308] sm:$0xff] }
  0x5a   : > { %1241 = vmatmul.mubr.f32.gmra.mxu1 %v2963_v31  ;;  %2058 = vmatprep.subr.mxu0 %v915_v35  ;;  %v3061_v35 = vld [vmem:[#allocation2 + $0xc8] sm:$0xff] }
  0x5b   : > { %2138 = vmatprep.subr.mxu1 %v947_v36  ;;  %2059 = vmatpush3.msra.mxu0 %v899_v38  ;;  %v3063_v36 = vld [vmem:[#allocation2 + $0xb2] sm:$0xff]  ;;  %v910_v38 = vld [vmem:[%s3414_s3 + $0x280] sm:$0xff] }
  0x5c   : > { %2139 = vmatpush3.msra.mxu1 %v931_v39  ;;  %1100 = vmatprep.mubr.f32.mxu0 %v2786_v33  ;;  %v942_v39 = vld [vmem:[%s3414_s3 + $0x380] sm:$0xff] }
  0x5d   : > { %1245 = vmatprep.mubr.f32.mxu1 %v2981_v43  ;;  %1101 = vmatmul.mubr.f32.gmra.mxu0 %v2937_v18 }
  0x5e   : > { %1246 = vmatmul.mubr.f32.gmra.mxu1 %v2983_v44  ;;  %2060 = vmatprep.subr.mxu0 %v914_v45  ;;  %v894_v45 = vld [vmem:[%s3414_s3 + $0x200] sm:$0xff] }
  0x5f   : > { %2140 = vmatprep.subr.mxu1 %v946_v46  ;;  %2061 = vmatpush3.msra.mxu0 %v898_v52  ;;  %v926_v46 = vld [vmem:[%s3414_s3 + $0x300] sm:$0xff]  ;;  %v973_v52 = vld [vmem:[%s3414_s3 + $0x478] sm:$0xff] }
  0x60   : > { %2141 = vmatpush3.msra.mxu1 %v930_v53  ;;  %1105 = vmatprep.mubr.f32.mxu0 %v2798_v37  ;;  %v972_v53 = vld [vmem:[%s3414_s3 + $0x470] sm:$0xff] }
  0x61   : > { %1250 = vmatprep.mubr.f32.mxu1 %v3001_v54  ;;  %1106 = vmatmul.mubr.f32.gmra.mxu0 %v2961_v30 }
  0x62   : > { %1251 = vmatmul.mubr.f32.gmra.mxu1 %v3003_v55  ;;  %2062 = vmatprep.subr.mxu0 %v913_v60 }
  0x63   : > { %2142 = vmatprep.subr.mxu1 %v945_v62  ;;  %2063 = vmatpush3.msra.mxu0 %v897_v0 }
  0x64   : > { %2143 = vmatpush3.msra.mxu1 %v929_v1  ;;  %1110 = vmatprep.mubr.f32.mxu0 %v2815_v42 }
  0x65   : > { %1255 = vmatprep.mubr.f32.mxu1 %v3021_v6  ;;  %1111 = vmatmul.mubr.f32.gmra.mxu0 %v2981_v43 }
  0x66   : > { %1256 = vmatmul.mubr.f32.gmra.mxu1 %v3023_v7  ;;  %2064 = vmatprep.subr.mxu0 %v912_v8 }
  0x67   : > { %2144 = vmatprep.subr.mxu1 %v944_v9  ;;  %2065 = vmatpush3.msra.mxu0 %v896_v12 }
  0x68   : > { %2145 = vmatpush3.msra.mxu1 %v928_v13  ;;  %1115 = vmatprep.mubr.f32.mxu0 %v2833_v47 }
  0x69   : > { %1260 = vmatprep.mubr.f32.mxu1 %v3041_v14  ;;  %1116 = vmatmul.mubr.f32.gmra.mxu0 %v3001_v54 }
  0x6a   : > { %1261 = vmatmul.mubr.f32.gmra.mxu1 %v3043_v16  ;;  %2066 = vmatprep.subr.mxu0 %v911_v22 }
  0x6b   : > { %2146 = vmatprep.subr.mxu1 %v943_v23  ;;  %2067 = vmatpush3.msra.mxu0 %v895_v28 }
  0x6c   : > { %2147 = vmatpush3.msra.mxu1 %v927_v29  ;;  %1120 = vmatprep.mubr.f32.mxu0 %v2843_v51 }
  0x6d   : > { %1265 = vmatprep.mubr.f32.mxu1 %v3061_v35  ;;  %1121 = vmatmul.mubr.f32.gmra.mxu0 %v3021_v6 }
  0x6e   : > { %1266 = vmatmul.mubr.f32.gmra.mxu1 %v3063_v36  ;;  %2068 = vmatprep.subr.mxu0 %v910_v38 }
  0x6f   : > { %2148 = vmatprep.subr.mxu1 %v942_v39  ;;  %2069 = vmatpush3.msra.mxu0 %v894_v45 }
  0x70   : > { %2149 = vmatpush3.msra.mxu1 %v926_v46  ;;  %1335 = vmatprep.mubr.f32.mxu0 %v2761_v26  ;;  %v962_v26 = vld [vmem:[%s3414_s3 + $0x420] sm:$0xff] }
  0x71   : > { %1480 = vmatprep.mubr.f32.mxu1 %v2688_v61  ;;  %1336 = vmatmul.mubr.f32.vlgmr.msra.gmra.mxu0 %v2653_v50  ;;  %v971_v50 = vld [vmem:[%s3414_s3 + $0x468] sm:$0xff] }
  0x72   : > { %1481 = vmatmul.mubr.f32.vlgmr.msra.gmra.mxu1 %v2756_v24  ;;  %2230 = vmatprep.subr.mxu0 %v973_v52  ;;  %v964_v24 = vld [vmem:[%s3414_s3 + $0x430] sm:$0xff] }
  0x73   : > { %2286 = vmatprep.subr.mxu1 %v973_v52  ;;  %2231 = vmatpush3.msra.mxu0 %v973_v52 }
  0x74   : > { %2302 = vmatpush3.msra.mxu1 %v973_v52  ;;  %1340 = vmatprep.mubr.f32.mxu0 %v2788_v34  ;;  %v604_v34 = vld [vmem:[#allocation2 + $0xd8] sm:$0xff] }
  0x75   : > { %1485 = vmatprep.mubr.f32.mxu1 %v2704_v2  ;;  %1341 = vmatmul.mubr.f32.gmra.mxu0 %v2672_v56  ;;  %v970_v56 = vld [vmem:[%s3414_s3 + $0x460] sm:$0xff] }
  0x76   : > { %1486 = vmatmul.mubr.f32.gmra.mxu1 %v2783_v32  ;;  %2232 = vmatprep.subr.mxu0 %v972_v53  ;;  %v960_v32 = vld [vmem:[%s3414_s3 + $0x410] sm:$0xff] }
  0x77   : > { %2287 = vmatprep.subr.mxu1 %v972_v53  ;;  %2233 = vmatpush3.msra.mxu0 %v972_v53 }
  0x78   : > { %2303 = vmatpush3.msra.mxu1 %v972_v53  ;;  %1345 = vmatprep.mubr.f32.mxu0 %v2812_v41 }
  0x79   : > { %1490 = vmatprep.mubr.f32.mxu1 %v2714_v5  ;;  %1346 = vmatmul.mubr.f32.gmra.mxu0 %v2688_v61  ;;  %v969_v61 = vld [vmem:[%s3414_s3 + $0x458] sm:$0xff] }
  0x7a   : > { %1491 = vmatmul.mubr.f32.gmra.mxu1 %v2810_v40  ;;  %2234 = vmatprep.subr.mxu0 %v971_v50  ;;  %v572_v40 = vld [vmem:[#allocation2 + $0xca] sm:$0xff] }
  0x7b   : > { %2288 = vmatprep.subr.mxu1 %v971_v50  ;;  %2235 = vmatpush3.msra.mxu0 %v971_v50 }
  0x7c   : > { %2304 = vmatpush3.msra.mxu1 %v971_v50  ;;  %1350 = vmatprep.mubr.f32.mxu0 %v2840_v49 }
  0x7d   : > { %1495 = vmatprep.mubr.f32.mxu1 %v2736_v15  ;;  %1351 = vmatmul.mubr.f32.gmra.mxu0 %v2704_v2  ;;  %v968_v2 = vld [vmem:[%s3414_s3 + $0x450] sm:$0xff] }
  0x7e   : > { %1496 = vmatmul.mubr.f32.gmra.mxu1 %v2837_v48  ;;  %2236 = vmatprep.subr.mxu0 %v970_v56  ;;  %v668_v48 = vld [vmem:[#allocation2 + $0xda] sm:$0xff] }
  0x7f   : > { %2289 = vmatprep.subr.mxu1 %v970_v56  ;;  %2237 = vmatpush3.msra.mxu0 %v970_v56 }
  0x80   : > { %2305 = vmatpush3.msra.mxu1 %v970_v56  ;;  %1355 = vmatprep.mubr.f32.mxu0 %v2868_v59 }
  0x81   : > { %1500 = vmatprep.mubr.f32.mxu1 %v2746_v21  ;;  %1356 = vmatmul.mubr.f32.gmra.mxu0 %v2714_v5  ;;  %v967_v5 = vld [vmem:[%s3414_s3 + $0x448] sm:$0xff] }
  0x82   : > { %1501 = vmatmul.mubr.f32.gmra.mxu1 %v2865_v58  ;;  %2238 = vmatprep.subr.mxu0 %v969_v61 }
  0x83   : > { %2290 = vmatprep.subr.mxu1 %v969_v61  ;;  %2239 = vmatpush3.msra.mxu0 %v969_v61 }
  0x84   : > { %2306 = vmatpush3.msra.mxu1 %v969_v61  ;;  %1360 = vmatprep.mubr.f32.mxu0 %v2892_v4 }
  0x85   : > { %1505 = vmatprep.mubr.f32.mxu1 %v2759_v25  ;;  %1361 = vmatmul.mubr.f32.gmra.mxu0 %v2736_v15  ;;  %v966_v15 = vld [vmem:[%s3414_s3 + $0x440] sm:$0xff] }
  0x86   : > { %1506 = vmatmul.mubr.f32.gmra.mxu1 %v2890_v3  ;;  %2240 = vmatprep.subr.mxu0 %v968_v2 }
  0x87   : > { %2291 = vmatprep.subr.mxu1 %v968_v2  ;;  %2241 = vmatpush3.msra.mxu0 %v968_v2 }
  0x88   : > { %2307 = vmatpush3.msra.mxu1 %v968_v2  ;;  %1365 = vmatprep.mubr.f32.mxu0 %v2917_v11 }
  0x89   : > { %1510 = vmatprep.mubr.f32.mxu1 %v2765_v27  ;;  %1366 = vmatmul.mubr.f32.gmra.mxu0 %v2746_v21  ;;  %v965_v21 = vld [vmem:[%s3414_s3 + $0x438] sm:$0xff] }
  0x8a   : > { %1511 = vmatmul.mubr.f32.gmra.mxu1 %v2910_v10  ;;  %2242 = vmatprep.subr.mxu0 %v967_v5 }
  0x8b   : > { %2292 = vmatprep.subr.mxu1 %v967_v5  ;;  %2243 = vmatpush3.msra.mxu0 %v967_v5 }
  0x8c   : > { %2308 = vmatpush3.msra.mxu1 %v967_v5  ;;  %1370 = vmatprep.mubr.f32.mxu0 %v2942_v20 }
  0x8d   : > { %1515 = vmatprep.mubr.f32.mxu1 %v2786_v33  ;;  %1371 = vmatmul.mubr.f32.gmra.mxu0 %v2759_v25  ;;  %v963_v25 = vld [vmem:[%s3414_s3 + $0x428] sm:$0xff] }
  0x8e   : > { %1516 = vmatmul.mubr.f32.gmra.mxu1 %v2937_v18  ;;  %2244 = vmatprep.subr.mxu0 %v966_v15 }
  0x8f   : > { %2293 = vmatprep.subr.mxu1 %v966_v15  ;;  %2245 = vmatpush3.msra.mxu0 %v966_v15 }
  0x90   : > { %2309 = vmatpush3.msra.mxu1 %v966_v15  ;;  %1375 = vmatprep.mubr.f32.mxu0 %v2963_v31 }
  0x91   : > { %1520 = vmatprep.mubr.f32.mxu1 %v2798_v37  ;;  %1376 = vmatmul.mubr.f32.gmra.mxu0 %v2765_v27  ;;  %v961_v27 = vld [vmem:[%s3414_s3 + $0x418] sm:$0xff] }
  0x92   : > { %1521 = vmatmul.mubr.f32.gmra.mxu1 %v2961_v30  ;;  %2246 = vmatprep.subr.mxu0 %v965_v21 }
  0x93   : > { %2294 = vmatprep.subr.mxu1 %v965_v21  ;;  %2247 = vmatpush3.msra.mxu0 %v965_v21 }
  0x94   : > { %2310 = vmatpush3.msra.mxu1 %v965_v21  ;;  %1380 = vmatprep.mubr.f32.mxu0 %v2983_v44 }
  0x95   : > { %1525 = vmatprep.mubr.f32.mxu1 %v2815_v42  ;;  %1381 = vmatmul.mubr.f32.gmra.mxu0 %v2786_v33  ;;  %v571_v33 = vld [vmem:[#allocation2 + $0xc2] sm:$0xff] }
  0x96   : > { %1526 = vmatmul.mubr.f32.gmra.mxu1 %v2981_v43  ;;  %2248 = vmatprep.subr.mxu0 %v964_v24 }
  0x97   : > { %2295 = vmatprep.subr.mxu1 %v964_v24  ;;  %2249 = vmatpush3.msra.mxu0 %v964_v24 }
  0x98   : > { %2311 = vmatpush3.msra.mxu1 %v964_v24  ;;  %1385 = vmatprep.mubr.f32.mxu0 %v3003_v55 }
  0x99   : > { %1530 = vmatprep.mubr.f32.mxu1 %v2833_v47  ;;  %1386 = vmatmul.mubr.f32.gmra.mxu0 %v2798_v37  ;;  %v959_v37 = vld [vmem:[%s3414_s3 + $0x408] sm:$0xff] }
  0x9a   : > { %1531 = vmatmul.mubr.f32.gmra.mxu1 %v3001_v54  ;;  %2250 = vmatprep.subr.mxu0 %v963_v25 }
  0x9b   : > { %2296 = vmatprep.subr.mxu1 %v963_v25  ;;  %2251 = vmatpush3.msra.mxu0 %v963_v25 }
  0x9c   : > { %2312 = vmatpush3.msra.mxu1 %v963_v25  ;;  %1390 = vmatprep.mubr.f32.mxu0 %v3023_v7 }
  0x9d   : > { %1535 = vmatprep.mubr.f32.mxu1 %v2843_v51  ;;  %1391 = vmatmul.mubr.f32.gmra.mxu0 %v2815_v42  ;;  %v605_v42 = vld [vmem:[#allocation2 + $0xe0] sm:$0xff] }
  0x9e   : > { %1536 = vmatmul.mubr.f32.gmra.mxu1 %v3021_v6  ;;  %2252 = vmatprep.subr.mxu0 %v962_v26 }
  0x9f   : > { %2297 = vmatprep.subr.mxu1 %v962_v26  ;;  %2253 = vmatpush3.msra.mxu0 %v962_v26 }
  0xa0   : > { %2313 = vmatpush3.msra.mxu1 %v962_v26  ;;  %1395 = vmatprep.mubr.f32.mxu0 %v3043_v16 }
  0xa1   : > { %1540 = vmatprep.mubr.f32.mxu1 %v2861_v57  ;;  %1396 = vmatmul.mubr.f32.gmra.mxu0 %v2833_v47  ;;  %v958_v47 = vld [vmem:[%s3414_s3 + $0x400] sm:$0xff] }
  0xa2   : > { %1541 = vmatmul.mubr.f32.gmra.mxu1 %v3041_v14  ;;  %2254 = vmatprep.subr.mxu0 %v961_v27 }
  0xa3   : > { %2298 = vmatprep.subr.mxu1 %v961_v27  ;;  %2255 = vmatpush3.msra.mxu0 %v961_v27 }
  0xa4   : > { %2314 = vmatpush3.msra.mxu1 %v961_v27  ;;  %1400 = vmatprep.mubr.f32.mxu0 %v3063_v36 }
  0xa5   : > { %1545 = vmatprep.mubr.f32.mxu1 %v2877_v63  ;;  %1401 = vmatmul.mubr.f32.gmra.mxu0 %v2843_v51 }
  0xa6   : > { %1546 = vmatmul.mubr.f32.gmra.mxu1 %v3061_v35  ;;  %2256 = vmatprep.subr.mxu0 %v960_v32 }
  0xa7   : > { %2299 = vmatprep.subr.mxu1 %v960_v32  ;;  %2257 = vmatpush3.msra.mxu0 %v960_v32 }
  0xa8   : > { %2315 = vmatpush3.msra.mxu1 %v960_v32  ;;  %1405 = vmatprep.mubr.f32.mxu0 %v571_v33 }
  0xa9   : > { %1550 = vmatprep.mubr.f32.mxu1 %v2933_v17  ;;  %1406 = vmatmul.mubr.f32.gmra.mxu0 %v2861_v57  ;;  %v3204_v57 = vld [vmem:[%s3415_s4] ss:$0 sm:$0xff] }
  0xaa   : > { %1551 = vmatmul.mubr.f32.gmra.mxu1 %v604_v34  ;;  %2258 = vmatprep.subr.mxu0 %v959_v37 }
  0xab   : > { %2300 = vmatprep.subr.mxu1 %v959_v37  ;;  %2259 = vmatpush3.msra.mxu0 %v959_v37 }
  0xac   : > { %2316 = vmatpush3.msra.mxu1 %v959_v37  ;;  %1410 = vmatprep.mubr.f32.mxu0 %v572_v40 }
  0xad   : > { %1555 = vmatprep.mubr.f32.mxu1 %v2940_v19  ;;  %1411 = vmatmul.mubr.f32.gmra.mxu0 %v2877_v63 }
  0xae   : > { %1556 = vmatmul.mubr.f32.gmra.mxu1 %v605_v42  ;;  %2260 = vmatprep.subr.mxu0 %v958_v47 }
  0xaf   : > { %2301 = vmatprep.subr.mxu1 %v958_v47  ;;  %2261 = vmatpush3.msra.mxu0 %v958_v47 }
  0xb0   : > { %2317 = vmatpush3.msra.mxu1 %v958_v47  ;;  %2262 = vmatprep.mubr.f32.mxu0 %v2812_v41  ;;  %v669_v41 = vld [vmem:[#allocation2 + $0xe2] sm:$0xff] }
  0xb1   : > { %2274 = vmatprep.mubr.f32.mxu1 %v3003_v55  ;;  %2263 = vmatmul.mubr.f32.vlgmr.msra.gmra.mxu0 %v2840_v49 }
  0xb2   : > { %2275 = vmatmul.mubr.f32.vlgmr.msra.gmra.mxu1 %v3023_v7  ;;  %2265 = vmatprep.mubr.f32.mxu0 %v2868_v59 }
  0xb3   : > { %2277 = vmatprep.mubr.f32.mxu1 %v3043_v16 }
  0xb5   : > { %2266 = vmatmul.mubr.f32.gmra.mxu0 %v2892_v4 }
  0xb6   : > { %2278 = vmatmul.mubr.f32.gmra.mxu1 %v3063_v36  ;;  %2268 = vmatprep.mubr.f32.mxu0 %v2917_v11 }
  0xb7   : > { %2280 = vmatprep.mubr.f32.mxu1 %v571_v33 }
  0xb9   : > { %2269 = vmatmul.mubr.f32.gmra.mxu0 %v2942_v20 }
  0xba   : > { %2281 = vmatmul.mubr.f32.gmra.mxu1 %v572_v40  ;;  %2271 = vmatprep.mubr.f32.mxu0 %v2963_v31 }
  0xbb   : > { %2283 = vmatprep.mubr.f32.mxu1 %v668_v48 }
  0xbd   : > { %2272 = vmatmul.mubr.f32.gmra.mxu0 %v2983_v44 }
  0xbe   : > { %2284 = vmatmul.mubr.f32.gmra.mxu1 %v669_v41 }
  0xf1   : > { %v1910_v49 = vpop.f32.mrf.mxu0 }
  0xf2   : > { %v1990_v51 = vpop.f32.mrf.mxu1 }
  0xf3   : > { %v1911_v58 = vpop.f32.mrf.mxu0 }
  0xf4   : > { %v1991_v59 = vpop.f32.mrf.mxu1  ;;  %v1912_v63 = vadd.f32 %v1911_v58, %v1910_v49 }
  0xf5   : > { %v1992_v3 = vadd.f32 %v1991_v59, %v1990_v51  ;;  %v1913_v4 = vpop.f32.mrf.mxu0 }
  0xf6   : > { %v1993_v10 = vpop.f32.mrf.mxu1  ;;  %v1048_v11 = vadd.f32 %v1912_v63, %v3204_v57 }
  0xf7   : > { %v1914_v17 = vpop.f32.mrf.mxu0 }
  0xf8   : > { %v1994_v18 = vpop.f32.mrf.mxu1  ;;  %v3207_v19 = vadd.f32 %v1992_v3, %v1048_v11  ;;  %v1915_v20 = vadd.f32 %v1914_v17, %v1913_v4 }
  0xf9   : > { %v1995_v30 = vadd.f32 %v1994_v18, %v1993_v10  ;;  %v1916_v31 = vpop.f32.mrf.mxu0 }
  0xfa   : > { %v1996_v43 = vpop.f32.mrf.mxu1  ;;  %v1053_v44 = vadd.f32 %v1915_v20, %v3204_v57 }
  0xfb   : > { %v1917_v54 = vpop.f32.mrf.mxu0 }
  0xfc   : > { %v1997_v55 = vpop.f32.mrf.mxu1  ;;  %v3210_v60 = vadd.f32 %v1995_v30, %v1053_v44  ;;  %v1918_v62 = vadd.f32 %v1917_v54, %v1916_v31 }
  0xfd   : > { %v1998_v0 = vadd.f32 %v1997_v55, %v1996_v43  ;;  %v1919_v1 = vpop.f32.mrf.mxu0 }
  0xfe   : > { %v1999_v6 = vpop.f32.mrf.mxu1  ;;  %v1058_v7 = vadd.f32 %v1918_v62, %v3204_v57 }
  0xff   : > { %v1920_v8 = vpop.f32.mrf.mxu0 }
 0x100   : > { %v2000_v9 = vpop.f32.mrf.mxu1  ;;  %v3213_v12 = vadd.f32 %v1998_v0, %v1058_v7  ;;  %v1921_v13 = vadd.f32 %v1920_v8, %v1919_v1 }
 0x101   : > { %v2001_v14 = vadd.f32 %v2000_v9, %v1999_v6  ;;  %v1922_v16 = vpop.f32.mrf.mxu0 }
 0x102   : > { %v2002_v22 = vpop.f32.mrf.mxu1  ;;  %v1063_v23 = vadd.f32 %v1921_v13, %v3204_v57 }
 0x103   : > { %v1923_v28 = vpop.f32.mrf.mxu0 }
 0x104   : > { %v2003_v29 = vpop.f32.mrf.mxu1  ;;  %v3216_v35 = vadd.f32 %v2001_v14, %v1063_v23  ;;  %v1924_v36 = vadd.f32 %v1923_v28, %v1922_v16 }
 0x105   : > { %v2004_v38 = vadd.f32 %v2003_v29, %v2002_v22  ;;  %v1925_v39 = vpop.f32.mrf.mxu0 }
 0x106   : > { %v2005_v45 = vpop.f32.mrf.mxu1  ;;  %v1068_v46 = vadd.f32 %v1924_v36, %v3204_v57 }
 0x107   : > { %v1926_v52 = vpop.f32.mrf.mxu0 }
 0x108   : > { %v2006_v53 = vpop.f32.mrf.mxu1  ;;  %v3219_v50 = vadd.f32 %v2004_v38, %v1068_v46  ;;  %v1927_v56 = vadd.f32 %v1926_v52, %v1925_v39 }
 0x109   : > { %v2007_v61 = vadd.f32 %v2006_v53, %v2005_v45  ;;  %v1928_v2 = vpop.f32.mrf.mxu0 }
 0x10a   : > { %v2008_v5 = vpop.f32.mrf.mxu1  ;;  %v1073_v15 = vadd.f32 %v1927_v56, %v3204_v57 }
 0x10b   : > { %v1929_v21 = vpop.f32.mrf.mxu0 }
 0x10c   : > { %v2009_v24 = vpop.f32.mrf.mxu1  ;;  %v3222_v25 = vadd.f32 %v2007_v61, %v1073_v15  ;;  %v1930_v26 = vadd.f32 %v1929_v21, %v1928_v2 }
 0x10d   : > { %v2010_v27 = vadd.f32 %v2009_v24, %v2008_v5  ;;  %v1931_v32 = vpop.f32.mrf.mxu0 }
 0x10e   : > { %v2011_v33 = vpop.f32.mrf.mxu1  ;;  %v1078_v34 = vadd.f32 %v1930_v26, %v3204_v57 }
 0x10f   : > { %v1932_v37 = vpop.f32.mrf.mxu0 }
 0x110   : > { %v2012_v40 = vpop.f32.mrf.mxu1  ;;  %v3225_v42 = vadd.f32 %v2010_v27, %v1078_v34  ;;  %v1933_v47 = vadd.f32 %v1932_v37, %v1931_v32 }
 0x111   : > { %v2013_v48 = vadd.f32 %v2012_v40, %v2011_v33  ;;  %v1934_v41 = vpop.f32.mrf.mxu0 }
 0x112   : > { %3418 = vst [vmem:[#allocation4_spill] sm:$0xff] %v3225_v42  ;;  %v2014_v49 = vpop.f32.mrf.mxu1  ;;  %v1083_v51 = vadd.f32 %v1933_v47, %v3204_v57 }
 0x113   : > { %v1935_v58 = vpop.f32.mrf.mxu0 }
 0x114   : > { %v2015_v59 = vpop.f32.mrf.mxu1  ;;  %v3228_v63 = vadd.f32 %v2013_v48, %v1083_v51  ;;  %v1936_v3 = vadd.f32 %v1935_v58, %v1934_v41 }
 0x115   : > { %v2016_v4 = vadd.f32 %v2015_v59, %v2014_v49  ;;  %v1937_v10 = vpop.f32.mrf.mxu0 }
 0x116   : > { %3419 = vst [vmem:[#allocation5_spill] sm:$0xff] %v3228_v63  ;;  %v2017_v11 = vpop.f32.mrf.mxu1  ;;  %v1088_v17 = vadd.f32 %v1936_v3, %v3204_v57 }
 0x117   : > { %v1938_v18 = vpop.f32.mrf.mxu0 }
 0x118   : > { %v2018_v20 = vpop.f32.mrf.mxu1  ;;  %v3231_v30 = vadd.f32 %v2016_v4, %v1088_v17  ;;  %v1939_v31 = vadd.f32 %v1938_v18, %v1937_v10 }
 0x119   : > { %v2019_v43 = vadd.f32 %v2018_v20, %v2017_v11  ;;  %v1940_v44 = vpop.f32.mrf.mxu0 }
 0x11a   : > { %v2020_v54 = vpop.f32.mrf.mxu1  ;;  %v1093_v55 = vadd.f32 %v1939_v31, %v3204_v57 }
 0x11b   : > { %v1941_v62 = vpop.f32.mrf.mxu0 }
 0x11c   : > { %v2021_v0 = vpop.f32.mrf.mxu1  ;;  %v3234_v1 = vadd.f32 %v2019_v43, %v1093_v55  ;;  %v1942_v6 = vadd.f32 %v1941_v62, %v1940_v44 }
 0x11d   : > { %v2022_v7 = vadd.f32 %v2021_v0, %v2020_v54  ;;  %v1943_v8 = vpop.f32.mrf.mxu0 }
 0x11e   : > { %v2023_v9 = vpop.f32.mrf.mxu1  ;;  %v1098_v13 = vadd.f32 %v1942_v6, %v3204_v57 }
 0x11f   : > { %v1944_v14 = vpop.f32.mrf.mxu0 }
 0x120   : > { %v2024_v16 = vpop.f32.mrf.mxu1  ;;  %v3237_v22 = vadd.f32 %v2022_v7, %v1098_v13  ;;  %v1945_v23 = vadd.f32 %v1944_v14, %v1943_v8 }
 0x121   : > { %v2025_v28 = vadd.f32 %v2024_v16, %v2023_v9  ;;  %v1946_v29 = vpop.f32.mrf.mxu0 }
 0x122   : > { %v2026_v36 = vpop.f32.mrf.mxu1  ;;  %v1103_v38 = vadd.f32 %v1945_v23, %v3204_v57 }
 0x123   : > { %v1947_v39 = vpop.f32.mrf.mxu0 }
 0x124   : > { %v2027_v45 = vpop.f32.mrf.mxu1  ;;  %v3240_v46 = vadd.f32 %v2025_v28, %v1103_v38  ;;  %v1948_v52 = vadd.f32 %v1947_v39, %v1946_v29 }
 0x125   : > { %v2028_v53 = vadd.f32 %v2027_v45, %v2026_v36  ;;  %v1949_v56 = vpop.f32.mrf.mxu0 }
 0x126   : > { %v2029_v61 = vpop.f32.mrf.mxu1  ;;  %v1108_v2 = vadd.f32 %v1948_v52, %v3204_v57 }
 0x127   : > { %v1950_v5 = vpop.f32.mrf.mxu0 }
 0x128   : > { %v2030_v15 = vpop.f32.mrf.mxu1  ;;  %v3243_v21 = vadd.f32 %v2028_v53, %v1108_v2  ;;  %v1951_v24 = vadd.f32 %v1950_v5, %v1949_v56 }
 0x129   : > { %v2031_v26 = vadd.f32 %v2030_v15, %v2029_v61  ;;  %v1952_v27 = vpop.f32.mrf.mxu0 }
 0x12a   : > { %3420 = vst [vmem:[#allocation6_spill] sm:$0xff] %v3243_v21  ;;  %v2032_v32 = vpop.f32.mrf.mxu1  ;;  %v1113_v33 = vadd.f32 %v1951_v24, %v3204_v57 }
 0x12b   : > { %v1953_v34 = vpop.f32.mrf.mxu0 }
 0x12c   : > { %v2033_v37 = vpop.f32.mrf.mxu1  ;;  %v3246_v40 = vadd.f32 %v2031_v26, %v1113_v33  ;;  %v1954_v47 = vadd.f32 %v1953_v34, %v1952_v27 }
 0x12d   : > { %v2034_v48 = vadd.f32 %v2033_v37, %v2032_v32  ;;  %v1955_v41 = vpop.f32.mrf.mxu0 }
 0x12e   : > { %3421 = vst [vmem:[#allocation7_spill] sm:$0xff] %v3246_v40  ;;  %v2035_v49 = vpop.f32.mrf.mxu1  ;;  %v1118_v51 = vadd.f32 %v1954_v47, %v3204_v57 }
 0x12f   : > { %v1956_v58 = vpop.f32.mrf.mxu0 }
 0x130   : > { %v2036_v59 = vpop.f32.mrf.mxu1  ;;  %v3249_v3 = vadd.f32 %v2034_v48, %v1118_v51  ;;  %v1957_v4 = vadd.f32 %v1956_v58, %v1955_v41 }
 0x131   : > { %v2037_v10 = vadd.f32 %v2036_v59, %v2035_v49  ;;  %v2070_v11 = vpop.f32.mrf.mxu0 }
 0x132   : > { %3422 = vst [vmem:[#allocation8_spill] sm:$0xff] %v3249_v3  ;;  %v3251_v17 = vpop.f32.mrf.mxu1  ;;  %v1123_v18 = vadd.f32 %v1957_v4, %v3204_v57 }
 0x133   : > { %v2071_v20 = vpop.f32.mrf.mxu0 }
 0x134   : > { %v3254_v31 = vpop.f32.mrf.mxu1  ;;  %v3256_v43 = vadd.f32 %v2037_v10, %v1123_v18 }
 0x135   : > { %v2073_v44 = vpop.f32.mrf.mxu0 }
 0x136   : > { %3423 = vst [vmem:[#allocation9_spill] sm:$0xff] %v3256_v43  ;;  %v3258_v54 = vpop.f32.mrf.mxu1 }
 0x137   : > { %v2074_v55 = vpop.f32.mrf.mxu0 }
 0x138   : > { %v3260_v62 = vpop.f32.mrf.mxu1  ;;  %v2075_v63 = vadd.f32 %v2074_v55, %v2073_v44 }
 0x139   : > { %v2076_v0 = vpop.f32.mrf.mxu0 }
 0x13a   : > { %v3262_v6 = vpop.f32.mrf.mxu1 }
 0x13b   : > { %v2077_v7 = vpop.f32.mrf.mxu0 }
 0x13c   : > { %v3264_v8 = vpop.f32.mrf.mxu1  ;;  %v2078_v21 = vadd.f32 %v2077_v7, %v2076_v0 }
 0x13d   : > { %v2079_v9 = vpop.f32.mrf.mxu0 }
 0x13e   : > { %v3266_v13 = vpop.f32.mrf.mxu1 }
 0x13f   : > { %v2080_v57 = vpop.f32.mrf.mxu0 }
 0x140   : > { %v3268_v14 = vpop.f32.mrf.mxu1 }
 0x141   : > { %v3270_v16 = vpop.f32.mrf.mxu0 }
 0x142   : > { %v3272_v23 = vpop.f32.mrf.mxu1 }
 0x143   : > { %3424 = vst [vmem:[#allocation10_spill] sm:$0xff] %v3272_v23  ;;  %v3274_v28 = vpop.f32.mrf.mxu0 }
 0x144   : > { %v3276_v29 = vpop.f32.mrf.mxu1 }
 0x145   : > { %3425 = vst [vmem:[#allocation11_spill] sm:$0xff] %v3276_v29  ;;  %v3278_v36 = vpop.f32.mrf.mxu0 }
 0x146   : > { %v3280_v38 = vpop.f32.mrf.mxu1 }
 0x147   : > { %3426 = vst [vmem:[#allocation12_spill] sm:$0xff] %v3280_v38  ;;  %v3282_v39 = vpop.f32.mrf.mxu0 }
 0x148   : > { %v3284_v45 = vpop.f32.mrf.mxu1 }
 0x149   : > { %3427 = vst [vmem:[#allocation13_spill] sm:$0xff] %v3284_v45  ;;  %v3286_v52 = vpop.f32.mrf.mxu0  ;;  %v2081_v45 = vadd.f32 %v2080_v57, %v2079_v9  ;;  %v2155_v9 = vadd.f32 %v3260_v62, %v3258_v54 }
 0x14a   : > { %3428 = vst [vmem:[#allocation14_spill] sm:$0xff] %v3286_v52  ;;  %v3288_v53 = vpop.f32.mrf.mxu1 }
 0x14b   : > { %3429 = vst [vmem:[#allocation15_spill] sm:$0xff] %v3288_v53  ;;  %v3290_v56 = vpop.f32.mrf.mxu0  ;;  %v1353_v57 = vadd.f32 %v2081_v45, %v3216_v35  ;;  %v2087_v35 = vadd.f32 %v3282_v39, %v3278_v36 }
 0x14c   : > { %3430 = vst [vmem:[#allocation16_spill] sm:$0xff] %v3290_v56  ;;  %v3292_v61 = vpop.f32.mrf.mxu1 }
 0x14d   : > { %3431 = vst [vmem:[#allocation17_spill] sm:$0xff] %v3292_v61  ;;  %v3294_v2 = vpop.f32.mrf.mxu0  ;;  %v1363_v39 = vadd.f32 %v2087_v35, %v3222_v25  ;;  %v3446_v35 = vld [vmem:[#allocation4_spill] sm:$0xff] }
 0x14e   : > { %v3296_v5 = vpop.f32.mrf.mxu1 }
 0x14f   : > { %3432 = vst [vmem:[#allocation18_spill] sm:$0xff] %v3296_v5  ;;  %v3298_v15 = vpop.f32.mrf.mxu0  ;;  %v2072_v5 = vadd.f32 %v2071_v20, %v2070_v11  ;;  %v2152_v11 = vadd.f32 %v3254_v31, %v3251_v17  ;;  %v1343_v20 = vadd.f32 %v2075_v63, %v3210_v60  ;;  %v2158_v60 = vadd.f32 %v3264_v8, %v3262_v6 }
 0x150   : > { %v3300_v24 = vpop.f32.mrf.mxu1  ;;  %v2084_v63 = vadd.f32 %v3274_v28, %v3270_v16  ;;  %v3437_v25 = vld [vmem:[#allocation13_spill] sm:$0xff] }
 0x151   : > { %3433 = vst [vmem:[#allocation19_spill] sm:$0xff] %v3300_v24  ;;  %v2094_v26 = vpop.f32.mrf.mxu0  ;;  %v1338_v52 = vadd.f32 %v2072_v5, %v3207_v19  ;;  %v1348_v19 = vadd.f32 %v2078_v21, %v3213_v12  ;;  %v2161_v21 = vadd.f32 %v3268_v14, %v3266_v13  ;;  %v1488_v45 = vadd.f32 %v2155_v9, %v1343_v20  ;;  %v3442_v9 = vld [vmem:[#allocation11_spill] sm:$0xff] }
 0x152   : > { %v2174_v27 = vpop.f32.mrf.mxu1  ;;  %v1358_v28 = vadd.f32 %v2084_v63, %v3219_v50 }
 0x153   : > { %v2095_v32 = vpop.f32.mrf.mxu0  ;;  %v1483_v17 = vadd.f32 %v2152_v11, %v1338_v52  ;;  %v1493_v8 = vadd.f32 %v2158_v60, %v1348_v19  ;;  %v1498_v16 = vadd.f32 %v2161_v21, %v1353_v57  ;;  %v3445_v21 = vld [vmem:[#allocation9_spill] sm:$0xff] }
 0x154   : > { %v2175_v33 = vpop.f32.mrf.mxu1  ;;  %v2096_v40 = vadd.f32 %v2095_v32, %v2094_v26 }
 0x155   : > { %v2097_v34 = vpop.f32.mrf.mxu0  ;;  %v2176_v52 = vadd.f32 %v2175_v33, %v2174_v27  ;;  %v2093_v27 = vadd.f32 %v3298_v15, %v3294_v2  ;;  %v3439_v2 = vld [vmem:[#allocation16_spill] sm:$0xff] }
 0x156   : > { %v2177_v37 = vpop.f32.mrf.mxu1  ;;  %v1378_v12 = vadd.f32 %v2096_v40, %v3231_v30 }
 0x157   : > { %v2098_v47 = vpop.f32.mrf.mxu0 }
 0x158   : > { %v2178_v48 = vpop.f32.mrf.mxu1  ;;  %v2099_v56 = vadd.f32 %v2098_v47, %v2097_v34  ;;  %v3435_v34 = vld [vmem:[#allocation7_spill] sm:$0xff] }
 0x159   : > { %v2100_v41 = vpop.f32.mrf.mxu0 }
 0x15a   : > { %v3302_v49 = vpop.f32.mrf.mxu1  ;;  %v1383_v7 = vadd.f32 %v2099_v56, %v3234_v1  ;;  %v2179_v1 = vadd.f32 %v2178_v48, %v2177_v37 }
 0x15b   : > { %v2101_v51 = vpop.f32.mrf.mxu0 }
 0x15c   : > { %v3304_v58 = vpop.f32.mrf.mxu1  ;;  %v2102_v5 = vadd.f32 %v2101_v51, %v2100_v41  ;;  %v1528_v6 = vadd.f32 %v2179_v1, %v1383_v7  ;;  %v3436_v41 = vld [vmem:[#allocation12_spill] sm:$0xff]  ;;  %v3441_v7 = vld [vmem:[#allocation10_spill] sm:$0xff] }
 0x15d   : > { %v2103_v59 = vpop.f32.mrf.mxu0  ;;  %v2167_v51 = vadd.f32 %v3437_v25, %v3436_v41  ;;  %v2164_v57 = vadd.f32 %v3442_v9, %v3441_v7 }
 0x15e   : > { %v2183_v4 = vpop.f32.mrf.mxu1  ;;  %v1388_v30 = vadd.f32 %v2102_v5, %v3237_v22  ;;  %v2182_v22 = vadd.f32 %v3304_v58, %v3302_v49  ;;  %v3443_v5 = vld [vmem:[#allocation5_spill] sm:$0xff] }
 0x15f   : > { %v2104_v10 = vpop.f32.mrf.mxu0  ;;  %v1508_v1 = vadd.f32 %v2167_v51, %v1363_v39 }
 0x160   : > { %v2184_v18 = vpop.f32.mrf.mxu1  ;;  %v2105_v44 = vadd.f32 %v2104_v10, %v2103_v59  ;;  %v3438_v59 = vld [vmem:[#allocation14_spill] sm:$0xff] }
 0x161   : > { %v2106_v61 = vpop.f32.mrf.mxu0  ;;  %v2185_v40 = vadd.f32 %v2184_v18, %v2183_v4  ;;  %v2090_v15 = vadd.f32 %v3439_v2, %v3438_v59  ;;  %v3440_v4 = vld [vmem:[#allocation6_spill] sm:$0xff]  ;;  %v1533_v18 = vadd.f32 %v2182_v22, %v1388_v30 }
 0x162   : > { %v3307_v53 = vpop.f32.mrf.mxu1  ;;  %v1393_v31 = vadd.f32 %v2105_v44, %v3240_v46 }
 0x163   : > { %3434 = vst [vmem:[#allocation20_spill] sm:$0xff] %v3307_v53  ;;  %v2107_v3 = vpop.f32.mrf.mxu0 }
 0x164   : > { %v3309_v24 = vpop.f32.mrf.mxu1  ;;  %v2108_v13 = vadd.f32 %v2107_v3, %v2106_v61  ;;  %v1538_v61 = vadd.f32 %v2185_v40, %v1393_v31  ;;  %v1368_v31 = vadd.f32 %v2090_v15, %v3446_v35  ;;  %v3449_v40 = vld [vmem:[#allocation8_spill] sm:$0xff] }
 0x165   : > { %v2109_v42 = vpop.f32.mrf.mxu0 }
 0x166   : > { %v3311_v43 = vpop.f32.mrf.mxu1  ;;  %v1398_v49 = vadd.f32 %v2108_v13, %v3440_v4 }
 0x167   : > { %v2110_v29 = vpop.f32.mrf.mxu0 }
 0x168   : > { %v3313_v23 = vpop.f32.mrf.mxu1  ;;  %v2111_v56 = vadd.f32 %v2110_v29, %v2109_v42  ;;  %v1523_v29 = vadd.f32 %v2176_v52, %v1378_v12 }
 0x169   : > { %v2112_v53 = vpop.f32.mrf.mxu0  ;;  %v2191_v11 = vadd.f32 %v3313_v23, %v3311_v43 }
 0x16a   : > { %v3316_v38 = vpop.f32.mrf.mxu1  ;;  %v1403_v37 = vadd.f32 %v2111_v56, %v3435_v34 }
 0x16b   : > { %v2113_v55 = vpop.f32.mrf.mxu0 }
 0x16c   : > { %v3325_v0 = vpop.f32.mrf.mxu1  ;;  %v2114_v20 = vadd.f32 %v2113_v55, %v2112_v53  ;;  %v1548_v55 = vadd.f32 %v2191_v11, %v1403_v37 }
 0x16d   : > { %v2115_v26 = vpop.f32.mrf.mxu0 }
 0x16e   : > { %v3332_v32 = vpop.f32.mrf.mxu1  ;;  %v1408_v13 = vadd.f32 %v2114_v20, %v3449_v40 }
 0x16f   : > { %v2116_v54 = vpop.f32.mrf.mxu0 }
 0x170   : > { %v2196_v62 = vpop.f32.mrf.mxu1  ;;  %v2117_v47 = vadd.f32 %v2116_v54, %v2115_v26  ;;  %v1373_v26 = vadd.f32 %v2093_v27, %v3443_v5  ;;  %v3447_v54 = vld [vmem:[#allocation18_spill] sm:$0xff] }
 0x171   : > { %v2264_v14 = vpop.f32.mrf.mxu0 }
 0x172   : > { %v2276_v46 = vpop.f32.mrf.mxu1  ;;  %v1633_v36 = vadd.f32 %v2264_v14, %v1488_v45  ;;  %v1413_v43 = vadd.f32 %v2117_v47, %v3445_v21  ;;  %v3448_v45 = vld [vmem:[#allocation19_spill] sm:$0xff]  ;;  %v2197_v14 = vadd.f32 %v2196_v62, %v3332_v32 }
 0x173   : > { %v1673_v42 = vadd.f32 %v2276_v46, %v1528_v6  ;;  %v1627_v33 = vpop.f32.mrf.mxu0  ;;  %v2173_v52 = vadd.f32 %v3448_v45, %v3447_v54  ;;  %v1503_v6 = vadd.f32 %v2164_v57, %v1358_v28  ;;  %v2194_v28 = vadd.f32 %v3325_v0, %v3316_v38 }
 0x174   : > { %v1667_v3 = vpop.f32.mrf.mxu1  ;;  %1707 = vst [vmem:[%s3348_s12 + $0x8] sm:$0xff] %v1633_v36  ;;  %v1628_v50 = vadd.f32 %v1627_v33, %v1483_v17  ;;  %v3444_v17 = vld [vmem:[#allocation20_spill] sm:$0xff]  ;;  %v3451_v36 = vld [vmem:[#allocation17_spill] sm:$0xff]  ;;  %v1558_v22 = vadd.f32 %v2197_v14, %v1413_v43 }
 0x175   : > { %1715 = vst [vmem:[%s3348_s12 + $0x48] sm:$0xff] %v1673_v42  ;;  %v1668_v48 = vadd.f32 %v1667_v3, %v1523_v29  ;;  %v2267_v58 = vpop.f32.mrf.mxu0  ;;  %v2188_v60 = vadd.f32 %v3309_v24, %v3444_v17  ;;  %v1518_v27 = vadd.f32 %v2173_v52, %v1373_v26  ;;  %v1553_v47 = vadd.f32 %v2194_v28, %v1408_v13 }
 0x176   : > { %v2279_v10 = vpop.f32.mrf.mxu1  ;;  %1706 = vst [vmem:[%s3348_s12] sm:$0xff] %v1628_v50  ;;  %v1643_v44 = vadd.f32 %v2267_v58, %v1498_v16  ;;  %v3450_v16 = vld [vmem:[#allocation15_spill] sm:$0xff] }
 0x177   : > { %1714 = vst [vmem:[%s3348_s12 + $0x40] sm:$0xff] %v1668_v48  ;;  %v1683_v19 = vadd.f32 %v2279_v10, %v1538_v61  ;;  %v1637_v63 = vpop.f32.mrf.mxu0  ;;  %v1543_v30 = vadd.f32 %v2188_v60, %v1398_v49  ;;  %v2170_v42 = vadd.f32 %v3451_v36, %v3450_v16 }
 0x178   : > { %v1677_v12 = vpop.f32.mrf.mxu1  ;;  %1709 = vst [vmem:[%s3348_s12 + $0x18] sm:$0xff] %v1643_v44  ;;  %v1638_v23 = vadd.f32 %v1637_v63, %v1493_v8 }
 0x179   : > { %1717 = vst [vmem:[%s3348_s12 + $0x58] sm:$0xff] %v1683_v19  ;;  %v1678_v53 = vadd.f32 %v1677_v12, %v1533_v18  ;;  %v2270_v56 = vpop.f32.mrf.mxu0  ;;  %v1513_v37 = vadd.f32 %v2170_v42, %v1368_v31 }
 0x17a   : > { %v2282_v24 = vpop.f32.mrf.mxu1  ;;  %1708 = vst [vmem:[%s3348_s12 + $0x10] sm:$0xff] %v1638_v23  ;;  %v1653_v8 = vadd.f32 %v2270_v56, %v1508_v1 }
 0x17b   : > { %1716 = vst [vmem:[%s3348_s12 + $0x50] sm:$0xff] %v1678_v53  ;;  %v1693_v46 = vadd.f32 %v2282_v24, %v1548_v55  ;;  %v1647_v29 = vpop.f32.mrf.mxu0 }
 0x17c   : > { %v1687_v39 = vpop.f32.mrf.mxu1  ;;  %1711 = vst [vmem:[%s3348_s12 + $0x28] sm:$0xff] %v1653_v8  ;;  %v1648_v32 = vadd.f32 %v1647_v29, %v1503_v6 }
 0x17d   : > { %1719 = vst [vmem:[%s3348_s12 + $0x68] sm:$0xff] %v1693_v46  ;;  %v1688_v62 = vadd.f32 %v1687_v39, %v1543_v30  ;;  %v2273_v33 = vpop.f32.mrf.mxu0 }
 0x17e   : > { %v2285_v3 = vpop.f32.mrf.mxu1  ;;  %1710 = vst [vmem:[%s3348_s12 + $0x20] sm:$0xff] %v1648_v32  ;;  %v1663_v61 = vadd.f32 %v2273_v33, %v1518_v27 }
 0x17f   : > { %1718 = vst [vmem:[%s3348_s12 + $0x60] sm:$0xff] %v1688_v62  ;;  %v1703_v34 = vadd.f32 %v2285_v3, %v1558_v22  ;;  %v1657_v50 = vpop.f32.mrf.mxu0 }
 0x180   : > { %v1697_v48 = vpop.f32.mrf.mxu1  ;;  %1713 = vst [vmem:[%s3348_s12 + $0x38] sm:$0xff] %v1663_v61  ;;  %v1658_v38 = vadd.f32 %v1657_v50, %v1513_v37 }
 0x181   : > { %1721 = vst [vmem:[%s3348_s12 + $0x78] sm:$0xff] %v1703_v34  ;;  %v1698_v0 = vadd.f32 %v1697_v48, %v1553_v47 }
 0x182   : > { %1712 = vst [vmem:[%s3348_s12 + $0x30] sm:$0xff] %v1658_v38 }
 0x183   : > { %1720 = vst [vmem:[%s3348_s12 + $0x70] sm:$0xff] %v1698_v0 }
 0x184 PF: > { %s15_s22 = sadd.s32 1, %s2397_s22   ;;  %s3452_s18 = smov %s2389_s20 }
 0x185   : > { %p12_p9 = scmp.ge.s32.totalorder %s15_s22, 6   ;;  %s3453_s19 = smov %s2393_s21 }
 0x186   : > { %s3454_s20 = smov %s3457_s23  ;;  %s3455_s21 = smov %s3461_s24 }
 0x187   :  { %14 = sbr.rel (!%p12_p9) target bundleno = 3 (0x3), region = 79 }

</bundles_post_ra>
